<compile_context>
chip_gen: v6e
topology: v6e:2x2x1
jax: 0.10.0
libtpu: 0.0.40
codegen_flags: <defaults>
</compile_context>

<pallas_src>
import functools

import jax
import jax.numpy as jnp
from jax.experimental import pallas as pl
from jax.experimental.pallas import tpu as pltpu

F32 = jnp.float32
_INV_SQRT2 = 0.7071067811865476
LN_EPS = 1e-5
LINATT_EPS = 1e-6
OUT_LANES = 128  # lane-dense padded width of the prediction head output
N_LAYER_ROWS = 10
N_FINAL_ROWS = 9


def _gelu_exact(x):
    # matches torch.nn.GELU() / ESM's erf-based gelu
    return 0.5 * x * (1.0 + jax.lax.erf(x * _INV_SQRT2))


def _layernorm(x, g, b):
    mu = jnp.mean(x, axis=-1, keepdims=True)
    var = jnp.mean((x - mu) ** 2, axis=-1, keepdims=True)
    return (x - mu) * jax.lax.rsqrt(var + LN_EPS) * g + b


# --------------------------------------------------------------------------
# Fused kernel: whole model, whole batch, one grid step.
# --------------------------------------------------------------------------

def _fused_dti_kernel(xp_ref, xm_ref, bias_ref, kmask_ref,
                      e_matsA_ref, e_wfc2_ref, m_mats_ref, rows_ref,
                      fmat_ref, frow_ref, o_ref,
                      *, n_layers, heads, dh, e_dim, f_dim, b_sz, tp, lm):
    E = e_dim
    xp = xp_ref[...]            # (B*Tp, E)   protein stream (batch-stacked)
    xm = xm_ref[...]            # (B*Lm, E)   molecule stream (batch-stacked)
    bias = bias_ref[...]        # (B*Tp, B*Tp) block-diag + key-padding additive bias
    kmask = kmask_ref[...]      # (B*Lm, 1)   1.0 at valid molecule keys

    for li in range(n_layers):
        # -------- per-layer weight slabs (static slices of resident VMEM) -----
        eA = e_matsA_ref[li]                       # (E, 3E + E + F)
        e_wqkv = eA[:, :3 * E]                     # q columns pre-scaled
        e_wo = eA[:, 3 * E:4 * E]
        e_wfc1 = eA[:, 4 * E:4 * E + f_dim]
        e_wfc2 = e_wfc2_ref[li]                    # (F, E)
        mM = m_mats_ref[li]                        # (E, 4E)
        m_wqkv = mM[:, :3 * E]
        m_wo = mM[:, 3 * E:4 * E]
        rows = rows_ref[li]                        # (10, 128)
        e_ln1_g = rows[0:1, :E]
        e_ln1_b = rows[1:2, :E]
        e_bqkv = rows[2:3, :3 * E]
        e_bo = rows[3:4, :E]
        e_ln2_g = rows[4:5, :E]
        e_ln2_b = rows[5:6, :E]
        e_bfc1 = rows[6:7, :f_dim]
        e_bfc2 = rows[7:8, :E]
        m_bqkv = rows[8:9, :3 * E]
        m_bo = rows[9:10, :E]

        # ---------------- protein: ESM2 pre-LN self-attention ----------------
        res_p = xp
        h = _layernorm(xp, e_ln1_g, e_ln1_b)
        qkv = jnp.dot(h, e_wqkv, preferred_element_type=F32) + e_bqkv   # (BT, 3E)
        # TODO(synk): ESM2's rotary position embedding on q/k is omitted here.
        attn_p = jnp.zeros_like(xp)
        for hh in range(heads):
            qh = qkv[:, hh * dh:(hh + 1) * dh]
            kh = qkv[:, E + hh * dh:E + (hh + 1) * dh]
            vh = qkv[:, 2 * E + hh * dh:2 * E + (hh + 1) * dh]
            s = jax.lax.dot_general(qh, kh, (((1,), (1,)), ((), ())),
                                    preferred_element_type=F32) + bias   # (BT, BT)
            s = s - jnp.max(s, axis=-1, keepdims=True)
            p = jnp.exp(s)
            p = p * pl.reciprocal(jnp.sum(p, axis=-1, keepdims=True), approx=True)
            oh = jnp.dot(p, vh, preferred_element_type=F32)              # (BT, Dh)
            # W_o folded per head (no scatter matmul)
            attn_p = attn_p + jnp.dot(oh, e_wo[hh * dh:(hh + 1) * dh, :],
                                      preferred_element_type=F32)
        xp = res_p + attn_p + e_bo

        # ---------------- molecule: MolFormer linear attention ----------------
        # TODO(synk): MolFormer's generalized-random-feature map is replaced by
        # the fast_transformers default elu(x)+1 feature map.
        res_m = xm
        qkvm = jnp.dot(xm, m_wqkv, preferred_element_type=F32) + m_bqkv  # (BL, 3E)
        head_outs = []
        for hh in range(heads):
            qh = qkvm[:, hh * dh:(hh + 1) * dh]
            kh = qkvm[:, E + hh * dh:E + (hh + 1) * dh]
            vh = qkvm[:, 2 * E + hh * dh:2 * E + (hh + 1) * dh]
            qf = jnp.where(qh > 0, qh + 1.0, jnp.exp(qh))                # elu(x)+1
            kf = jnp.where(kh > 0, kh + 1.0, jnp.exp(kh)) * kmask
            parts = []
            for b in range(b_sz):                                        # per-batch KV
                s0, s1 = b * lm, (b + 1) * lm
                kfb = kf[s0:s1]
                vhb = vh[s0:s1]
                qfb = qf[s0:s1]
                kv = jax.lax.dot_general(kfb, vhb, (((0,), (0,)), ((), ())),
                                         preferred_element_type=F32)     # (Dh, Dh)
                ksum = jnp.sum(kfb, axis=0, keepdims=True)                # (1, Dh)
                z = pl.reciprocal(
                    jnp.sum(qfb * ksum, axis=-1, keepdims=True) + LINATT_EPS,
                    approx=True)
                parts.append(jnp.dot(qfb, kv, preferred_element_type=F32) * z)
            head_outs.append(jnp.concatenate(parts, axis=0))             # (BL, Dh)
        xm = res_m + jnp.concatenate(head_outs, axis=-1)                  # (BL, E)

        # ---------------- protein: ESM2 FFN sub-block ----------------
        res_p = xp
        h = _layernorm(xp, e_ln2_g, e_ln2_b)
        h = _gelu_exact(jnp.dot(h, e_wfc1, preferred_element_type=F32) + e_bfc1)
        h = jnp.dot(h, e_wfc2, preferred_element_type=F32) + e_bfc2
        xp = res_p + h

        # ----- molecule: out-projection applied to post-residual act (per ref) -----
        xm = xm + jnp.dot(xm, m_wo, preferred_element_type=F32) + m_bo

    # ---------------- final norms + projections ----------------
    fr = frow_ref[...]                               # (9, 128)
    emb_ln_g = fr[0:1, :E]
    emb_ln_b = fr[1:2, :E]
    blk_ln_g = fr[2:3, :E]
    blk_ln_b = fr[3:4, :E]
    mol_lin_b = fr[4:5, :E]
    prot_lin_b = fr[5:6, :E]
    p_b1 = fr[6:7, :E]
    p_b2 = fr[7:8, :E]
    p_bf = fr[8:9, :]                                # (1, 128), lanes 1.. are 0

    fm = fmat_ref[...]                               # (E, 4E + 128)
    mol_lin_w = fm[:, :E]
    prot_lin_w = fm[:, E:2 * E]
    p_w1 = fm[:, 2 * E:3 * E]
    p_w2 = fm[:, 3 * E:4 * E]
    p_wf = fm[:, 4 * E:]                             # (E, 128)

    xp = _layernorm(xp, emb_ln_g, emb_ln_b)
    xm = _layernorm(xm, blk_ln_g, blk_ln_b)
    xm = jnp.dot(xm, mol_lin_w, preferred_element_type=F32) + mol_lin_b   # (BL, E)
    xp = jnp.dot(xp, prot_lin_w, preferred_element_type=F32) + prot_lin_b  # (BT, E)

    # torch.cat(dim=-2) + mean(dim=1)  == (sum_mol + sum_prot) / (Lm + Tp), per batch
    denom = 1.0 / float(lm + tp)
    means = []
    for b in range(b_sz):
        sm = (jnp.sum(xm[b * lm:(b + 1) * lm], axis=0, keepdims=True)
              + jnp.sum(xp[b * tp:(b + 1) * tp], axis=0, keepdims=True))
        means.append(sm * denom)
    mean_x = jnp.concatenate(means, axis=0)                                # (B, E)

    # Pred_net: fc1 -> gelu -> +x -> fc2 -> gelu -> final(z + x_out) -> sigmoid
    h1 = _gelu_exact(jnp.dot(mean_x, p_w1, preferred_element_type=F32) + p_b1)
    h1 = h1 + mean_x
    h2 = _gelu_exact(jnp.dot(h1, p_w2, preferred_element_type=F32) + p_b2)
    z = jnp.dot(h2 + h1, p_wf, preferred_element_type=F32) + p_bf          # (B, 128)
    o_ref[...] = pl.reciprocal(1.0 + jnp.exp(-z), approx=True)


def fused_dti_call(xp_all, xm_all, attn_bias, key_mask, W, cfg, b_sz, tp, lm):
    E = cfg["hidden"]
    H = cfg["heads"]
    Dh = E // H
    NL = cfg["num_layers"]
    Fd = cfg["ffn"]

    kernel = functools.partial(
        _fused_dti_kernel, n_layers=NL, heads=H, dh=Dh, e_dim=E, f_dim=Fd,
        b_sz=b_sz, tp=tp, lm=lm)

    def fullspec(a):
        nd = a.ndim
        return pl.BlockSpec(a.shape, lambda i, _nd=nd: (0,) * _nd)

    args = [xp_all, xm_all, attn_bias, key_mask,
            W["e_matsA"], W["e_wfc2"], W["m_mats"], W["layer_rows"],
            W["final_mats"], W["final_rows"]]

    out = pl.pallas_call(
        kernel,
        out_shape=jax.ShapeDtypeStruct((b_sz, OUT_LANES), F32),
        grid=(1,),                                # batch folded into one step
        in_specs=[fullspec(a) for a in args],
        out_specs=pl.BlockSpec((b_sz, OUT_LANES), lambda i: (0, 0)),
        compiler_params=pltpu.CompilerParams(
            dimension_semantics=("arbitrary",)),
    )(*args)
    return out[:, :1]


# --------------------------------------------------------------------------
# Weight packing (hoisted out of the per-call forward path; run once)
# --------------------------------------------------------------------------

def pack_weights(params, cfg):
    """Pack all weights into 6 lane-friendly slabs; fold q-scale into Wq/bq."""
    E = cfg["hidden"]
    Fd = cfg["ffn"]
    H = cfg["heads"]
    Dh = E // H
    scale = Dh ** -0.5
    el = params["esm_layers"]
    ml = params["mol_layers"]

    def row128(v):
        v = jnp.asarray(v, F32).reshape(1, -1)
        return jnp.pad(v, ((0, 0), (0, 128 - v.shape[1])))

    eA, eF2, mM, rows = [], [], [], []
    for le, lmo in zip(el, ml):
        wq = le["wq"].astype(F32) * scale          # fold 1/sqrt(Dh) into Wq
        wqkv = jnp.concatenate([wq, le["wk"].astype(F32), le["wv"].astype(F32)],
                               axis=1)
        eA.append(jnp.concatenate(
            [wqkv, le["wo"].astype(F32), le["w_fc1"].astype(F32)], axis=1))
        eF2.append(le["w_fc2"].astype(F32))
        m_wqkv = jnp.concatenate(
            [lmo["wq"].astype(F32), lmo["wk"].astype(F32), lmo["wv"].astype(F32)],
            axis=1)
        mM.append(jnp.concatenate([m_wqkv, lmo["wo"].astype(F32)], axis=1))
        e_bqkv = jnp.concatenate([le["bq"].astype(F32) * scale,
                                  le["bk"].astype(F32), le["bv"].astype(F32)])
        m_bqkv = jnp.concatenate([lmo["bq"].astype(F32), lmo["bk"].astype(F32),
                                  lmo["bv"].astype(F32)])
        rows.append(jnp.concatenate([
            row128(le["ln1_g"]), row128(le["ln1_b"]),
            row128(e_bqkv), row128(le["bo"]),
            row128(le["ln2_g"]), row128(le["ln2_b"]),
            row128(le["b_fc1"]), row128(le["b_fc2"]),
            row128(m_bqkv), row128(lmo["bo"]),
        ], axis=0))
        assert rows[-1].shape == (N_LAYER_ROWS, 128)
        assert Fd <= 128 and 3 * E <= 128

    pred = params["pred"]
    p_wf = jnp.pad(pred["wf"].astype(F32),
                   ((0, 0), (0, OUT_LANES - pred["wf"].shape[1])))
    fmat = jnp.concatenate([
        params["mol_lin_w"].astype(F32), params["prot_lin_w"].astype(F32),
        pred["w1"].astype(F32), pred["w2"].astype(F32), p_wf], axis=1)
    frow = jnp.concatenate([
        row128(params["emb_ln_g"]), row128(params["emb_ln_b"]),
        row128(params["blocks_norm_g"]), row128(params["blocks_norm_b"]),
        row128(params["mol_lin_b"]), row128(params["prot_lin_b"]),
        row128(pred["b1"]), row128(pred["b2"]), row128(pred["bf"]),
    ], axis=0)
    assert frow.shape == (N_FINAL_ROWS, 128)

    return {
        "e_matsA": jnp.stack(eA),       # (NL, E, 3E+E+F)
        "e_wfc2": jnp.stack(eF2),       # (NL, F, E)
        "m_mats": jnp.stack(mM),        # (NL, E, 4E)
        "layer_rows": jnp.stack(rows),  # (NL, 10, 128)
        "final_mats": fmat,             # (E, 4E+128)
        "final_rows": frow,             # (9, 128)
        "esm_embed": params["esm_embed"].astype(F32),
        "mol_embed": params["mol_embed"].astype(F32),
    }


# --------------------------------------------------------------------------
# Model wrapper (embedding gathers + mask prep in plain JAX, rest in kernel)
# --------------------------------------------------------------------------

def dti_cross_forward(W, mol, protein, mol_mask, cfg):
    B, Tp = protein.shape
    _, Lm = mol.shape

    # ---- embeddings + ESM2 token-dropout rescaling (gathers; plain JAX) ----
    padding_mask = protein == cfg["padding_idx"]                       # (B, Tp)
    x_p = cfg["embed_scale"] * W["esm_embed"][protein]                 # (B, Tp, E)
    is_mask = protein == cfg["mask_idx"]
    x_p = jnp.where(is_mask[..., None], 0.0, x_p)
    mask_ratio_train = 0.15 * 0.8
    src_lengths = jnp.maximum(jnp.sum(~padding_mask, axis=-1), 1).astype(F32)
    mask_ratio_observed = is_mask.sum(-1).astype(F32) / src_lengths
    x_p = x_p * (1.0 - mask_ratio_train) / (1.0 - mask_ratio_observed)[:, None, None]
    x_p = x_p * (1.0 - padding_mask[..., None].astype(F32))
    x_p = x_p.astype(F32).reshape(B * Tp, -1)                          # batch-stacked

    x_m = W["mol_embed"][mol].astype(F32).reshape(B * Lm, -1)          # batch-stacked

    # block-diagonal (same-batch) + key-padding additive bias for softmax attn
    batch_idx = jnp.repeat(jnp.arange(B), Tp)
    key_ok = (~padding_mask).reshape(-1)
    allowed = (batch_idx[:, None] == batch_idx[None, :]) & key_ok[None, :]
    attn_bias = jnp.where(allowed, 0.0, -1e9).astype(F32)              # (B*Tp, B*Tp)

    mol_lengths = jnp.sum(mol_mask.astype(jnp.int32), axis=-1)
    key_mask = (jnp.arange(Lm)[None, :] < mol_lengths[:, None]).astype(F32)
    key_mask = key_mask.reshape(B * Lm, 1)

    return fused_dti_call(x_p, x_m, attn_bias, key_mask, W, cfg, B, Tp, Lm)


# --------------------------------------------------------------------------
# Deterministic synthetic parameters
# --------------------------------------------------------------------------

def _dense(key, fan_in, fan_out):
    kw, kb = jax.random.split(key)
    w = jax.random.normal(kw, (fan_in, fan_out), F32) * 0.05
    b = jax.random.normal(kb, (fan_out,), F32) * 0.01
    return w, b


def build_params(key, cfg):
    E = cfg["hidden"]
    Fdim = cfg["ffn"]
    keys = jax.random.split(key, 8 + 2 * cfg["num_layers"])
    params = {
        "esm_embed": jax.random.normal(keys[0], (cfg["esm_vocab"], E), F32) * 0.05,
        "mol_embed": jax.random.normal(keys[1], (cfg["mol_vocab"], E), F32) * 0.05,
        "emb_ln_g": jnp.ones((E,), F32), "emb_ln_b": jnp.zeros((E,), F32),
        "blocks_norm_g": jnp.ones((E,), F32), "blocks_norm_b": jnp.zeros((E,), F32),
    }
    params["mol_lin_w"], params["mol_lin_b"] = _dense(keys[2], E, E)
    params["prot_lin_w"], params["prot_lin_b"] = _dense(keys[3], E, E)
    w1, b1 = _dense(keys[4], E, E)
    w2, b2 = _dense(keys[5], E, E)
    wf, bf = _dense(keys[6], E, 1)
    params["pred"] = {"w1": w1, "b1": b1, "w2": w2, "b2": b2, "wf": wf, "bf": bf}

    esm_layers, mol_layers = [], []
    for i in range(cfg["num_layers"]):
        ke = jax.random.split(keys[8 + 2 * i], 6)
        wq, bq = _dense(ke[0], E, E)
        wk, bk = _dense(ke[1], E, E)
        wv, bv = _dense(ke[2], E, E)
        wo, bo = _dense(ke[3], E, E)
        wf1, bf1 = _dense(ke[4], E, Fdim)
        wf2, bf2 = _dense(ke[5], Fdim, E)
        esm_layers.append({
            "ln1_g": jnp.ones((E,), F32), "ln1_b": jnp.zeros((E,), F32),
            "ln2_g": jnp.ones((E,), F32), "ln2_b": jnp.zeros((E,), F32),
            "wq": wq, "bq": bq, "wk": wk, "bk": bk, "wv": wv, "bv": bv,
            "wo": wo, "bo": bo,
            "w_fc1": wf1, "b_fc1": bf1, "w_fc2": wf2, "b_fc2": bf2,
        })
        km = jax.random.split(keys[9 + 2 * i], 4)
        mwq, mbq = _dense(km[0], E, E)
        mwk, mbk = _dense(km[1], E, E)
        mwv, mbv = _dense(km[2], E, E)
        mwo, mbo = _dense(km[3], E, E)
        mol_layers.append({"wq": mwq, "bq": mbq, "wk": mwk, "bk": mbk,
                           "wv": mwv, "bv": mbv, "wo": mwo, "bo": mbo})
    params["esm_layers"] = esm_layers
    params["mol_layers"] = mol_layers
    return params


# --------------------------------------------------------------------------

if __name__ == "__main__":
    cfg = {
        "hidden": 32,          # config.hidden_size == backbone embed dims
        "heads": 4,
        "ffn": 64,
        "num_layers": 2,
        "esm_vocab": 33,
        "mol_vocab": 40,
        "padding_idx": 1,
        "mask_idx": 32,
        "embed_scale": 1.0,
    }
    B, Tp, Lm = 2, 12, 8

    key = jax.random.PRNGKey(0)
    kparam, kprot, kmol = jax.random.split(key, 3)
    params = build_params(kparam, cfg)
    packed = pack_weights(params, cfg)   # packed ONCE, outside the forward path

    protein = jax.random.randint(kprot, (B, Tp), 4, 31, dtype=jnp.int32)
    protein = protein.at[0, Tp - 2:].set(cfg["padding_idx"])   # some padding
    protein = protein.at[1, 3].set(cfg["mask_idx"])            # one <mask> token

    mol = jax.random.randint(kmol, (B, Lm), 0, cfg["mol_vocab"], dtype=jnp.int32)
    mol_lengths = jnp.array([Lm, Lm - 2], dtype=jnp.int32)
    mol_mask = (jnp.arange(Lm)[None, :] < mol_lengths[:, None])

    out = dti_cross_forward(packed, mol, protein, mol_mask, cfg)
    out = jax.block_until_ready(out)
    assert out.shape == (B, 1)
    assert bool(jnp.all(jnp.isfinite(out)))
    print("KERNEL_OK")
</pallas_src>

<mosaic_0001>
module attributes {stable_mosaic.version = 11 : i64} {
  func.func @_fused_dti_kernel(%arg0: i32, %arg1: memref<24x32xf32, #tpu.memory_space<vmem>>, %arg2: memref<16x32xf32, #tpu.memory_space<vmem>>, %arg3: memref<24x24xf32, #tpu.memory_space<vmem>>, %arg4: memref<16x1xf32, #tpu.memory_space<vmem>>, %arg5: memref<2x32x192xf32, #tpu.memory_space<vmem>>, %arg6: memref<2x64x32xf32, #tpu.memory_space<vmem>>, %arg7: memref<2x32x128xf32, #tpu.memory_space<vmem>>, %arg8: memref<2x10x128xf32, #tpu.memory_space<vmem>>, %arg9: memref<32x256xf32, #tpu.memory_space<vmem>>, %arg10: memref<9x128xf32, #tpu.memory_space<vmem>>, %arg11: memref<2x128xf32, #tpu.memory_space<vmem>>) attributes {dimension_semantics = [#tpu.dimension_semantics<arbitrary>], iteration_bounds = array<i64: 1>, scalar_prefetch = 0 : i64, scratch_operands = 0 : i64, tpu.core_type = #tpu.core_type<tc>, window_params = [{pipeline_mode = #tpu.pipeline_mode<synchronous>, transform_indices = @transform_0, window_bounds = array<i64: 24, 32>}, {pipeline_mode = #tpu.pipeline_mode<synchronous>, transform_indices = @transform_1, window_bounds = array<i64: 16, 32>}, {pipeline_mode = #tpu.pipeline_mode<synchronous>, transform_indices = @transform_2, window_bounds = array<i64: 24, 24>}, {pipeline_mode = #tpu.pipeline_mode<synchronous>, transform_indices = @transform_3, window_bounds = array<i64: 16, 1>}, {pipeline_mode = #tpu.pipeline_mode<synchronous>, transform_indices = @transform_4, window_bounds = array<i64: 2, 32, 192>}, {pipeline_mode = #tpu.pipeline_mode<synchronous>, transform_indices = @transform_5, window_bounds = array<i64: 2, 64, 32>}, {pipeline_mode = #tpu.pipeline_mode<synchronous>, transform_indices = @transform_6, window_bounds = array<i64: 2, 32, 128>}, {pipeline_mode = #tpu.pipeline_mode<synchronous>, transform_indices = @transform_7, window_bounds = array<i64: 2, 10, 128>}, {pipeline_mode = #tpu.pipeline_mode<synchronous>, transform_indices = @transform_8, window_bounds = array<i64: 32, 256>}, {pipeline_mode = #tpu.pipeline_mode<synchronous>, transform_indices = @transform_9, window_bounds = array<i64: 9, 128>}, {pipeline_mode = #tpu.pipeline_mode<synchronous>, transform_indices = @transform_10, window_bounds = array<i64: 2, 128>}]} {
    %c0 = arith.constant 0 : index
    %c0_0 = arith.constant 0 : index
    %0 = vector.load %arg1[%c0, %c0_0] : memref<24x32xf32, #tpu.memory_space<vmem>>, vector<24x32xf32>
    %c0_1 = arith.constant 0 : index
    %c0_2 = arith.constant 0 : index
    %1 = vector.load %arg2[%c0_1, %c0_2] : memref<16x32xf32, #tpu.memory_space<vmem>>, vector<16x32xf32>
    %c0_3 = arith.constant 0 : index
    %c0_4 = arith.constant 0 : index
    %2 = vector.load %arg3[%c0_3, %c0_4] : memref<24x24xf32, #tpu.memory_space<vmem>>, vector<24x24xf32>
    %c0_5 = arith.constant 0 : index
    %c0_6 = arith.constant 0 : index
    %3 = vector.load %arg4[%c0_5, %c0_6] : memref<16x1xf32, #tpu.memory_space<vmem>>, vector<16x1xf32>
    %c0_7 = arith.constant 0 : index
    %c0_8 = arith.constant 0 : index
    %c0_9 = arith.constant 0 : index
    %4 = vector.load %arg5[%c0_7, %c0_8, %c0_9] : memref<2x32x192xf32, #tpu.memory_space<vmem>>, vector<1x32x192xf32>
    %5 = vector.shape_cast %4 : vector<1x32x192xf32> to vector<32x192xf32>
    %6 = vector.extract_strided_slice %5 {offsets = [0, 0], sizes = [32, 96], strides = [1, 1]} : vector<32x192xf32> to vector<32x96xf32>
    %7 = vector.extract_strided_slice %5 {offsets = [0, 96], sizes = [32, 32], strides = [1, 1]} : vector<32x192xf32> to vector<32x32xf32>
    %8 = vector.extract_strided_slice %5 {offsets = [0, 128], sizes = [32, 64], strides = [1, 1]} : vector<32x192xf32> to vector<32x64xf32>
    %c0_10 = arith.constant 0 : index
    %c0_11 = arith.constant 0 : index
    %c0_12 = arith.constant 0 : index
    %9 = vector.load %arg6[%c0_10, %c0_11, %c0_12] : memref<2x64x32xf32, #tpu.memory_space<vmem>>, vector<1x64x32xf32>
    %10 = vector.shape_cast %9 : vector<1x64x32xf32> to vector<64x32xf32>
    %c0_13 = arith.constant 0 : index
    %c0_14 = arith.constant 0 : index
    %c0_15 = arith.constant 0 : index
    %11 = vector.load %arg7[%c0_13, %c0_14, %c0_15] : memref<2x32x128xf32, #tpu.memory_space<vmem>>, vector<1x32x128xf32>
    %12 = vector.shape_cast %11 : vector<1x32x128xf32> to vector<32x128xf32>
    %13 = vector.extract_strided_slice %12 {offsets = [0, 0], sizes = [32, 96], strides = [1, 1]} : vector<32x128xf32> to vector<32x96xf32>
    %14 = vector.extract_strided_slice %12 {offsets = [0, 96], sizes = [32, 32], strides = [1, 1]} : vector<32x128xf32> to vector<32x32xf32>
    %c0_16 = arith.constant 0 : index
    %c0_17 = arith.constant 0 : index
    %c0_18 = arith.constant 0 : index
    %15 = vector.load %arg8[%c0_16, %c0_17, %c0_18] : memref<2x10x128xf32, #tpu.memory_space<vmem>>, vector<1x10x128xf32>
    %16 = vector.shape_cast %15 : vector<1x10x128xf32> to vector<10x128xf32>
    %17 = vector.extract_strided_slice %16 {offsets = [0, 0], sizes = [1, 32], strides = [1, 1]} : vector<10x128xf32> to vector<1x32xf32>
    %18 = vector.extract_strided_slice %16 {offsets = [1, 0], sizes = [1, 32], strides = [1, 1]} : vector<10x128xf32> to vector<1x32xf32>
    %19 = vector.extract_strided_slice %16 {offsets = [2, 0], sizes = [1, 96], strides = [1, 1]} : vector<10x128xf32> to vector<1x96xf32>
    %20 = vector.extract_strided_slice %16 {offsets = [3, 0], sizes = [1, 32], strides = [1, 1]} : vector<10x128xf32> to vector<1x32xf32>
    %21 = vector.extract_strided_slice %16 {offsets = [4, 0], sizes = [1, 32], strides = [1, 1]} : vector<10x128xf32> to vector<1x32xf32>
    %22 = vector.extract_strided_slice %16 {offsets = [5, 0], sizes = [1, 32], strides = [1, 1]} : vector<10x128xf32> to vector<1x32xf32>
    %23 = vector.extract_strided_slice %16 {offsets = [6, 0], sizes = [1, 64], strides = [1, 1]} : vector<10x128xf32> to vector<1x64xf32>
    %24 = vector.extract_strided_slice %16 {offsets = [7, 0], sizes = [1, 32], strides = [1, 1]} : vector<10x128xf32> to vector<1x32xf32>
    %25 = vector.extract_strided_slice %16 {offsets = [8, 0], sizes = [1, 96], strides = [1, 1]} : vector<10x128xf32> to vector<1x96xf32>
    %26 = vector.extract_strided_slice %16 {offsets = [9, 0], sizes = [1, 32], strides = [1, 1]} : vector<10x128xf32> to vector<1x32xf32>
    %cst = arith.constant dense<0.000000e+00> : vector<24xf32>
    %27 = vector.multi_reduction <add>, %0, %cst [1] : vector<24x32xf32> to vector<24xf32>
    %28 = vector.shape_cast %27 : vector<24xf32> to vector<24x1xf32>
    %cst_19 = arith.constant 3.200000e+01 : f32
    %29 = vector.broadcast %cst_19 : f32 to vector<24x1xf32>
    %30 = arith.divf %28, %29 : vector<24x1xf32>
    %31 = vector.broadcast %30 : vector<24x1xf32> to vector<24x32xf32>
    %32 = arith.subf %0, %31 : vector<24x32xf32>
    %33 = arith.mulf %32, %32 : vector<24x32xf32>
    %cst_20 = arith.constant dense<0.000000e+00> : vector<24xf32>
    %34 = vector.multi_reduction <add>, %33, %cst_20 [1] : vector<24x32xf32> to vector<24xf32>
    %35 = vector.shape_cast %34 : vector<24xf32> to vector<24x1xf32>
    %cst_21 = arith.constant 3.200000e+01 : f32
    %36 = vector.broadcast %cst_21 : f32 to vector<24x1xf32>
    %37 = arith.divf %35, %36 : vector<24x1xf32>
    %38 = vector.broadcast %30 : vector<24x1xf32> to vector<24x32xf32>
    %39 = arith.subf %0, %38 : vector<24x32xf32>
    %cst_22 = arith.constant 9.99999974E-6 : f32
    %40 = vector.broadcast %cst_22 : f32 to vector<24x1xf32>
    %41 = arith.addf %37, %40 : vector<24x1xf32>
    %42 = math.rsqrt %41 : vector<24x1xf32>
    %43 = vector.broadcast %42 : vector<24x1xf32> to vector<24x32xf32>
    %44 = arith.mulf %39, %43 : vector<24x32xf32>
    %45 = vector.broadcast %17 : vector<1x32xf32> to vector<24x32xf32>
    %46 = arith.mulf %44, %45 : vector<24x32xf32>
    %47 = vector.broadcast %18 : vector<1x32xf32> to vector<24x32xf32>
    %48 = arith.addf %46, %47 : vector<24x32xf32>
    %cst_23 = arith.constant dense<0.000000e+00> : vector<24x96xf32>
    %49 = tpu.matmul %48, %6, %cst_23 {dimension_numbers = #tpu.dot_dimension_numbers<[1], [0], [0], [1], [0, 0, 1, 1], [], []>} : vector<24x32xf32>, vector<32x96xf32>, vector<24x96xf32> -> vector<24x96xf32>
    %50 = vector.broadcast %19 : vector<1x96xf32> to vector<24x96xf32>
    %51 = arith.addf %49, %50 : vector<24x96xf32>
    %cst_24 = arith.constant 0.000000e+00 : f32
    %52 = vector.broadcast %cst_24 : f32 to vector<24x32xf32>
    %53 = vector.extract_strided_slice %51 {offsets = [0, 0], sizes = [24, 8], strides = [1, 1]} : vector<24x96xf32> to vector<24x8xf32>
    %54 = vector.extract_strided_slice %51 {offsets = [0, 32], sizes = [24, 8], strides = [1, 1]} : vector<24x96xf32> to vector<24x8xf32>
    %55 = vector.extract_strided_slice %51 {offsets = [0, 64], sizes = [24, 8], strides = [1, 1]} : vector<24x96xf32> to vector<24x8xf32>
    %cst_25 = arith.constant dense<0.000000e+00> : vector<24x24xf32>
    %56 = tpu.matmul %53, %54, %cst_25 {dimension_numbers = #tpu.dot_dimension_numbers<[1], [1], [0], [0], [0, 0, 1, 0], [], []>} : vector<24x8xf32>, vector<24x8xf32>, vector<24x24xf32> -> vector<24x24xf32>
    %57 = arith.addf %56, %2 : vector<24x24xf32>
    %cst_26 = arith.constant dense<0xFF800000> : vector<24xf32>
    %58 = vector.multi_reduction <maximumf>, %57, %cst_26 [1] : vector<24x24xf32> to vector<24xf32>
    %59 = vector.shape_cast %58 : vector<24xf32> to vector<24x1xf32>
    %60 = vector.broadcast %59 : vector<24x1xf32> to vector<24x24xf32>
    %61 = arith.subf %57, %60 : vector<24x24xf32>
    %62 = math.exp %61 : vector<24x24xf32>
    %cst_27 = arith.constant dense<0.000000e+00> : vector<24xf32>
    %63 = vector.multi_reduction <add>, %62, %cst_27 [1] : vector<24x24xf32> to vector<24xf32>
    %64 = vector.shape_cast %63 : vector<24xf32> to vector<24x1xf32>
    %65 = tpu.reciprocal %64 {approx = true} : vector<24x1xf32> -> vector<24x1xf32>
    %66 = vector.broadcast %65 : vector<24x1xf32> to vector<24x24xf32>
    %67 = arith.mulf %62, %66 : vector<24x24xf32>
    %cst_28 = arith.constant dense<0.000000e+00> : vector<24x8xf32>
    %68 = tpu.matmul %67, %55, %cst_28 {dimension_numbers = #tpu.dot_dimension_numbers<[1], [0], [0], [1], [0, 0, 1, 1], [], []>} : vector<24x24xf32>, vector<24x8xf32>, vector<24x8xf32> -> vector<24x8xf32>
    %69 = vector.extract_strided_slice %7 {offsets = [0, 0], sizes = [8, 32], strides = [1, 1]} : vector<32x32xf32> to vector<8x32xf32>
    %cst_29 = arith.constant dense<0.000000e+00> : vector<24x32xf32>
    %70 = tpu.matmul %68, %69, %cst_29 {dimension_numbers = #tpu.dot_dimension_numbers<[1], [0], [0], [1], [0, 0, 1, 1], [], []>} : vector<24x8xf32>, vector<8x32xf32>, vector<24x32xf32> -> vector<24x32xf32>
    %71 = arith.addf %52, %70 : vector<24x32xf32>
    %72 = vector.extract_strided_slice %51 {offsets = [0, 8], sizes = [24, 8], strides = [1, 1]} : vector<24x96xf32> to vector<24x8xf32>
    %73 = vector.extract_strided_slice %51 {offsets = [0, 40], sizes = [24, 8], strides = [1, 1]} : vector<24x96xf32> to vector<24x8xf32>
    %74 = vector.extract_strided_slice %51 {offsets = [0, 72], sizes = [24, 8], strides = [1, 1]} : vector<24x96xf32> to vector<24x8xf32>
    %cst_30 = arith.constant dense<0.000000e+00> : vector<24x24xf32>
    %75 = tpu.matmul %72, %73, %cst_30 {dimension_numbers = #tpu.dot_dimension_numbers<[1], [1], [0], [0], [0, 0, 1, 0], [], []>} : vector<24x8xf32>, vector<24x8xf32>, vector<24x24xf32> -> vector<24x24xf32>
    %76 = arith.addf %75, %2 : vector<24x24xf32>
    %cst_31 = arith.constant dense<0xFF800000> : vector<24xf32>
    %77 = vector.multi_reduction <maximumf>, %76, %cst_31 [1] : vector<24x24xf32> to vector<24xf32>
    %78 = vector.shape_cast %77 : vector<24xf32> to vector<24x1xf32>
    %79 = vector.broadcast %78 : vector<24x1xf32> to vector<24x24xf32>
    %80 = arith.subf %76, %79 : vector<24x24xf32>
    %81 = math.exp %80 : vector<24x24xf32>
    %cst_32 = arith.constant dense<0.000000e+00> : vector<24xf32>
    %82 = vector.multi_reduction <add>, %81, %cst_32 [1] : vector<24x24xf32> to vector<24xf32>
    %83 = vector.shape_cast %82 : vector<24xf32> to vector<24x1xf32>
    %84 = tpu.reciprocal %83 {approx = true} : vector<24x1xf32> -> vector<24x1xf32>
    %85 = vector.broadcast %84 : vector<24x1xf32> to vector<24x24xf32>
    %86 = arith.mulf %81, %85 : vector<24x24xf32>
    %cst_33 = arith.constant dense<0.000000e+00> : vector<24x8xf32>
    %87 = tpu.matmul %86, %74, %cst_33 {dimension_numbers = #tpu.dot_dimension_numbers<[1], [0], [0], [1], [0, 0, 1, 1], [], []>} : vector<24x24xf32>, vector<24x8xf32>, vector<24x8xf32> -> vector<24x8xf32>
    %88 = vector.extract_strided_slice %7 {offsets = [8, 0], sizes = [8, 32], strides = [1, 1]} : vector<32x32xf32> to vector<8x32xf32>
    %cst_34 = arith.constant dense<0.000000e+00> : vector<24x32xf32>
    %89 = tpu.matmul %87, %88, %cst_34 {dimension_numbers = #tpu.dot_dimension_numbers<[1], [0], [0], [1], [0, 0, 1, 1], [], []>} : vector<24x8xf32>, vector<8x32xf32>, vector<24x32xf32> -> vector<24x32xf32>
    %90 = arith.addf %71, %89 : vector<24x32xf32>
    %91 = vector.extract_strided_slice %51 {offsets = [0, 16], sizes = [24, 8], strides = [1, 1]} : vector<24x96xf32> to vector<24x8xf32>
    %92 = vector.extract_strided_slice %51 {offsets = [0, 48], sizes = [24, 8], strides = [1, 1]} : vector<24x96xf32> to vector<24x8xf32>
    %93 = vector.extract_strided_slice %51 {offsets = [0, 80], sizes = [24, 8], strides = [1, 1]} : vector<24x96xf32> to vector<24x8xf32>
    %cst_35 = arith.constant dense<0.000000e+00> : vector<24x24xf32>
    %94 = tpu.matmul %91, %92, %cst_35 {dimension_numbers = #tpu.dot_dimension_numbers<[1], [1], [0], [0], [0, 0, 1, 0], [], []>} : vector<24x8xf32>, vector<24x8xf32>, vector<24x24xf32> -> vector<24x24xf32>
    %95 = arith.addf %94, %2 : vector<24x24xf32>
    %cst_36 = arith.constant dense<0xFF800000> : vector<24xf32>
    %96 = vector.multi_reduction <maximumf>, %95, %cst_36 [1] : vector<24x24xf32> to vector<24xf32>
    %97 = vector.shape_cast %96 : vector<24xf32> to vector<24x1xf32>
    %98 = vector.broadcast %97 : vector<24x1xf32> to vector<24x24xf32>
    %99 = arith.subf %95, %98 : vector<24x24xf32>
    %100 = math.exp %99 : vector<24x24xf32>
    %cst_37 = arith.constant dense<0.000000e+00> : vector<24xf32>
    %101 = vector.multi_reduction <add>, %100, %cst_37 [1] : vector<24x24xf32> to vector<24xf32>
    %102 = vector.shape_cast %101 : vector<24xf32> to vector<24x1xf32>
    %103 = tpu.reciprocal %102 {approx = true} : vector<24x1xf32> -> vector<24x1xf32>
    %104 = vector.broadcast %103 : vector<24x1xf32> to vector<24x24xf32>
    %105 = arith.mulf %100, %104 : vector<24x24xf32>
    %cst_38 = arith.constant dense<0.000000e+00> : vector<24x8xf32>
    %106 = tpu.matmul %105, %93, %cst_38 {dimension_numbers = #tpu.dot_dimension_numbers<[1], [0], [0], [1], [0, 0, 1, 1], [], []>} : vector<24x24xf32>, vector<24x8xf32>, vector<24x8xf32> -> vector<24x8xf32>
    %107 = vector.extract_strided_slice %7 {offsets = [16, 0], sizes = [8, 32], strides = [1, 1]} : vector<32x32xf32> to vector<8x32xf32>
    %cst_39 = arith.constant dense<0.000000e+00> : vector<24x32xf32>
    %108 = tpu.matmul %106, %107, %cst_39 {dimension_numbers = #tpu.dot_dimension_numbers<[1], [0], [0], [1], [0, 0, 1, 1], [], []>} : vector<24x8xf32>, vector<8x32xf32>, vector<24x32xf32> -> vector<24x32xf32>
    %109 = arith.addf %90, %108 : vector<24x32xf32>
    %110 = vector.extract_strided_slice %51 {offsets = [0, 24], sizes = [24, 8], strides = [1, 1]} : vector<24x96xf32> to vector<24x8xf32>
    %111 = vector.extract_strided_slice %51 {offsets = [0, 56], sizes = [24, 8], strides = [1, 1]} : vector<24x96xf32> to vector<24x8xf32>
    %112 = vector.extract_strided_slice %51 {offsets = [0, 88], sizes = [24, 8], strides = [1, 1]} : vector<24x96xf32> to vector<24x8xf32>
    %cst_40 = arith.constant dense<0.000000e+00> : vector<24x24xf32>
    %113 = tpu.matmul %110, %111, %cst_40 {dimension_numbers = #tpu.dot_dimension_numbers<[1], [1], [0], [0], [0, 0, 1, 0], [], []>} : vector<24x8xf32>, vector<24x8xf32>, vector<24x24xf32> -> vector<24x24xf32>
    %114 = arith.addf %113, %2 : vector<24x24xf32>
    %cst_41 = arith.constant dense<0xFF800000> : vector<24xf32>
    %115 = vector.multi_reduction <maximumf>, %114, %cst_41 [1] : vector<24x24xf32> to vector<24xf32>
    %116 = vector.shape_cast %115 : vector<24xf32> to vector<24x1xf32>
    %117 = vector.broadcast %116 : vector<24x1xf32> to vector<24x24xf32>
    %118 = arith.subf %114, %117 : vector<24x24xf32>
    %119 = math.exp %118 : vector<24x24xf32>
    %cst_42 = arith.constant dense<0.000000e+00> : vector<24xf32>
    %120 = vector.multi_reduction <add>, %119, %cst_42 [1] : vector<24x24xf32> to vector<24xf32>
    %121 = vector.shape_cast %120 : vector<24xf32> to vector<24x1xf32>
    %122 = tpu.reciprocal %121 {approx = true} : vector<24x1xf32> -> vector<24x1xf32>
    %123 = vector.broadcast %122 : vector<24x1xf32> to vector<24x24xf32>
    %124 = arith.mulf %119, %123 : vector<24x24xf32>
    %cst_43 = arith.constant dense<0.000000e+00> : vector<24x8xf32>
    %125 = tpu.matmul %124, %112, %cst_43 {dimension_numbers = #tpu.dot_dimension_numbers<[1], [0], [0], [1], [0, 0, 1, 1], [], []>} : vector<24x24xf32>, vector<24x8xf32>, vector<24x8xf32> -> vector<24x8xf32>
    %126 = vector.extract_strided_slice %7 {offsets = [24, 0], sizes = [8, 32], strides = [1, 1]} : vector<32x32xf32> to vector<8x32xf32>
    %cst_44 = arith.constant dense<0.000000e+00> : vector<24x32xf32>
    %127 = tpu.matmul %125, %126, %cst_44 {dimension_numbers = #tpu.dot_dimension_numbers<[1], [0], [0], [1], [0, 0, 1, 1], [], []>} : vector<24x8xf32>, vector<8x32xf32>, vector<24x32xf32> -> vector<24x32xf32>
    %128 = arith.addf %109, %127 : vector<24x32xf32>
    %129 = arith.addf %0, %128 : vector<24x32xf32>
    %130 = vector.broadcast %20 : vector<1x32xf32> to vector<24x32xf32>
    %131 = arith.addf %129, %130 : vector<24x32xf32>
    %cst_45 = arith.constant dense<0.000000e+00> : vector<16x96xf32>
    %132 = tpu.matmul %1, %13, %cst_45 {dimension_numbers = #tpu.dot_dimension_numbers<[1], [0], [0], [1], [0, 0, 1, 1], [], []>} : vector<16x32xf32>, vector<32x96xf32>, vector<16x96xf32> -> vector<16x96xf32>
    %133 = vector.broadcast %25 : vector<1x96xf32> to vector<16x96xf32>
    %134 = arith.addf %132, %133 : vector<16x96xf32>
    %135 = vector.extract_strided_slice %134 {offsets = [0, 0], sizes = [16, 8], strides = [1, 1]} : vector<16x96xf32> to vector<16x8xf32>
    %136 = vector.extract_strided_slice %134 {offsets = [0, 32], sizes = [16, 8], strides = [1, 1]} : vector<16x96xf32> to vector<16x8xf32>
    %137 = vector.extract_strided_slice %134 {offsets = [0, 64], sizes = [16, 8], strides = [1, 1]} : vector<16x96xf32> to vector<16x8xf32>
    %cst_46 = arith.constant 0.000000e+00 : f32
    %138 = vector.broadcast %cst_46 : f32 to vector<16x8xf32>
    %139 = arith.cmpf ogt, %135, %138 : vector<16x8xf32>
    %cst_47 = arith.constant 1.000000e+00 : f32
    %140 = vector.broadcast %cst_47 : f32 to vector<16x8xf32>
    %141 = arith.addf %135, %140 : vector<16x8xf32>
    %142 = math.exp %135 : vector<16x8xf32>
    %143 = arith.select %139, %141, %142 : vector<16x8xi1>, vector<16x8xf32>
    %cst_48 = arith.constant 0.000000e+00 : f32
    %144 = vector.broadcast %cst_48 : f32 to vector<16x8xf32>
    %145 = arith.cmpf ogt, %136, %144 : vector<16x8xf32>
    %cst_49 = arith.constant 1.000000e+00 : f32
    %146 = vector.broadcast %cst_49 : f32 to vector<16x8xf32>
    %147 = arith.addf %136, %146 : vector<16x8xf32>
    %148 = math.exp %136 : vector<16x8xf32>
    %149 = arith.select %145, %147, %148 : vector<16x8xi1>, vector<16x8xf32>
    %150 = vector.broadcast %3 : vector<16x1xf32> to vector<16x8xf32>
    %151 = arith.mulf %149, %150 : vector<16x8xf32>
    %152 = vector.extract_strided_slice %151 {offsets = [0, 0], sizes = [8, 8], strides = [1, 1]} : vector<16x8xf32> to vector<8x8xf32>
    %153 = vector.extract_strided_slice %137 {offsets = [0, 0], sizes = [8, 8], strides = [1, 1]} : vector<16x8xf32> to vector<8x8xf32>
    %154 = vector.extract_strided_slice %143 {offsets = [0, 0], sizes = [8, 8], strides = [1, 1]} : vector<16x8xf32> to vector<8x8xf32>
    %cst_50 = arith.constant dense<0.000000e+00> : vector<8x8xf32>
    %155 = tpu.matmul %152, %153, %cst_50 {dimension_numbers = #tpu.dot_dimension_numbers<[0], [0], [1], [1], [0, 1, 1, 1], [], []>} : vector<8x8xf32>, vector<8x8xf32>, vector<8x8xf32> -> vector<8x8xf32>
    %cst_51 = arith.constant dense<0.000000e+00> : vector<8xf32>
    %156 = vector.multi_reduction <add>, %152, %cst_51 [0] : vector<8x8xf32> to vector<8xf32>
    %157 = vector.shape_cast %156 : vector<8xf32> to vector<1x8xf32>
    %158 = vector.broadcast %157 : vector<1x8xf32> to vector<8x8xf32>
    %159 = arith.mulf %154, %158 : vector<8x8xf32>
    %cst_52 = arith.constant dense<0.000000e+00> : vector<8xf32>
    %160 = vector.multi_reduction <add>, %159, %cst_52 [1] : vector<8x8xf32> to vector<8xf32>
    %161 = vector.shape_cast %160 : vector<8xf32> to vector<8x1xf32>
    %cst_53 = arith.constant 9.99999997E-7 : f32
    %162 = vector.broadcast %cst_53 : f32 to vector<8x1xf32>
    %163 = arith.addf %161, %162 : vector<8x1xf32>
    %164 = tpu.reciprocal %163 {approx = true} : vector<8x1xf32> -> vector<8x1xf32>
    %cst_54 = arith.constant dense<0.000000e+00> : vector<8x8xf32>
    %165 = tpu.matmul %154, %155, %cst_54 {dimension_numbers = #tpu.dot_dimension_numbers<[1], [0], [0], [1], [0, 0, 1, 1], [], []>} : vector<8x8xf32>, vector<8x8xf32>, vector<8x8xf32> -> vector<8x8xf32>
    %166 = vector.broadcast %164 : vector<8x1xf32> to vector<8x8xf32>
    %167 = arith.mulf %165, %166 : vector<8x8xf32>
    %168 = vector.extract_strided_slice %151 {offsets = [8, 0], sizes = [8, 8], strides = [1, 1]} : vector<16x8xf32> to vector<8x8xf32>
    %169 = vector.extract_strided_slice %137 {offsets = [8, 0], sizes = [8, 8], strides = [1, 1]} : vector<16x8xf32> to vector<8x8xf32>
    %170 = vector.extract_strided_slice %143 {offsets = [8, 0], sizes = [8, 8], strides = [1, 1]} : vector<16x8xf32> to vector<8x8xf32>
    %cst_55 = arith.constant dense<0.000000e+00> : vector<8x8xf32>
    %171 = tpu.matmul %168, %169, %cst_55 {dimension_numbers = #tpu.dot_dimension_numbers<[0], [0], [1], [1], [0, 1, 1, 1], [], []>} : vector<8x8xf32>, vector<8x8xf32>, vector<8x8xf32> -> vector<8x8xf32>
    %cst_56 = arith.constant dense<0.000000e+00> : vector<8xf32>
    %172 = vector.multi_reduction <add>, %168, %cst_56 [0] : vector<8x8xf32> to vector<8xf32>
    %173 = vector.shape_cast %172 : vector<8xf32> to vector<1x8xf32>
    %174 = vector.broadcast %173 : vector<1x8xf32> to vector<8x8xf32>
    %175 = arith.mulf %170, %174 : vector<8x8xf32>
    %cst_57 = arith.constant dense<0.000000e+00> : vector<8xf32>
    %176 = vector.multi_reduction <add>, %175, %cst_57 [1] : vector<8x8xf32> to vector<8xf32>
    %177 = vector.shape_cast %176 : vector<8xf32> to vector<8x1xf32>
    %cst_58 = arith.constant 9.99999997E-7 : f32
    %178 = vector.broadcast %cst_58 : f32 to vector<8x1xf32>
    %179 = arith.addf %177, %178 : vector<8x1xf32>
    %180 = tpu.reciprocal %179 {approx = true} : vector<8x1xf32> -> vector<8x1xf32>
    %cst_59 = arith.constant dense<0.000000e+00> : vector<8x8xf32>
    %181 = tpu.matmul %170, %171, %cst_59 {dimension_numbers = #tpu.dot_dimension_numbers<[1], [0], [0], [1], [0, 0, 1, 1], [], []>} : vector<8x8xf32>, vector<8x8xf32>, vector<8x8xf32> -> vector<8x8xf32>
    %182 = vector.broadcast %180 : vector<8x1xf32> to vector<8x8xf32>
    %183 = arith.mulf %181, %182 : vector<8x8xf32>
    %184 = tpu.concatenate %167, %183 in 0 : vector<8x8xf32>, vector<8x8xf32> -> vector<16x8xf32>
    %185 = vector.extract_strided_slice %134 {offsets = [0, 8], sizes = [16, 8], strides = [1, 1]} : vector<16x96xf32> to vector<16x8xf32>
    %186 = vector.extract_strided_slice %134 {offsets = [0, 40], sizes = [16, 8], strides = [1, 1]} : vector<16x96xf32> to vector<16x8xf32>
    %187 = vector.extract_strided_slice %134 {offsets = [0, 72], sizes = [16, 8], strides = [1, 1]} : vector<16x96xf32> to vector<16x8xf32>
    %cst_60 = arith.constant 0.000000e+00 : f32
    %188 = vector.broadcast %cst_60 : f32 to vector<16x8xf32>
    %189 = arith.cmpf ogt, %185, %188 : vector<16x8xf32>
    %cst_61 = arith.constant 1.000000e+00 : f32
    %190 = vector.broadcast %cst_61 : f32 to vector<16x8xf32>
    %191 = arith.addf %185, %190 : vector<16x8xf32>
    %192 = math.exp %185 : vector<16x8xf32>
    %193 = arith.select %189, %191, %192 : vector<16x8xi1>, vector<16x8xf32>
    %cst_62 = arith.constant 0.000000e+00 : f32
    %194 = vector.broadcast %cst_62 : f32 to vector<16x8xf32>
    %195 = arith.cmpf ogt, %186, %194 : vector<16x8xf32>
    %cst_63 = arith.constant 1.000000e+00 : f32
    %196 = vector.broadcast %cst_63 : f32 to vector<16x8xf32>
    %197 = arith.addf %186, %196 : vector<16x8xf32>
    %198 = math.exp %186 : vector<16x8xf32>
    %199 = arith.select %195, %197, %198 : vector<16x8xi1>, vector<16x8xf32>
    %200 = vector.broadcast %3 : vector<16x1xf32> to vector<16x8xf32>
    %201 = arith.mulf %199, %200 : vector<16x8xf32>
    %202 = vector.extract_strided_slice %201 {offsets = [0, 0], sizes = [8, 8], strides = [1, 1]} : vector<16x8xf32> to vector<8x8xf32>
    %203 = vector.extract_strided_slice %187 {offsets = [0, 0], sizes = [8, 8], strides = [1, 1]} : vector<16x8xf32> to vector<8x8xf32>
    %204 = vector.extract_strided_slice %193 {offsets = [0, 0], sizes = [8, 8], strides = [1, 1]} : vector<16x8xf32> to vector<8x8xf32>
    %cst_64 = arith.constant dense<0.000000e+00> : vector<8x8xf32>
    %205 = tpu.matmul %202, %203, %cst_64 {dimension_numbers = #tpu.dot_dimension_numbers<[0], [0], [1], [1], [0, 1, 1, 1], [], []>} : vector<8x8xf32>, vector<8x8xf32>, vector<8x8xf32> -> vector<8x8xf32>
    %cst_65 = arith.constant dense<0.000000e+00> : vector<8xf32>
    %206 = vector.multi_reduction <add>, %202, %cst_65 [0] : vector<8x8xf32> to vector<8xf32>
    %207 = vector.shape_cast %206 : vector<8xf32> to vector<1x8xf32>
    %208 = vector.broadcast %207 : vector<1x8xf32> to vector<8x8xf32>
    %209 = arith.mulf %204, %208 : vector<8x8xf32>
    %cst_66 = arith.constant dense<0.000000e+00> : vector<8xf32>
    %210 = vector.multi_reduction <add>, %209, %cst_66 [1] : vector<8x8xf32> to vector<8xf32>
    %211 = vector.shape_cast %210 : vector<8xf32> to vector<8x1xf32>
    %cst_67 = arith.constant 9.99999997E-7 : f32
    %212 = vector.broadcast %cst_67 : f32 to vector<8x1xf32>
    %213 = arith.addf %211, %212 : vector<8x1xf32>
    %214 = tpu.reciprocal %213 {approx = true} : vector<8x1xf32> -> vector<8x1xf32>
    %cst_68 = arith.constant dense<0.000000e+00> : vector<8x8xf32>
    %215 = tpu.matmul %204, %205, %cst_68 {dimension_numbers = #tpu.dot_dimension_numbers<[1], [0], [0], [1], [0, 0, 1, 1], [], []>} : vector<8x8xf32>, vector<8x8xf32>, vector<8x8xf32> -> vector<8x8xf32>
    %216 = vector.broadcast %214 : vector<8x1xf32> to vector<8x8xf32>
    %217 = arith.mulf %215, %216 : vector<8x8xf32>
    %218 = vector.extract_strided_slice %201 {offsets = [8, 0], sizes = [8, 8], strides = [1, 1]} : vector<16x8xf32> to vector<8x8xf32>
    %219 = vector.extract_strided_slice %187 {offsets = [8, 0], sizes = [8, 8], strides = [1, 1]} : vector<16x8xf32> to vector<8x8xf32>
    %220 = vector.extract_strided_slice %193 {offsets = [8, 0], sizes = [8, 8], strides = [1, 1]} : vector<16x8xf32> to vector<8x8xf32>
    %cst_69 = arith.constant dense<0.000000e+00> : vector<8x8xf32>
    %221 = tpu.matmul %218, %219, %cst_69 {dimension_numbers = #tpu.dot_dimension_numbers<[0], [0], [1], [1], [0, 1, 1, 1], [], []>} : vector<8x8xf32>, vector<8x8xf32>, vector<8x8xf32> -> vector<8x8xf32>
    %cst_70 = arith.constant dense<0.000000e+00> : vector<8xf32>
    %222 = vector.multi_reduction <add>, %218, %cst_70 [0] : vector<8x8xf32> to vector<8xf32>
    %223 = vector.shape_cast %222 : vector<8xf32> to vector<1x8xf32>
    %224 = vector.broadcast %223 : vector<1x8xf32> to vector<8x8xf32>
    %225 = arith.mulf %220, %224 : vector<8x8xf32>
    %cst_71 = arith.constant dense<0.000000e+00> : vector<8xf32>
    %226 = vector.multi_reduction <add>, %225, %cst_71 [1] : vector<8x8xf32> to vector<8xf32>
    %227 = vector.shape_cast %226 : vector<8xf32> to vector<8x1xf32>
    %cst_72 = arith.constant 9.99999997E-7 : f32
    %228 = vector.broadcast %cst_72 : f32 to vector<8x1xf32>
    %229 = arith.addf %227, %228 : vector<8x1xf32>
    %230 = tpu.reciprocal %229 {approx = true} : vector<8x1xf32> -> vector<8x1xf32>
    %cst_73 = arith.constant dense<0.000000e+00> : vector<8x8xf32>
    %231 = tpu.matmul %220, %221, %cst_73 {dimension_numbers = #tpu.dot_dimension_numbers<[1], [0], [0], [1], [0, 0, 1, 1], [], []>} : vector<8x8xf32>, vector<8x8xf32>, vector<8x8xf32> -> vector<8x8xf32>
    %232 = vector.broadcast %230 : vector<8x1xf32> to vector<8x8xf32>
    %233 = arith.mulf %231, %232 : vector<8x8xf32>
    %234 = tpu.concatenate %217, %233 in 0 : vector<8x8xf32>, vector<8x8xf32> -> vector<16x8xf32>
    %235 = vector.extract_strided_slice %134 {offsets = [0, 16], sizes = [16, 8], strides = [1, 1]} : vector<16x96xf32> to vector<16x8xf32>
    %236 = vector.extract_strided_slice %134 {offsets = [0, 48], sizes = [16, 8], strides = [1, 1]} : vector<16x96xf32> to vector<16x8xf32>
    %237 = vector.extract_strided_slice %134 {offsets = [0, 80], sizes = [16, 8], strides = [1, 1]} : vector<16x96xf32> to vector<16x8xf32>
    %cst_74 = arith.constant 0.000000e+00 : f32
    %238 = vector.broadcast %cst_74 : f32 to vector<16x8xf32>
    %239 = arith.cmpf ogt, %235, %238 : vector<16x8xf32>
    %cst_75 = arith.constant 1.000000e+00 : f32
    %240 = vector.broadcast %cst_75 : f32 to vector<16x8xf32>
    %241 = arith.addf %235, %240 : vector<16x8xf32>
    %242 = math.exp %235 : vector<16x8xf32>
    %243 = arith.select %239, %241, %242 : vector<16x8xi1>, vector<16x8xf32>
    %cst_76 = arith.constant 0.000000e+00 : f32
    %244 = vector.broadcast %cst_76 : f32 to vector<16x8xf32>
    %245 = arith.cmpf ogt, %236, %244 : vector<16x8xf32>
    %cst_77 = arith.constant 1.000000e+00 : f32
    %246 = vector.broadcast %cst_77 : f32 to vector<16x8xf32>
    %247 = arith.addf %236, %246 : vector<16x8xf32>
    %248 = math.exp %236 : vector<16x8xf32>
    %249 = arith.select %245, %247, %248 : vector<16x8xi1>, vector<16x8xf32>
    %250 = vector.broadcast %3 : vector<16x1xf32> to vector<16x8xf32>
    %251 = arith.mulf %249, %250 : vector<16x8xf32>
    %252 = vector.extract_strided_slice %251 {offsets = [0, 0], sizes = [8, 8], strides = [1, 1]} : vector<16x8xf32> to vector<8x8xf32>
    %253 = vector.extract_strided_slice %237 {offsets = [0, 0], sizes = [8, 8], strides = [1, 1]} : vector<16x8xf32> to vector<8x8xf32>
    %254 = vector.extract_strided_slice %243 {offsets = [0, 0], sizes = [8, 8], strides = [1, 1]} : vector<16x8xf32> to vector<8x8xf32>
    %cst_78 = arith.constant dense<0.000000e+00> : vector<8x8xf32>
    %255 = tpu.matmul %252, %253, %cst_78 {dimension_numbers = #tpu.dot_dimension_numbers<[0], [0], [1], [1], [0, 1, 1, 1], [], []>} : vector<8x8xf32>, vector<8x8xf32>, vector<8x8xf32> -> vector<8x8xf32>
    %cst_79 = arith.constant dense<0.000000e+00> : vector<8xf32>
    %256 = vector.multi_reduction <add>, %252, %cst_79 [0] : vector<8x8xf32> to vector<8xf32>
    %257 = vector.shape_cast %256 : vector<8xf32> to vector<1x8xf32>
    %258 = vector.broadcast %257 : vector<1x8xf32> to vector<8x8xf32>
    %259 = arith.mulf %254, %258 : vector<8x8xf32>
    %cst_80 = arith.constant dense<0.000000e+00> : vector<8xf32>
    %260 = vector.multi_reduction <add>, %259, %cst_80 [1] : vector<8x8xf32> to vector<8xf32>
    %261 = vector.shape_cast %260 : vector<8xf32> to vector<8x1xf32>
    %cst_81 = arith.constant 9.99999997E-7 : f32
    %262 = vector.broadcast %cst_81 : f32 to vector<8x1xf32>
    %263 = arith.addf %261, %262 : vector<8x1xf32>
    %264 = tpu.reciprocal %263 {approx = true} : vector<8x1xf32> -> vector<8x1xf32>
    %cst_82 = arith.constant dense<0.000000e+00> : vector<8x8xf32>
    %265 = tpu.matmul %254, %255, %cst_82 {dimension_numbers = #tpu.dot_dimension_numbers<[1], [0], [0], [1], [0, 0, 1, 1], [], []>} : vector<8x8xf32>, vector<8x8xf32>, vector<8x8xf32> -> vector<8x8xf32>
    %266 = vector.broadcast %264 : vector<8x1xf32> to vector<8x8xf32>
    %267 = arith.mulf %265, %266 : vector<8x8xf32>
    %268 = vector.extract_strided_slice %251 {offsets = [8, 0], sizes = [8, 8], strides = [1, 1]} : vector<16x8xf32> to vector<8x8xf32>
    %269 = vector.extract_strided_slice %237 {offsets = [8, 0], sizes = [8, 8], strides = [1, 1]} : vector<16x8xf32> to vector<8x8xf32>
    %270 = vector.extract_strided_slice %243 {offsets = [8, 0], sizes = [8, 8], strides = [1, 1]} : vector<16x8xf32> to vector<8x8xf32>
    %cst_83 = arith.constant dense<0.000000e+00> : vector<8x8xf32>
    %271 = tpu.matmul %268, %269, %cst_83 {dimension_numbers = #tpu.dot_dimension_numbers<[0], [0], [1], [1], [0, 1, 1, 1], [], []>} : vector<8x8xf32>, vector<8x8xf32>, vector<8x8xf32> -> vector<8x8xf32>
    %cst_84 = arith.constant dense<0.000000e+00> : vector<8xf32>
    %272 = vector.multi_reduction <add>, %268, %cst_84 [0] : vector<8x8xf32> to vector<8xf32>
    %273 = vector.shape_cast %272 : vector<8xf32> to vector<1x8xf32>
    %274 = vector.broadcast %273 : vector<1x8xf32> to vector<8x8xf32>
    %275 = arith.mulf %270, %274 : vector<8x8xf32>
    %cst_85 = arith.constant dense<0.000000e+00> : vector<8xf32>
    %276 = vector.multi_reduction <add>, %275, %cst_85 [1] : vector<8x8xf32> to vector<8xf32>
    %277 = vector.shape_cast %276 : vector<8xf32> to vector<8x1xf32>
    %cst_86 = arith.constant 9.99999997E-7 : f32
    %278 = vector.broadcast %cst_86 : f32 to vector<8x1xf32>
    %279 = arith.addf %277, %278 : vector<8x1xf32>
    %280 = tpu.reciprocal %279 {approx = true} : vector<8x1xf32> -> vector<8x1xf32>
    %cst_87 = arith.constant dense<0.000000e+00> : vector<8x8xf32>
    %281 = tpu.matmul %270, %271, %cst_87 {dimension_numbers = #tpu.dot_dimension_numbers<[1], [0], [0], [1], [0, 0, 1, 1], [], []>} : vector<8x8xf32>, vector<8x8xf32>, vector<8x8xf32> -> vector<8x8xf32>
    %282 = vector.broadcast %280 : vector<8x1xf32> to vector<8x8xf32>
    %283 = arith.mulf %281, %282 : vector<8x8xf32>
    %284 = tpu.concatenate %267, %283 in 0 : vector<8x8xf32>, vector<8x8xf32> -> vector<16x8xf32>
    %285 = vector.extract_strided_slice %134 {offsets = [0, 24], sizes = [16, 8], strides = [1, 1]} : vector<16x96xf32> to vector<16x8xf32>
    %286 = vector.extract_strided_slice %134 {offsets = [0, 56], sizes = [16, 8], strides = [1, 1]} : vector<16x96xf32> to vector<16x8xf32>
    %287 = vector.extract_strided_slice %134 {offsets = [0, 88], sizes = [16, 8], strides = [1, 1]} : vector<16x96xf32> to vector<16x8xf32>
    %cst_88 = arith.constant 0.000000e+00 : f32
    %288 = vector.broadcast %cst_88 : f32 to vector<16x8xf32>
    %289 = arith.cmpf ogt, %285, %288 : vector<16x8xf32>
    %cst_89 = arith.constant 1.000000e+00 : f32
    %290 = vector.broadcast %cst_89 : f32 to vector<16x8xf32>
    %291 = arith.addf %285, %290 : vector<16x8xf32>
    %292 = math.exp %285 : vector<16x8xf32>
    %293 = arith.select %289, %291, %292 : vector<16x8xi1>, vector<16x8xf32>
    %cst_90 = arith.constant 0.000000e+00 : f32
    %294 = vector.broadcast %cst_90 : f32 to vector<16x8xf32>
    %295 = arith.cmpf ogt, %286, %294 : vector<16x8xf32>
    %cst_91 = arith.constant 1.000000e+00 : f32
    %296 = vector.broadcast %cst_91 : f32 to vector<16x8xf32>
    %297 = arith.addf %286, %296 : vector<16x8xf32>
    %298 = math.exp %286 : vector<16x8xf32>
    %299 = arith.select %295, %297, %298 : vector<16x8xi1>, vector<16x8xf32>
    %300 = vector.broadcast %3 : vector<16x1xf32> to vector<16x8xf32>
    %301 = arith.mulf %299, %300 : vector<16x8xf32>
    %302 = vector.extract_strided_slice %301 {offsets = [0, 0], sizes = [8, 8], strides = [1, 1]} : vector<16x8xf32> to vector<8x8xf32>
    %303 = vector.extract_strided_slice %287 {offsets = [0, 0], sizes = [8, 8], strides = [1, 1]} : vector<16x8xf32> to vector<8x8xf32>
    %304 = vector.extract_strided_slice %293 {offsets = [0, 0], sizes = [8, 8], strides = [1, 1]} : vector<16x8xf32> to vector<8x8xf32>
    %cst_92 = arith.constant dense<0.000000e+00> : vector<8x8xf32>
    %305 = tpu.matmul %302, %303, %cst_92 {dimension_numbers = #tpu.dot_dimension_numbers<[0], [0], [1], [1], [0, 1, 1, 1], [], []>} : vector<8x8xf32>, vector<8x8xf32>, vector<8x8xf32> -> vector<8x8xf32>
    %cst_93 = arith.constant dense<0.000000e+00> : vector<8xf32>
    %306 = vector.multi_reduction <add>, %302, %cst_93 [0] : vector<8x8xf32> to vector<8xf32>
    %307 = vector.shape_cast %306 : vector<8xf32> to vector<1x8xf32>
    %308 = vector.broadcast %307 : vector<1x8xf32> to vector<8x8xf32>
    %309 = arith.mulf %304, %308 : vector<8x8xf32>
    %cst_94 = arith.constant dense<0.000000e+00> : vector<8xf32>
    %310 = vector.multi_reduction <add>, %309, %cst_94 [1] : vector<8x8xf32> to vector<8xf32>
    %311 = vector.shape_cast %310 : vector<8xf32> to vector<8x1xf32>
    %cst_95 = arith.constant 9.99999997E-7 : f32
    %312 = vector.broadcast %cst_95 : f32 to vector<8x1xf32>
    %313 = arith.addf %311, %312 : vector<8x1xf32>
    %314 = tpu.reciprocal %313 {approx = true} : vector<8x1xf32> -> vector<8x1xf32>
    %cst_96 = arith.constant dense<0.000000e+00> : vector<8x8xf32>
    %315 = tpu.matmul %304, %305, %cst_96 {dimension_numbers = #tpu.dot_dimension_numbers<[1], [0], [0], [1], [0, 0, 1, 1], [], []>} : vector<8x8xf32>, vector<8x8xf32>, vector<8x8xf32> -> vector<8x8xf32>
    %316 = vector.broadcast %314 : vector<8x1xf32> to vector<8x8xf32>
    %317 = arith.mulf %315, %316 : vector<8x8xf32>
    %318 = vector.extract_strided_slice %301 {offsets = [8, 0], sizes = [8, 8], strides = [1, 1]} : vector<16x8xf32> to vector<8x8xf32>
    %319 = vector.extract_strided_slice %287 {offsets = [8, 0], sizes = [8, 8], strides = [1, 1]} : vector<16x8xf32> to vector<8x8xf32>
    %320 = vector.extract_strided_slice %293 {offsets = [8, 0], sizes = [8, 8], strides = [1, 1]} : vector<16x8xf32> to vector<8x8xf32>
    %cst_97 = arith.constant dense<0.000000e+00> : vector<8x8xf32>
    %321 = tpu.matmul %318, %319, %cst_97 {dimension_numbers = #tpu.dot_dimension_numbers<[0], [0], [1], [1], [0, 1, 1, 1], [], []>} : vector<8x8xf32>, vector<8x8xf32>, vector<8x8xf32> -> vector<8x8xf32>
    %cst_98 = arith.constant dense<0.000000e+00> : vector<8xf32>
    %322 = vector.multi_reduction <add>, %318, %cst_98 [0] : vector<8x8xf32> to vector<8xf32>
    %323 = vector.shape_cast %322 : vector<8xf32> to vector<1x8xf32>
    %324 = vector.broadcast %323 : vector<1x8xf32> to vector<8x8xf32>
    %325 = arith.mulf %320, %324 : vector<8x8xf32>
    %cst_99 = arith.constant dense<0.000000e+00> : vector<8xf32>
    %326 = vector.multi_reduction <add>, %325, %cst_99 [1] : vector<8x8xf32> to vector<8xf32>
    %327 = vector.shape_cast %326 : vector<8xf32> to vector<8x1xf32>
    %cst_100 = arith.constant 9.99999997E-7 : f32
    %328 = vector.broadcast %cst_100 : f32 to vector<8x1xf32>
    %329 = arith.addf %327, %328 : vector<8x1xf32>
    %330 = tpu.reciprocal %329 {approx = true} : vector<8x1xf32> -> vector<8x1xf32>
    %cst_101 = arith.constant dense<0.000000e+00> : vector<8x8xf32>
    %331 = tpu.matmul %320, %321, %cst_101 {dimension_numbers = #tpu.dot_dimension_numbers<[1], [0], [0], [1], [0, 0, 1, 1], [], []>} : vector<8x8xf32>, vector<8x8xf32>, vector<8x8xf32> -> vector<8x8xf32>
    %332 = vector.broadcast %330 : vector<8x1xf32> to vector<8x8xf32>
    %333 = arith.mulf %331, %332 : vector<8x8xf32>
    %334 = tpu.concatenate %317, %333 in 0 : vector<8x8xf32>, vector<8x8xf32> -> vector<16x8xf32>
    %335 = tpu.concatenate %184, %234, %284, %334 in 1 : vector<16x8xf32>, vector<16x8xf32>, vector<16x8xf32>, vector<16x8xf32> -> vector<16x32xf32>
    %336 = arith.addf %1, %335 : vector<16x32xf32>
    %cst_102 = arith.constant dense<0.000000e+00> : vector<24xf32>
    %337 = vector.multi_reduction <add>, %131, %cst_102 [1] : vector<24x32xf32> to vector<24xf32>
    %338 = vector.shape_cast %337 : vector<24xf32> to vector<24x1xf32>
    %cst_103 = arith.constant 3.200000e+01 : f32
    %339 = vector.broadcast %cst_103 : f32 to vector<24x1xf32>
    %340 = arith.divf %338, %339 : vector<24x1xf32>
    %341 = vector.broadcast %340 : vector<24x1xf32> to vector<24x32xf32>
    %342 = arith.subf %131, %341 : vector<24x32xf32>
    %343 = arith.mulf %342, %342 : vector<24x32xf32>
    %cst_104 = arith.constant dense<0.000000e+00> : vector<24xf32>
    %344 = vector.multi_reduction <add>, %343, %cst_104 [1] : vector<24x32xf32> to vector<24xf32>
    %345 = vector.shape_cast %344 : vector<24xf32> to vector<24x1xf32>
    %cst_105 = arith.constant 3.200000e+01 : f32
    %346 = vector.broadcast %cst_105 : f32 to vector<24x1xf32>
    %347 = arith.divf %345, %346 : vector<24x1xf32>
    %348 = vector.broadcast %340 : vector<24x1xf32> to vector<24x32xf32>
    %349 = arith.subf %131, %348 : vector<24x32xf32>
    %cst_106 = arith.constant 9.99999974E-6 : f32
    %350 = vector.broadcast %cst_106 : f32 to vector<24x1xf32>
    %351 = arith.addf %347, %350 : vector<24x1xf32>
    %352 = math.rsqrt %351 : vector<24x1xf32>
    %353 = vector.broadcast %352 : vector<24x1xf32> to vector<24x32xf32>
    %354 = arith.mulf %349, %353 : vector<24x32xf32>
    %355 = vector.broadcast %21 : vector<1x32xf32> to vector<24x32xf32>
    %356 = arith.mulf %354, %355 : vector<24x32xf32>
    %357 = vector.broadcast %22 : vector<1x32xf32> to vector<24x32xf32>
    %358 = arith.addf %356, %357 : vector<24x32xf32>
    %cst_107 = arith.constant dense<0.000000e+00> : vector<24x64xf32>
    %359 = tpu.matmul %358, %8, %cst_107 {dimension_numbers = #tpu.dot_dimension_numbers<[1], [0], [0], [1], [0, 0, 1, 1], [], []>} : vector<24x32xf32>, vector<32x64xf32>, vector<24x64xf32> -> vector<24x64xf32>
    %360 = vector.broadcast %23 : vector<1x64xf32> to vector<24x64xf32>
    %361 = arith.addf %359, %360 : vector<24x64xf32>
    %cst_108 = arith.constant 5.000000e-01 : f32
    %362 = vector.broadcast %cst_108 : f32 to vector<24x64xf32>
    %363 = arith.mulf %362, %361 : vector<24x64xf32>
    %cst_109 = arith.constant 0.707106769 : f32
    %364 = vector.broadcast %cst_109 : f32 to vector<24x64xf32>
    %365 = arith.mulf %361, %364 : vector<24x64xf32>
    %366 = math.erf %365 : vector<24x64xf32>
    %cst_110 = arith.constant 1.000000e+00 : f32
    %367 = vector.broadcast %cst_110 : f32 to vector<24x64xf32>
    %368 = arith.addf %367, %366 : vector<24x64xf32>
    %369 = arith.mulf %363, %368 : vector<24x64xf32>
    %cst_111 = arith.constant dense<0.000000e+00> : vector<24x32xf32>
    %370 = tpu.matmul %369, %10, %cst_111 {dimension_numbers = #tpu.dot_dimension_numbers<[1], [0], [0], [1], [0, 0, 1, 1], [], []>} : vector<24x64xf32>, vector<64x32xf32>, vector<24x32xf32> -> vector<24x32xf32>
    %371 = vector.broadcast %24 : vector<1x32xf32> to vector<24x32xf32>
    %372 = arith.addf %370, %371 : vector<24x32xf32>
    %373 = arith.addf %131, %372 : vector<24x32xf32>
    %cst_112 = arith.constant dense<0.000000e+00> : vector<16x32xf32>
    %374 = tpu.matmul %336, %14, %cst_112 {dimension_numbers = #tpu.dot_dimension_numbers<[1], [0], [0], [1], [0, 0, 1, 1], [], []>} : vector<16x32xf32>, vector<32x32xf32>, vector<16x32xf32> -> vector<16x32xf32>
    %375 = arith.addf %336, %374 : vector<16x32xf32>
    %376 = vector.broadcast %26 : vector<1x32xf32> to vector<16x32xf32>
    %377 = arith.addf %375, %376 : vector<16x32xf32>
    %c1 = arith.constant 1 : index
    %c0_113 = arith.constant 0 : index
    %c0_114 = arith.constant 0 : index
    %378 = vector.load %arg5[%c1, %c0_113, %c0_114] : memref<2x32x192xf32, #tpu.memory_space<vmem>>, vector<1x32x192xf32>
    %379 = vector.shape_cast %378 : vector<1x32x192xf32> to vector<32x192xf32>
    %380 = vector.extract_strided_slice %379 {offsets = [0, 0], sizes = [32, 96], strides = [1, 1]} : vector<32x192xf32> to vector<32x96xf32>
    %381 = vector.extract_strided_slice %379 {offsets = [0, 96], sizes = [32, 32], strides = [1, 1]} : vector<32x192xf32> to vector<32x32xf32>
    %382 = vector.extract_strided_slice %379 {offsets = [0, 128], sizes = [32, 64], strides = [1, 1]} : vector<32x192xf32> to vector<32x64xf32>
    %c1_115 = arith.constant 1 : index
    %c0_116 = arith.constant 0 : index
    %c0_117 = arith.constant 0 : index
    %383 = vector.load %arg6[%c1_115, %c0_116, %c0_117] : memref<2x64x32xf32, #tpu.memory_space<vmem>>, vector<1x64x32xf32>
    %384 = vector.shape_cast %383 : vector<1x64x32xf32> to vector<64x32xf32>
    %c1_118 = arith.constant 1 : index
    %c0_119 = arith.constant 0 : index
    %c0_120 = arith.constant 0 : index
    %385 = vector.load %arg7[%c1_118, %c0_119, %c0_120] : memref<2x32x128xf32, #tpu.memory_space<vmem>>, vector<1x32x128xf32>
    %386 = vector.shape_cast %385 : vector<1x32x128xf32> to vector<32x128xf32>
    %387 = vector.extract_strided_slice %386 {offsets = [0, 0], sizes = [32, 96], strides = [1, 1]} : vector<32x128xf32> to vector<32x96xf32>
    %388 = vector.extract_strided_slice %386 {offsets = [0, 96], sizes = [32, 32], strides = [1, 1]} : vector<32x128xf32> to vector<32x32xf32>
    %c1_121 = arith.constant 1 : index
    %c0_122 = arith.constant 0 : index
    %c0_123 = arith.constant 0 : index
    %389 = vector.load %arg8[%c1_121, %c0_122, %c0_123] : memref<2x10x128xf32, #tpu.memory_space<vmem>>, vector<1x10x128xf32>
    %390 = vector.shape_cast %389 : vector<1x10x128xf32> to vector<10x128xf32>
    %391 = vector.extract_strided_slice %390 {offsets = [0, 0], sizes = [1, 32], strides = [1, 1]} : vector<10x128xf32> to vector<1x32xf32>
    %392 = vector.extract_strided_slice %390 {offsets = [1, 0], sizes = [1, 32], strides = [1, 1]} : vector<10x128xf32> to vector<1x32xf32>
    %393 = vector.extract_strided_slice %390 {offsets = [2, 0], sizes = [1, 96], strides = [1, 1]} : vector<10x128xf32> to vector<1x96xf32>
    %394 = vector.extract_strided_slice %390 {offsets = [3, 0], sizes = [1, 32], strides = [1, 1]} : vector<10x128xf32> to vector<1x32xf32>
    %395 = vector.extract_strided_slice %390 {offsets = [4, 0], sizes = [1, 32], strides = [1, 1]} : vector<10x128xf32> to vector<1x32xf32>
    %396 = vector.extract_strided_slice %390 {offsets = [5, 0], sizes = [1, 32], strides = [1, 1]} : vector<10x128xf32> to vector<1x32xf32>
    %397 = vector.extract_strided_slice %390 {offsets = [6, 0], sizes = [1, 64], strides = [1, 1]} : vector<10x128xf32> to vector<1x64xf32>
    %398 = vector.extract_strided_slice %390 {offsets = [7, 0], sizes = [1, 32], strides = [1, 1]} : vector<10x128xf32> to vector<1x32xf32>
    %399 = vector.extract_strided_slice %390 {offsets = [8, 0], sizes = [1, 96], strides = [1, 1]} : vector<10x128xf32> to vector<1x96xf32>
    %400 = vector.extract_strided_slice %390 {offsets = [9, 0], sizes = [1, 32], strides = [1, 1]} : vector<10x128xf32> to vector<1x32xf32>
    %cst_124 = arith.constant dense<0.000000e+00> : vector<24xf32>
    %401 = vector.multi_reduction <add>, %373, %cst_124 [1] : vector<24x32xf32> to vector<24xf32>
    %402 = vector.shape_cast %401 : vector<24xf32> to vector<24x1xf32>
    %cst_125 = arith.constant 3.200000e+01 : f32
    %403 = vector.broadcast %cst_125 : f32 to vector<24x1xf32>
    %404 = arith.divf %402, %403 : vector<24x1xf32>
    %405 = vector.broadcast %404 : vector<24x1xf32> to vector<24x32xf32>
    %406 = arith.subf %373, %405 : vector<24x32xf32>
    %407 = arith.mulf %406, %406 : vector<24x32xf32>
    %cst_126 = arith.constant dense<0.000000e+00> : vector<24xf32>
    %408 = vector.multi_reduction <add>, %407, %cst_126 [1] : vector<24x32xf32> to vector<24xf32>
    %409 = vector.shape_cast %408 : vector<24xf32> to vector<24x1xf32>
    %cst_127 = arith.constant 3.200000e+01 : f32
    %410 = vector.broadcast %cst_127 : f32 to vector<24x1xf32>
    %411 = arith.divf %409, %410 : vector<24x1xf32>
    %412 = vector.broadcast %404 : vector<24x1xf32> to vector<24x32xf32>
    %413 = arith.subf %373, %412 : vector<24x32xf32>
    %cst_128 = arith.constant 9.99999974E-6 : f32
    %414 = vector.broadcast %cst_128 : f32 to vector<24x1xf32>
    %415 = arith.addf %411, %414 : vector<24x1xf32>
    %416 = math.rsqrt %415 : vector<24x1xf32>
    %417 = vector.broadcast %416 : vector<24x1xf32> to vector<24x32xf32>
    %418 = arith.mulf %413, %417 : vector<24x32xf32>
    %419 = vector.broadcast %391 : vector<1x32xf32> to vector<24x32xf32>
    %420 = arith.mulf %418, %419 : vector<24x32xf32>
    %421 = vector.broadcast %392 : vector<1x32xf32> to vector<24x32xf32>
    %422 = arith.addf %420, %421 : vector<24x32xf32>
    %cst_129 = arith.constant dense<0.000000e+00> : vector<24x96xf32>
    %423 = tpu.matmul %422, %380, %cst_129 {dimension_numbers = #tpu.dot_dimension_numbers<[1], [0], [0], [1], [0, 0, 1, 1], [], []>} : vector<24x32xf32>, vector<32x96xf32>, vector<24x96xf32> -> vector<24x96xf32>
    %424 = vector.broadcast %393 : vector<1x96xf32> to vector<24x96xf32>
    %425 = arith.addf %423, %424 : vector<24x96xf32>
    %cst_130 = arith.constant 0.000000e+00 : f32
    %426 = vector.broadcast %cst_130 : f32 to vector<24x32xf32>
    %427 = vector.extract_strided_slice %425 {offsets = [0, 0], sizes = [24, 8], strides = [1, 1]} : vector<24x96xf32> to vector<24x8xf32>
    %428 = vector.extract_strided_slice %425 {offsets = [0, 32], sizes = [24, 8], strides = [1, 1]} : vector<24x96xf32> to vector<24x8xf32>
    %429 = vector.extract_strided_slice %425 {offsets = [0, 64], sizes = [24, 8], strides = [1, 1]} : vector<24x96xf32> to vector<24x8xf32>
    %cst_131 = arith.constant dense<0.000000e+00> : vector<24x24xf32>
    %430 = tpu.matmul %427, %428, %cst_131 {dimension_numbers = #tpu.dot_dimension_numbers<[1], [1], [0], [0], [0, 0, 1, 0], [], []>} : vector<24x8xf32>, vector<24x8xf32>, vector<24x24xf32> -> vector<24x24xf32>
    %431 = arith.addf %430, %2 : vector<24x24xf32>
    %cst_132 = arith.constant dense<0xFF800000> : vector<24xf32>
    %432 = vector.multi_reduction <maximumf>, %431, %cst_132 [1] : vector<24x24xf32> to vector<24xf32>
    %433 = vector.shape_cast %432 : vector<24xf32> to vector<24x1xf32>
    %434 = vector.broadcast %433 : vector<24x1xf32> to vector<24x24xf32>
    %435 = arith.subf %431, %434 : vector<24x24xf32>
    %436 = math.exp %435 : vector<24x24xf32>
    %cst_133 = arith.constant dense<0.000000e+00> : vector<24xf32>
    %437 = vector.multi_reduction <add>, %436, %cst_133 [1] : vector<24x24xf32> to vector<24xf32>
    %438 = vector.shape_cast %437 : vector<24xf32> to vector<24x1xf32>
    %439 = tpu.reciprocal %438 {approx = true} : vector<24x1xf32> -> vector<24x1xf32>
    %440 = vector.broadcast %439 : vector<24x1xf32> to vector<24x24xf32>
    %441 = arith.mulf %436, %440 : vector<24x24xf32>
    %cst_134 = arith.constant dense<0.000000e+00> : vector<24x8xf32>
    %442 = tpu.matmul %441, %429, %cst_134 {dimension_numbers = #tpu.dot_dimension_numbers<[1], [0], [0], [1], [0, 0, 1, 1], [], []>} : vector<24x24xf32>, vector<24x8xf32>, vector<24x8xf32> -> vector<24x8xf32>
    %443 = vector.extract_strided_slice %381 {offsets = [0, 0], sizes = [8, 32], strides = [1, 1]} : vector<32x32xf32> to vector<8x32xf32>
    %cst_135 = arith.constant dense<0.000000e+00> : vector<24x32xf32>
    %444 = tpu.matmul %442, %443, %cst_135 {dimension_numbers = #tpu.dot_dimension_numbers<[1], [0], [0], [1], [0, 0, 1, 1], [], []>} : vector<24x8xf32>, vector<8x32xf32>, vector<24x32xf32> -> vector<24x32xf32>
    %445 = arith.addf %426, %444 : vector<24x32xf32>
    %446 = vector.extract_strided_slice %425 {offsets = [0, 8], sizes = [24, 8], strides = [1, 1]} : vector<24x96xf32> to vector<24x8xf32>
    %447 = vector.extract_strided_slice %425 {offsets = [0, 40], sizes = [24, 8], strides = [1, 1]} : vector<24x96xf32> to vector<24x8xf32>
    %448 = vector.extract_strided_slice %425 {offsets = [0, 72], sizes = [24, 8], strides = [1, 1]} : vector<24x96xf32> to vector<24x8xf32>
    %cst_136 = arith.constant dense<0.000000e+00> : vector<24x24xf32>
    %449 = tpu.matmul %446, %447, %cst_136 {dimension_numbers = #tpu.dot_dimension_numbers<[1], [1], [0], [0], [0, 0, 1, 0], [], []>} : vector<24x8xf32>, vector<24x8xf32>, vector<24x24xf32> -> vector<24x24xf32>
    %450 = arith.addf %449, %2 : vector<24x24xf32>
    %cst_137 = arith.constant dense<0xFF800000> : vector<24xf32>
    %451 = vector.multi_reduction <maximumf>, %450, %cst_137 [1] : vector<24x24xf32> to vector<24xf32>
    %452 = vector.shape_cast %451 : vector<24xf32> to vector<24x1xf32>
    %453 = vector.broadcast %452 : vector<24x1xf32> to vector<24x24xf32>
    %454 = arith.subf %450, %453 : vector<24x24xf32>
    %455 = math.exp %454 : vector<24x24xf32>
    %cst_138 = arith.constant dense<0.000000e+00> : vector<24xf32>
    %456 = vector.multi_reduction <add>, %455, %cst_138 [1] : vector<24x24xf32> to vector<24xf32>
    %457 = vector.shape_cast %456 : vector<24xf32> to vector<24x1xf32>
    %458 = tpu.reciprocal %457 {approx = true} : vector<24x1xf32> -> vector<24x1xf32>
    %459 = vector.broadcast %458 : vector<24x1xf32> to vector<24x24xf32>
    %460 = arith.mulf %455, %459 : vector<24x24xf32>
    %cst_139 = arith.constant dense<0.000000e+00> : vector<24x8xf32>
    %461 = tpu.matmul %460, %448, %cst_139 {dimension_numbers = #tpu.dot_dimension_numbers<[1], [0], [0], [1], [0, 0, 1, 1], [], []>} : vector<24x24xf32>, vector<24x8xf32>, vector<24x8xf32> -> vector<24x8xf32>
    %462 = vector.extract_strided_slice %381 {offsets = [8, 0], sizes = [8, 32], strides = [1, 1]} : vector<32x32xf32> to vector<8x32xf32>
    %cst_140 = arith.constant dense<0.000000e+00> : vector<24x32xf32>
    %463 = tpu.matmul %461, %462, %cst_140 {dimension_numbers = #tpu.dot_dimension_numbers<[1], [0], [0], [1], [0, 0, 1, 1], [], []>} : vector<24x8xf32>, vector<8x32xf32>, vector<24x32xf32> -> vector<24x32xf32>
    %464 = arith.addf %445, %463 : vector<24x32xf32>
    %465 = vector.extract_strided_slice %425 {offsets = [0, 16], sizes = [24, 8], strides = [1, 1]} : vector<24x96xf32> to vector<24x8xf32>
    %466 = vector.extract_strided_slice %425 {offsets = [0, 48], sizes = [24, 8], strides = [1, 1]} : vector<24x96xf32> to vector<24x8xf32>
    %467 = vector.extract_strided_slice %425 {offsets = [0, 80], sizes = [24, 8], strides = [1, 1]} : vector<24x96xf32> to vector<24x8xf32>
    %cst_141 = arith.constant dense<0.000000e+00> : vector<24x24xf32>
    %468 = tpu.matmul %465, %466, %cst_141 {dimension_numbers = #tpu.dot_dimension_numbers<[1], [1], [0], [0], [0, 0, 1, 0], [], []>} : vector<24x8xf32>, vector<24x8xf32>, vector<24x24xf32> -> vector<24x24xf32>
    %469 = arith.addf %468, %2 : vector<24x24xf32>
    %cst_142 = arith.constant dense<0xFF800000> : vector<24xf32>
    %470 = vector.multi_reduction <maximumf>, %469, %cst_142 [1] : vector<24x24xf32> to vector<24xf32>
    %471 = vector.shape_cast %470 : vector<24xf32> to vector<24x1xf32>
    %472 = vector.broadcast %471 : vector<24x1xf32> to vector<24x24xf32>
    %473 = arith.subf %469, %472 : vector<24x24xf32>
    %474 = math.exp %473 : vector<24x24xf32>
    %cst_143 = arith.constant dense<0.000000e+00> : vector<24xf32>
    %475 = vector.multi_reduction <add>, %474, %cst_143 [1] : vector<24x24xf32> to vector<24xf32>
    %476 = vector.shape_cast %475 : vector<24xf32> to vector<24x1xf32>
    %477 = tpu.reciprocal %476 {approx = true} : vector<24x1xf32> -> vector<24x1xf32>
    %478 = vector.broadcast %477 : vector<24x1xf32> to vector<24x24xf32>
    %479 = arith.mulf %474, %478 : vector<24x24xf32>
    %cst_144 = arith.constant dense<0.000000e+00> : vector<24x8xf32>
    %480 = tpu.matmul %479, %467, %cst_144 {dimension_numbers = #tpu.dot_dimension_numbers<[1], [0], [0], [1], [0, 0, 1, 1], [], []>} : vector<24x24xf32>, vector<24x8xf32>, vector<24x8xf32> -> vector<24x8xf32>
    %481 = vector.extract_strided_slice %381 {offsets = [16, 0], sizes = [8, 32], strides = [1, 1]} : vector<32x32xf32> to vector<8x32xf32>
    %cst_145 = arith.constant dense<0.000000e+00> : vector<24x32xf32>
    %482 = tpu.matmul %480, %481, %cst_145 {dimension_numbers = #tpu.dot_dimension_numbers<[1], [0], [0], [1], [0, 0, 1, 1], [], []>} : vector<24x8xf32>, vector<8x32xf32>, vector<24x32xf32> -> vector<24x32xf32>
    %483 = arith.addf %464, %482 : vector<24x32xf32>
    %484 = vector.extract_strided_slice %425 {offsets = [0, 24], sizes = [24, 8], strides = [1, 1]} : vector<24x96xf32> to vector<24x8xf32>
    %485 = vector.extract_strided_slice %425 {offsets = [0, 56], sizes = [24, 8], strides = [1, 1]} : vector<24x96xf32> to vector<24x8xf32>
    %486 = vector.extract_strided_slice %425 {offsets = [0, 88], sizes = [24, 8], strides = [1, 1]} : vector<24x96xf32> to vector<24x8xf32>
    %cst_146 = arith.constant dense<0.000000e+00> : vector<24x24xf32>
    %487 = tpu.matmul %484, %485, %cst_146 {dimension_numbers = #tpu.dot_dimension_numbers<[1], [1], [0], [0], [0, 0, 1, 0], [], []>} : vector<24x8xf32>, vector<24x8xf32>, vector<24x24xf32> -> vector<24x24xf32>
    %488 = arith.addf %487, %2 : vector<24x24xf32>
    %cst_147 = arith.constant dense<0xFF800000> : vector<24xf32>
    %489 = vector.multi_reduction <maximumf>, %488, %cst_147 [1] : vector<24x24xf32> to vector<24xf32>
    %490 = vector.shape_cast %489 : vector<24xf32> to vector<24x1xf32>
    %491 = vector.broadcast %490 : vector<24x1xf32> to vector<24x24xf32>
    %492 = arith.subf %488, %491 : vector<24x24xf32>
    %493 = math.exp %492 : vector<24x24xf32>
    %cst_148 = arith.constant dense<0.000000e+00> : vector<24xf32>
    %494 = vector.multi_reduction <add>, %493, %cst_148 [1] : vector<24x24xf32> to vector<24xf32>
    %495 = vector.shape_cast %494 : vector<24xf32> to vector<24x1xf32>
    %496 = tpu.reciprocal %495 {approx = true} : vector<24x1xf32> -> vector<24x1xf32>
    %497 = vector.broadcast %496 : vector<24x1xf32> to vector<24x24xf32>
    %498 = arith.mulf %493, %497 : vector<24x24xf32>
    %cst_149 = arith.constant dense<0.000000e+00> : vector<24x8xf32>
    %499 = tpu.matmul %498, %486, %cst_149 {dimension_numbers = #tpu.dot_dimension_numbers<[1], [0], [0], [1], [0, 0, 1, 1], [], []>} : vector<24x24xf32>, vector<24x8xf32>, vector<24x8xf32> -> vector<24x8xf32>
    %500 = vector.extract_strided_slice %381 {offsets = [24, 0], sizes = [8, 32], strides = [1, 1]} : vector<32x32xf32> to vector<8x32xf32>
    %cst_150 = arith.constant dense<0.000000e+00> : vector<24x32xf32>
    %501 = tpu.matmul %499, %500, %cst_150 {dimension_numbers = #tpu.dot_dimension_numbers<[1], [0], [0], [1], [0, 0, 1, 1], [], []>} : vector<24x8xf32>, vector<8x32xf32>, vector<24x32xf32> -> vector<24x32xf32>
    %502 = arith.addf %483, %501 : vector<24x32xf32>
    %503 = arith.addf %373, %502 : vector<24x32xf32>
    %504 = vector.broadcast %394 : vector<1x32xf32> to vector<24x32xf32>
    %505 = arith.addf %503, %504 : vector<24x32xf32>
    %cst_151 = arith.constant dense<0.000000e+00> : vector<16x96xf32>
    %506 = tpu.matmul %377, %387, %cst_151 {dimension_numbers = #tpu.dot_dimension_numbers<[1], [0], [0], [1], [0, 0, 1, 1], [], []>} : vector<16x32xf32>, vector<32x96xf32>, vector<16x96xf32> -> vector<16x96xf32>
    %507 = vector.broadcast %399 : vector<1x96xf32> to vector<16x96xf32>
    %508 = arith.addf %506, %507 : vector<16x96xf32>
    %509 = vector.extract_strided_slice %508 {offsets = [0, 0], sizes = [16, 8], strides = [1, 1]} : vector<16x96xf32> to vector<16x8xf32>
    %510 = vector.extract_strided_slice %508 {offsets = [0, 32], sizes = [16, 8], strides = [1, 1]} : vector<16x96xf32> to vector<16x8xf32>
    %511 = vector.extract_strided_slice %508 {offsets = [0, 64], sizes = [16, 8], strides = [1, 1]} : vector<16x96xf32> to vector<16x8xf32>
    %cst_152 = arith.constant 0.000000e+00 : f32
    %512 = vector.broadcast %cst_152 : f32 to vector<16x8xf32>
    %513 = arith.cmpf ogt, %509, %512 : vector<16x8xf32>
    %cst_153 = arith.constant 1.000000e+00 : f32
    %514 = vector.broadcast %cst_153 : f32 to vector<16x8xf32>
    %515 = arith.addf %509, %514 : vector<16x8xf32>
    %516 = math.exp %509 : vector<16x8xf32>
    %517 = arith.select %513, %515, %516 : vector<16x8xi1>, vector<16x8xf32>
    %cst_154 = arith.constant 0.000000e+00 : f32
    %518 = vector.broadcast %cst_154 : f32 to vector<16x8xf32>
    %519 = arith.cmpf ogt, %510, %518 : vector<16x8xf32>
    %cst_155 = arith.constant 1.000000e+00 : f32
    %520 = vector.broadcast %cst_155 : f32 to vector<16x8xf32>
    %521 = arith.addf %510, %520 : vector<16x8xf32>
    %522 = math.exp %510 : vector<16x8xf32>
    %523 = arith.select %519, %521, %522 : vector<16x8xi1>, vector<16x8xf32>
    %524 = vector.broadcast %3 : vector<16x1xf32> to vector<16x8xf32>
    %525 = arith.mulf %523, %524 : vector<16x8xf32>
    %526 = vector.extract_strided_slice %525 {offsets = [0, 0], sizes = [8, 8], strides = [1, 1]} : vector<16x8xf32> to vector<8x8xf32>
    %527 = vector.extract_strided_slice %511 {offsets = [0, 0], sizes = [8, 8], strides = [1, 1]} : vector<16x8xf32> to vector<8x8xf32>
    %528 = vector.extract_strided_slice %517 {offsets = [0, 0], sizes = [8, 8], strides = [1, 1]} : vector<16x8xf32> to vector<8x8xf32>
    %cst_156 = arith.constant dense<0.000000e+00> : vector<8x8xf32>
    %529 = tpu.matmul %526, %527, %cst_156 {dimension_numbers = #tpu.dot_dimension_numbers<[0], [0], [1], [1], [0, 1, 1, 1], [], []>} : vector<8x8xf32>, vector<8x8xf32>, vector<8x8xf32> -> vector<8x8xf32>
    %cst_157 = arith.constant dense<0.000000e+00> : vector<8xf32>
    %530 = vector.multi_reduction <add>, %526, %cst_157 [0] : vector<8x8xf32> to vector<8xf32>
    %531 = vector.shape_cast %530 : vector<8xf32> to vector<1x8xf32>
    %532 = vector.broadcast %531 : vector<1x8xf32> to vector<8x8xf32>
    %533 = arith.mulf %528, %532 : vector<8x8xf32>
    %cst_158 = arith.constant dense<0.000000e+00> : vector<8xf32>
    %534 = vector.multi_reduction <add>, %533, %cst_158 [1] : vector<8x8xf32> to vector<8xf32>
    %535 = vector.shape_cast %534 : vector<8xf32> to vector<8x1xf32>
    %cst_159 = arith.constant 9.99999997E-7 : f32
    %536 = vector.broadcast %cst_159 : f32 to vector<8x1xf32>
    %537 = arith.addf %535, %536 : vector<8x1xf32>
    %538 = tpu.reciprocal %537 {approx = true} : vector<8x1xf32> -> vector<8x1xf32>
    %cst_160 = arith.constant dense<0.000000e+00> : vector<8x8xf32>
    %539 = tpu.matmul %528, %529, %cst_160 {dimension_numbers = #tpu.dot_dimension_numbers<[1], [0], [0], [1], [0, 0, 1, 1], [], []>} : vector<8x8xf32>, vector<8x8xf32>, vector<8x8xf32> -> vector<8x8xf32>
    %540 = vector.broadcast %538 : vector<8x1xf32> to vector<8x8xf32>
    %541 = arith.mulf %539, %540 : vector<8x8xf32>
    %542 = vector.extract_strided_slice %525 {offsets = [8, 0], sizes = [8, 8], strides = [1, 1]} : vector<16x8xf32> to vector<8x8xf32>
    %543 = vector.extract_strided_slice %511 {offsets = [8, 0], sizes = [8, 8], strides = [1, 1]} : vector<16x8xf32> to vector<8x8xf32>
    %544 = vector.extract_strided_slice %517 {offsets = [8, 0], sizes = [8, 8], strides = [1, 1]} : vector<16x8xf32> to vector<8x8xf32>
    %cst_161 = arith.constant dense<0.000000e+00> : vector<8x8xf32>
    %545 = tpu.matmul %542, %543, %cst_161 {dimension_numbers = #tpu.dot_dimension_numbers<[0], [0], [1], [1], [0, 1, 1, 1], [], []>} : vector<8x8xf32>, vector<8x8xf32>, vector<8x8xf32> -> vector<8x8xf32>
    %cst_162 = arith.constant dense<0.000000e+00> : vector<8xf32>
    %546 = vector.multi_reduction <add>, %542, %cst_162 [0] : vector<8x8xf32> to vector<8xf32>
    %547 = vector.shape_cast %546 : vector<8xf32> to vector<1x8xf32>
    %548 = vector.broadcast %547 : vector<1x8xf32> to vector<8x8xf32>
    %549 = arith.mulf %544, %548 : vector<8x8xf32>
    %cst_163 = arith.constant dense<0.000000e+00> : vector<8xf32>
    %550 = vector.multi_reduction <add>, %549, %cst_163 [1] : vector<8x8xf32> to vector<8xf32>
    %551 = vector.shape_cast %550 : vector<8xf32> to vector<8x1xf32>
    %cst_164 = arith.constant 9.99999997E-7 : f32
    %552 = vector.broadcast %cst_164 : f32 to vector<8x1xf32>
    %553 = arith.addf %551, %552 : vector<8x1xf32>
    %554 = tpu.reciprocal %553 {approx = true} : vector<8x1xf32> -> vector<8x1xf32>
    %cst_165 = arith.constant dense<0.000000e+00> : vector<8x8xf32>
    %555 = tpu.matmul %544, %545, %cst_165 {dimension_numbers = #tpu.dot_dimension_numbers<[1], [0], [0], [1], [0, 0, 1, 1], [], []>} : vector<8x8xf32>, vector<8x8xf32>, vector<8x8xf32> -> vector<8x8xf32>
    %556 = vector.broadcast %554 : vector<8x1xf32> to vector<8x8xf32>
    %557 = arith.mulf %555, %556 : vector<8x8xf32>
    %558 = tpu.concatenate %541, %557 in 0 : vector<8x8xf32>, vector<8x8xf32> -> vector<16x8xf32>
    %559 = vector.extract_strided_slice %508 {offsets = [0, 8], sizes = [16, 8], strides = [1, 1]} : vector<16x96xf32> to vector<16x8xf32>
    %560 = vector.extract_strided_slice %508 {offsets = [0, 40], sizes = [16, 8], strides = [1, 1]} : vector<16x96xf32> to vector<16x8xf32>
    %561 = vector.extract_strided_slice %508 {offsets = [0, 72], sizes = [16, 8], strides = [1, 1]} : vector<16x96xf32> to vector<16x8xf32>
    %cst_166 = arith.constant 0.000000e+00 : f32
    %562 = vector.broadcast %cst_166 : f32 to vector<16x8xf32>
    %563 = arith.cmpf ogt, %559, %562 : vector<16x8xf32>
    %cst_167 = arith.constant 1.000000e+00 : f32
    %564 = vector.broadcast %cst_167 : f32 to vector<16x8xf32>
    %565 = arith.addf %559, %564 : vector<16x8xf32>
    %566 = math.exp %559 : vector<16x8xf32>
    %567 = arith.select %563, %565, %566 : vector<16x8xi1>, vector<16x8xf32>
    %cst_168 = arith.constant 0.000000e+00 : f32
    %568 = vector.broadcast %cst_168 : f32 to vector<16x8xf32>
    %569 = arith.cmpf ogt, %560, %568 : vector<16x8xf32>
    %cst_169 = arith.constant 1.000000e+00 : f32
    %570 = vector.broadcast %cst_169 : f32 to vector<16x8xf32>
    %571 = arith.addf %560, %570 : vector<16x8xf32>
    %572 = math.exp %560 : vector<16x8xf32>
    %573 = arith.select %569, %571, %572 : vector<16x8xi1>, vector<16x8xf32>
    %574 = vector.broadcast %3 : vector<16x1xf32> to vector<16x8xf32>
    %575 = arith.mulf %573, %574 : vector<16x8xf32>
    %576 = vector.extract_strided_slice %575 {offsets = [0, 0], sizes = [8, 8], strides = [1, 1]} : vector<16x8xf32> to vector<8x8xf32>
    %577 = vector.extract_strided_slice %561 {offsets = [0, 0], sizes = [8, 8], strides = [1, 1]} : vector<16x8xf32> to vector<8x8xf32>
    %578 = vector.extract_strided_slice %567 {offsets = [0, 0], sizes = [8, 8], strides = [1, 1]} : vector<16x8xf32> to vector<8x8xf32>
    %cst_170 = arith.constant dense<0.000000e+00> : vector<8x8xf32>
    %579 = tpu.matmul %576, %577, %cst_170 {dimension_numbers = #tpu.dot_dimension_numbers<[0], [0], [1], [1], [0, 1, 1, 1], [], []>} : vector<8x8xf32>, vector<8x8xf32>, vector<8x8xf32> -> vector<8x8xf32>
    %cst_171 = arith.constant dense<0.000000e+00> : vector<8xf32>
    %580 = vector.multi_reduction <add>, %576, %cst_171 [0] : vector<8x8xf32> to vector<8xf32>
    %581 = vector.shape_cast %580 : vector<8xf32> to vector<1x8xf32>
    %582 = vector.broadcast %581 : vector<1x8xf32> to vector<8x8xf32>
    %583 = arith.mulf %578, %582 : vector<8x8xf32>
    %cst_172 = arith.constant dense<0.000000e+00> : vector<8xf32>
    %584 = vector.multi_reduction <add>, %583, %cst_172 [1] : vector<8x8xf32> to vector<8xf32>
    %585 = vector.shape_cast %584 : vector<8xf32> to vector<8x1xf32>
    %cst_173 = arith.constant 9.99999997E-7 : f32
    %586 = vector.broadcast %cst_173 : f32 to vector<8x1xf32>
    %587 = arith.addf %585, %586 : vector<8x1xf32>
    %588 = tpu.reciprocal %587 {approx = true} : vector<8x1xf32> -> vector<8x1xf32>
    %cst_174 = arith.constant dense<0.000000e+00> : vector<8x8xf32>
    %589 = tpu.matmul %578, %579, %cst_174 {dimension_numbers = #tpu.dot_dimension_numbers<[1], [0], [0], [1], [0, 0, 1, 1], [], []>} : vector<8x8xf32>, vector<8x8xf32>, vector<8x8xf32> -> vector<8x8xf32>
    %590 = vector.broadcast %588 : vector<8x1xf32> to vector<8x8xf32>
    %591 = arith.mulf %589, %590 : vector<8x8xf32>
    %592 = vector.extract_strided_slice %575 {offsets = [8, 0], sizes = [8, 8], strides = [1, 1]} : vector<16x8xf32> to vector<8x8xf32>
    %593 = vector.extract_strided_slice %561 {offsets = [8, 0], sizes = [8, 8], strides = [1, 1]} : vector<16x8xf32> to vector<8x8xf32>
    %594 = vector.extract_strided_slice %567 {offsets = [8, 0], sizes = [8, 8], strides = [1, 1]} : vector<16x8xf32> to vector<8x8xf32>
    %cst_175 = arith.constant dense<0.000000e+00> : vector<8x8xf32>
    %595 = tpu.matmul %592, %593, %cst_175 {dimension_numbers = #tpu.dot_dimension_numbers<[0], [0], [1], [1], [0, 1, 1, 1], [], []>} : vector<8x8xf32>, vector<8x8xf32>, vector<8x8xf32> -> vector<8x8xf32>
    %cst_176 = arith.constant dense<0.000000e+00> : vector<8xf32>
    %596 = vector.multi_reduction <add>, %592, %cst_176 [0] : vector<8x8xf32> to vector<8xf32>
    %597 = vector.shape_cast %596 : vector<8xf32> to vector<1x8xf32>
    %598 = vector.broadcast %597 : vector<1x8xf32> to vector<8x8xf32>
    %599 = arith.mulf %594, %598 : vector<8x8xf32>
    %cst_177 = arith.constant dense<0.000000e+00> : vector<8xf32>
    %600 = vector.multi_reduction <add>, %599, %cst_177 [1] : vector<8x8xf32> to vector<8xf32>
    %601 = vector.shape_cast %600 : vector<8xf32> to vector<8x1xf32>
    %cst_178 = arith.constant 9.99999997E-7 : f32
    %602 = vector.broadcast %cst_178 : f32 to vector<8x1xf32>
    %603 = arith.addf %601, %602 : vector<8x1xf32>
    %604 = tpu.reciprocal %603 {approx = true} : vector<8x1xf32> -> vector<8x1xf32>
    %cst_179 = arith.constant dense<0.000000e+00> : vector<8x8xf32>
    %605 = tpu.matmul %594, %595, %cst_179 {dimension_numbers = #tpu.dot_dimension_numbers<[1], [0], [0], [1], [0, 0, 1, 1], [], []>} : vector<8x8xf32>, vector<8x8xf32>, vector<8x8xf32> -> vector<8x8xf32>
    %606 = vector.broadcast %604 : vector<8x1xf32> to vector<8x8xf32>
    %607 = arith.mulf %605, %606 : vector<8x8xf32>
    %608 = tpu.concatenate %591, %607 in 0 : vector<8x8xf32>, vector<8x8xf32> -> vector<16x8xf32>
    %609 = vector.extract_strided_slice %508 {offsets = [0, 16], sizes = [16, 8], strides = [1, 1]} : vector<16x96xf32> to vector<16x8xf32>
    %610 = vector.extract_strided_slice %508 {offsets = [0, 48], sizes = [16, 8], strides = [1, 1]} : vector<16x96xf32> to vector<16x8xf32>
    %611 = vector.extract_strided_slice %508 {offsets = [0, 80], sizes = [16, 8], strides = [1, 1]} : vector<16x96xf32> to vector<16x8xf32>
    %cst_180 = arith.constant 0.000000e+00 : f32
    %612 = vector.broadcast %cst_180 : f32 to vector<16x8xf32>
    %613 = arith.cmpf ogt, %609, %612 : vector<16x8xf32>
    %cst_181 = arith.constant 1.000000e+00 : f32
    %614 = vector.broadcast %cst_181 : f32 to vector<16x8xf32>
    %615 = arith.addf %609, %614 : vector<16x8xf32>
    %616 = math.exp %609 : vector<16x8xf32>
    %617 = arith.select %613, %615, %616 : vector<16x8xi1>, vector<16x8xf32>
    %cst_182 = arith.constant 0.000000e+00 : f32
    %618 = vector.broadcast %cst_182 : f32 to vector<16x8xf32>
    %619 = arith.cmpf ogt, %610, %618 : vector<16x8xf32>
    %cst_183 = arith.constant 1.000000e+00 : f32
    %620 = vector.broadcast %cst_183 : f32 to vector<16x8xf32>
    %621 = arith.addf %610, %620 : vector<16x8xf32>
    %622 = math.exp %610 : vector<16x8xf32>
    %623 = arith.select %619, %621, %622 : vector<16x8xi1>, vector<16x8xf32>
    %624 = vector.broadcast %3 : vector<16x1xf32> to vector<16x8xf32>
    %625 = arith.mulf %623, %624 : vector<16x8xf32>
    %626 = vector.extract_strided_slice %625 {offsets = [0, 0], sizes = [8, 8], strides = [1, 1]} : vector<16x8xf32> to vector<8x8xf32>
    %627 = vector.extract_strided_slice %611 {offsets = [0, 0], sizes = [8, 8], strides = [1, 1]} : vector<16x8xf32> to vector<8x8xf32>
    %628 = vector.extract_strided_slice %617 {offsets = [0, 0], sizes = [8, 8], strides = [1, 1]} : vector<16x8xf32> to vector<8x8xf32>
    %cst_184 = arith.constant dense<0.000000e+00> : vector<8x8xf32>
    %629 = tpu.matmul %626, %627, %cst_184 {dimension_numbers = #tpu.dot_dimension_numbers<[0], [0], [1], [1], [0, 1, 1, 1], [], []>} : vector<8x8xf32>, vector<8x8xf32>, vector<8x8xf32> -> vector<8x8xf32>
    %cst_185 = arith.constant dense<0.000000e+00> : vector<8xf32>
    %630 = vector.multi_reduction <add>, %626, %cst_185 [0] : vector<8x8xf32> to vector<8xf32>
    %631 = vector.shape_cast %630 : vector<8xf32> to vector<1x8xf32>
    %632 = vector.broadcast %631 : vector<1x8xf32> to vector<8x8xf32>
    %633 = arith.mulf %628, %632 : vector<8x8xf32>
    %cst_186 = arith.constant dense<0.000000e+00> : vector<8xf32>
    %634 = vector.multi_reduction <add>, %633, %cst_186 [1] : vector<8x8xf32> to vector<8xf32>
    %635 = vector.shape_cast %634 : vector<8xf32> to vector<8x1xf32>
    %cst_187 = arith.constant 9.99999997E-7 : f32
    %636 = vector.broadcast %cst_187 : f32 to vector<8x1xf32>
    %637 = arith.addf %635, %636 : vector<8x1xf32>
    %638 = tpu.reciprocal %637 {approx = true} : vector<8x1xf32> -> vector<8x1xf32>
    %cst_188 = arith.constant dense<0.000000e+00> : vector<8x8xf32>
    %639 = tpu.matmul %628, %629, %cst_188 {dimension_numbers = #tpu.dot_dimension_numbers<[1], [0], [0], [1], [0, 0, 1, 1], [], []>} : vector<8x8xf32>, vector<8x8xf32>, vector<8x8xf32> -> vector<8x8xf32>
    %640 = vector.broadcast %638 : vector<8x1xf32> to vector<8x8xf32>
    %641 = arith.mulf %639, %640 : vector<8x8xf32>
    %642 = vector.extract_strided_slice %625 {offsets = [8, 0], sizes = [8, 8], strides = [1, 1]} : vector<16x8xf32> to vector<8x8xf32>
    %643 = vector.extract_strided_slice %611 {offsets = [8, 0], sizes = [8, 8], strides = [1, 1]} : vector<16x8xf32> to vector<8x8xf32>
    %644 = vector.extract_strided_slice %617 {offsets = [8, 0], sizes = [8, 8], strides = [1, 1]} : vector<16x8xf32> to vector<8x8xf32>
    %cst_189 = arith.constant dense<0.000000e+00> : vector<8x8xf32>
    %645 = tpu.matmul %642, %643, %cst_189 {dimension_numbers = #tpu.dot_dimension_numbers<[0], [0], [1], [1], [0, 1, 1, 1], [], []>} : vector<8x8xf32>, vector<8x8xf32>, vector<8x8xf32> -> vector<8x8xf32>
    %cst_190 = arith.constant dense<0.000000e+00> : vector<8xf32>
    %646 = vector.multi_reduction <add>, %642, %cst_190 [0] : vector<8x8xf32> to vector<8xf32>
    %647 = vector.shape_cast %646 : vector<8xf32> to vector<1x8xf32>
    %648 = vector.broadcast %647 : vector<1x8xf32> to vector<8x8xf32>
    %649 = arith.mulf %644, %648 : vector<8x8xf32>
    %cst_191 = arith.constant dense<0.000000e+00> : vector<8xf32>
    %650 = vector.multi_reduction <add>, %649, %cst_191 [1] : vector<8x8xf32> to vector<8xf32>
    %651 = vector.shape_cast %650 : vector<8xf32> to vector<8x1xf32>
    %cst_192 = arith.constant 9.99999997E-7 : f32
    %652 = vector.broadcast %cst_192 : f32 to vector<8x1xf32>
    %653 = arith.addf %651, %652 : vector<8x1xf32>
    %654 = tpu.reciprocal %653 {approx = true} : vector<8x1xf32> -> vector<8x1xf32>
    %cst_193 = arith.constant dense<0.000000e+00> : vector<8x8xf32>
    %655 = tpu.matmul %644, %645, %cst_193 {dimension_numbers = #tpu.dot_dimension_numbers<[1], [0], [0], [1], [0, 0, 1, 1], [], []>} : vector<8x8xf32>, vector<8x8xf32>, vector<8x8xf32> -> vector<8x8xf32>
    %656 = vector.broadcast %654 : vector<8x1xf32> to vector<8x8xf32>
    %657 = arith.mulf %655, %656 : vector<8x8xf32>
    %658 = tpu.concatenate %641, %657 in 0 : vector<8x8xf32>, vector<8x8xf32> -> vector<16x8xf32>
    %659 = vector.extract_strided_slice %508 {offsets = [0, 24], sizes = [16, 8], strides = [1, 1]} : vector<16x96xf32> to vector<16x8xf32>
    %660 = vector.extract_strided_slice %508 {offsets = [0, 56], sizes = [16, 8], strides = [1, 1]} : vector<16x96xf32> to vector<16x8xf32>
    %661 = vector.extract_strided_slice %508 {offsets = [0, 88], sizes = [16, 8], strides = [1, 1]} : vector<16x96xf32> to vector<16x8xf32>
    %cst_194 = arith.constant 0.000000e+00 : f32
    %662 = vector.broadcast %cst_194 : f32 to vector<16x8xf32>
    %663 = arith.cmpf ogt, %659, %662 : vector<16x8xf32>
    %cst_195 = arith.constant 1.000000e+00 : f32
    %664 = vector.broadcast %cst_195 : f32 to vector<16x8xf32>
    %665 = arith.addf %659, %664 : vector<16x8xf32>
    %666 = math.exp %659 : vector<16x8xf32>
    %667 = arith.select %663, %665, %666 : vector<16x8xi1>, vector<16x8xf32>
    %cst_196 = arith.constant 0.000000e+00 : f32
    %668 = vector.broadcast %cst_196 : f32 to vector<16x8xf32>
    %669 = arith.cmpf ogt, %660, %668 : vector<16x8xf32>
    %cst_197 = arith.constant 1.000000e+00 : f32
    %670 = vector.broadcast %cst_197 : f32 to vector<16x8xf32>
    %671 = arith.addf %660, %670 : vector<16x8xf32>
    %672 = math.exp %660 : vector<16x8xf32>
    %673 = arith.select %669, %671, %672 : vector<16x8xi1>, vector<16x8xf32>
    %674 = vector.broadcast %3 : vector<16x1xf32> to vector<16x8xf32>
    %675 = arith.mulf %673, %674 : vector<16x8xf32>
    %676 = vector.extract_strided_slice %675 {offsets = [0, 0], sizes = [8, 8], strides = [1, 1]} : vector<16x8xf32> to vector<8x8xf32>
    %677 = vector.extract_strided_slice %661 {offsets = [0, 0], sizes = [8, 8], strides = [1, 1]} : vector<16x8xf32> to vector<8x8xf32>
    %678 = vector.extract_strided_slice %667 {offsets = [0, 0], sizes = [8, 8], strides = [1, 1]} : vector<16x8xf32> to vector<8x8xf32>
    %cst_198 = arith.constant dense<0.000000e+00> : vector<8x8xf32>
    %679 = tpu.matmul %676, %677, %cst_198 {dimension_numbers = #tpu.dot_dimension_numbers<[0], [0], [1], [1], [0, 1, 1, 1], [], []>} : vector<8x8xf32>, vector<8x8xf32>, vector<8x8xf32> -> vector<8x8xf32>
    %cst_199 = arith.constant dense<0.000000e+00> : vector<8xf32>
    %680 = vector.multi_reduction <add>, %676, %cst_199 [0] : vector<8x8xf32> to vector<8xf32>
    %681 = vector.shape_cast %680 : vector<8xf32> to vector<1x8xf32>
    %682 = vector.broadcast %681 : vector<1x8xf32> to vector<8x8xf32>
    %683 = arith.mulf %678, %682 : vector<8x8xf32>
    %cst_200 = arith.constant dense<0.000000e+00> : vector<8xf32>
    %684 = vector.multi_reduction <add>, %683, %cst_200 [1] : vector<8x8xf32> to vector<8xf32>
    %685 = vector.shape_cast %684 : vector<8xf32> to vector<8x1xf32>
    %cst_201 = arith.constant 9.99999997E-7 : f32
    %686 = vector.broadcast %cst_201 : f32 to vector<8x1xf32>
    %687 = arith.addf %685, %686 : vector<8x1xf32>
    %688 = tpu.reciprocal %687 {approx = true} : vector<8x1xf32> -> vector<8x1xf32>
    %cst_202 = arith.constant dense<0.000000e+00> : vector<8x8xf32>
    %689 = tpu.matmul %678, %679, %cst_202 {dimension_numbers = #tpu.dot_dimension_numbers<[1], [0], [0], [1], [0, 0, 1, 1], [], []>} : vector<8x8xf32>, vector<8x8xf32>, vector<8x8xf32> -> vector<8x8xf32>
    %690 = vector.broadcast %688 : vector<8x1xf32> to vector<8x8xf32>
    %691 = arith.mulf %689, %690 : vector<8x8xf32>
    %692 = vector.extract_strided_slice %675 {offsets = [8, 0], sizes = [8, 8], strides = [1, 1]} : vector<16x8xf32> to vector<8x8xf32>
    %693 = vector.extract_strided_slice %661 {offsets = [8, 0], sizes = [8, 8], strides = [1, 1]} : vector<16x8xf32> to vector<8x8xf32>
    %694 = vector.extract_strided_slice %667 {offsets = [8, 0], sizes = [8, 8], strides = [1, 1]} : vector<16x8xf32> to vector<8x8xf32>
    %cst_203 = arith.constant dense<0.000000e+00> : vector<8x8xf32>
    %695 = tpu.matmul %692, %693, %cst_203 {dimension_numbers = #tpu.dot_dimension_numbers<[0], [0], [1], [1], [0, 1, 1, 1], [], []>} : vector<8x8xf32>, vector<8x8xf32>, vector<8x8xf32> -> vector<8x8xf32>
    %cst_204 = arith.constant dense<0.000000e+00> : vector<8xf32>
    %696 = vector.multi_reduction <add>, %692, %cst_204 [0] : vector<8x8xf32> to vector<8xf32>
    %697 = vector.shape_cast %696 : vector<8xf32> to vector<1x8xf32>
    %698 = vector.broadcast %697 : vector<1x8xf32> to vector<8x8xf32>
    %699 = arith.mulf %694, %698 : vector<8x8xf32>
    %cst_205 = arith.constant dense<0.000000e+00> : vector<8xf32>
    %700 = vector.multi_reduction <add>, %699, %cst_205 [1] : vector<8x8xf32> to vector<8xf32>
    %701 = vector.shape_cast %700 : vector<8xf32> to vector<8x1xf32>
    %cst_206 = arith.constant 9.99999997E-7 : f32
    %702 = vector.broadcast %cst_206 : f32 to vector<8x1xf32>
    %703 = arith.addf %701, %702 : vector<8x1xf32>
    %704 = tpu.reciprocal %703 {approx = true} : vector<8x1xf32> -> vector<8x1xf32>
    %cst_207 = arith.constant dense<0.000000e+00> : vector<8x8xf32>
    %705 = tpu.matmul %694, %695, %cst_207 {dimension_numbers = #tpu.dot_dimension_numbers<[1], [0], [0], [1], [0, 0, 1, 1], [], []>} : vector<8x8xf32>, vector<8x8xf32>, vector<8x8xf32> -> vector<8x8xf32>
    %706 = vector.broadcast %704 : vector<8x1xf32> to vector<8x8xf32>
    %707 = arith.mulf %705, %706 : vector<8x8xf32>
    %708 = tpu.concatenate %691, %707 in 0 : vector<8x8xf32>, vector<8x8xf32> -> vector<16x8xf32>
    %709 = tpu.concatenate %558, %608, %658, %708 in 1 : vector<16x8xf32>, vector<16x8xf32>, vector<16x8xf32>, vector<16x8xf32> -> vector<16x32xf32>
    %710 = arith.addf %377, %709 : vector<16x32xf32>
    %cst_208 = arith.constant dense<0.000000e+00> : vector<24xf32>
    %711 = vector.multi_reduction <add>, %505, %cst_208 [1] : vector<24x32xf32> to vector<24xf32>
    %712 = vector.shape_cast %711 : vector<24xf32> to vector<24x1xf32>
    %cst_209 = arith.constant 3.200000e+01 : f32
    %713 = vector.broadcast %cst_209 : f32 to vector<24x1xf32>
    %714 = arith.divf %712, %713 : vector<24x1xf32>
    %715 = vector.broadcast %714 : vector<24x1xf32> to vector<24x32xf32>
    %716 = arith.subf %505, %715 : vector<24x32xf32>
    %717 = arith.mulf %716, %716 : vector<24x32xf32>
    %cst_210 = arith.constant dense<0.000000e+00> : vector<24xf32>
    %718 = vector.multi_reduction <add>, %717, %cst_210 [1] : vector<24x32xf32> to vector<24xf32>
    %719 = vector.shape_cast %718 : vector<24xf32> to vector<24x1xf32>
    %cst_211 = arith.constant 3.200000e+01 : f32
    %720 = vector.broadcast %cst_211 : f32 to vector<24x1xf32>
    %721 = arith.divf %719, %720 : vector<24x1xf32>
    %722 = vector.broadcast %714 : vector<24x1xf32> to vector<24x32xf32>
    %723 = arith.subf %505, %722 : vector<24x32xf32>
    %cst_212 = arith.constant 9.99999974E-6 : f32
    %724 = vector.broadcast %cst_212 : f32 to vector<24x1xf32>
    %725 = arith.addf %721, %724 : vector<24x1xf32>
    %726 = math.rsqrt %725 : vector<24x1xf32>
    %727 = vector.broadcast %726 : vector<24x1xf32> to vector<24x32xf32>
    %728 = arith.mulf %723, %727 : vector<24x32xf32>
    %729 = vector.broadcast %395 : vector<1x32xf32> to vector<24x32xf32>
    %730 = arith.mulf %728, %729 : vector<24x32xf32>
    %731 = vector.broadcast %396 : vector<1x32xf32> to vector<24x32xf32>
    %732 = arith.addf %730, %731 : vector<24x32xf32>
    %cst_213 = arith.constant dense<0.000000e+00> : vector<24x64xf32>
    %733 = tpu.matmul %732, %382, %cst_213 {dimension_numbers = #tpu.dot_dimension_numbers<[1], [0], [0], [1], [0, 0, 1, 1], [], []>} : vector<24x32xf32>, vector<32x64xf32>, vector<24x64xf32> -> vector<24x64xf32>
    %734 = vector.broadcast %397 : vector<1x64xf32> to vector<24x64xf32>
    %735 = arith.addf %733, %734 : vector<24x64xf32>
    %cst_214 = arith.constant 5.000000e-01 : f32
    %736 = vector.broadcast %cst_214 : f32 to vector<24x64xf32>
    %737 = arith.mulf %736, %735 : vector<24x64xf32>
    %cst_215 = arith.constant 0.707106769 : f32
    %738 = vector.broadcast %cst_215 : f32 to vector<24x64xf32>
    %739 = arith.mulf %735, %738 : vector<24x64xf32>
    %740 = math.erf %739 : vector<24x64xf32>
    %cst_216 = arith.constant 1.000000e+00 : f32
    %741 = vector.broadcast %cst_216 : f32 to vector<24x64xf32>
    %742 = arith.addf %741, %740 : vector<24x64xf32>
    %743 = arith.mulf %737, %742 : vector<24x64xf32>
    %cst_217 = arith.constant dense<0.000000e+00> : vector<24x32xf32>
    %744 = tpu.matmul %743, %384, %cst_217 {dimension_numbers = #tpu.dot_dimension_numbers<[1], [0], [0], [1], [0, 0, 1, 1], [], []>} : vector<24x64xf32>, vector<64x32xf32>, vector<24x32xf32> -> vector<24x32xf32>
    %745 = vector.broadcast %398 : vector<1x32xf32> to vector<24x32xf32>
    %746 = arith.addf %744, %745 : vector<24x32xf32>
    %747 = arith.addf %505, %746 : vector<24x32xf32>
    %cst_218 = arith.constant dense<0.000000e+00> : vector<16x32xf32>
    %748 = tpu.matmul %710, %388, %cst_218 {dimension_numbers = #tpu.dot_dimension_numbers<[1], [0], [0], [1], [0, 0, 1, 1], [], []>} : vector<16x32xf32>, vector<32x32xf32>, vector<16x32xf32> -> vector<16x32xf32>
    %749 = arith.addf %710, %748 : vector<16x32xf32>
    %750 = vector.broadcast %400 : vector<1x32xf32> to vector<16x32xf32>
    %751 = arith.addf %749, %750 : vector<16x32xf32>
    %c0_219 = arith.constant 0 : index
    %c0_220 = arith.constant 0 : index
    %752 = vector.load %arg10[%c0_219, %c0_220] : memref<9x128xf32, #tpu.memory_space<vmem>>, vector<9x128xf32>
    %753 = vector.extract_strided_slice %752 {offsets = [0, 0], sizes = [1, 32], strides = [1, 1]} : vector<9x128xf32> to vector<1x32xf32>
    %754 = vector.extract_strided_slice %752 {offsets = [1, 0], sizes = [1, 32], strides = [1, 1]} : vector<9x128xf32> to vector<1x32xf32>
    %755 = vector.extract_strided_slice %752 {offsets = [2, 0], sizes = [1, 32], strides = [1, 1]} : vector<9x128xf32> to vector<1x32xf32>
    %756 = vector.extract_strided_slice %752 {offsets = [3, 0], sizes = [1, 32], strides = [1, 1]} : vector<9x128xf32> to vector<1x32xf32>
    %757 = vector.extract_strided_slice %752 {offsets = [4, 0], sizes = [1, 32], strides = [1, 1]} : vector<9x128xf32> to vector<1x32xf32>
    %758 = vector.extract_strided_slice %752 {offsets = [5, 0], sizes = [1, 32], strides = [1, 1]} : vector<9x128xf32> to vector<1x32xf32>
    %759 = vector.extract_strided_slice %752 {offsets = [6, 0], sizes = [1, 32], strides = [1, 1]} : vector<9x128xf32> to vector<1x32xf32>
    %760 = vector.extract_strided_slice %752 {offsets = [7, 0], sizes = [1, 32], strides = [1, 1]} : vector<9x128xf32> to vector<1x32xf32>
    %761 = vector.extract_strided_slice %752 {offsets = [8, 0], sizes = [1, 128], strides = [1, 1]} : vector<9x128xf32> to vector<1x128xf32>
    %c0_221 = arith.constant 0 : index
    %c0_222 = arith.constant 0 : index
    %762 = vector.load %arg9[%c0_221, %c0_222] : memref<32x256xf32, #tpu.memory_space<vmem>>, vector<32x256xf32>
    %763 = vector.extract_strided_slice %762 {offsets = [0, 0], sizes = [32, 32], strides = [1, 1]} : vector<32x256xf32> to vector<32x32xf32>
    %764 = vector.extract_strided_slice %762 {offsets = [0, 32], sizes = [32, 32], strides = [1, 1]} : vector<32x256xf32> to vector<32x32xf32>
    %765 = vector.extract_strided_slice %762 {offsets = [0, 64], sizes = [32, 32], strides = [1, 1]} : vector<32x256xf32> to vector<32x32xf32>
    %766 = vector.extract_strided_slice %762 {offsets = [0, 96], sizes = [32, 32], strides = [1, 1]} : vector<32x256xf32> to vector<32x32xf32>
    %767 = vector.extract_strided_slice %762 {offsets = [0, 128], sizes = [32, 128], strides = [1, 1]} : vector<32x256xf32> to vector<32x128xf32>
    %cst_223 = arith.constant dense<0.000000e+00> : vector<24xf32>
    %768 = vector.multi_reduction <add>, %747, %cst_223 [1] : vector<24x32xf32> to vector<24xf32>
    %769 = vector.shape_cast %768 : vector<24xf32> to vector<24x1xf32>
    %cst_224 = arith.constant 3.200000e+01 : f32
    %770 = vector.broadcast %cst_224 : f32 to vector<24x1xf32>
    %771 = arith.divf %769, %770 : vector<24x1xf32>
    %772 = vector.broadcast %771 : vector<24x1xf32> to vector<24x32xf32>
    %773 = arith.subf %747, %772 : vector<24x32xf32>
    %774 = arith.mulf %773, %773 : vector<24x32xf32>
    %cst_225 = arith.constant dense<0.000000e+00> : vector<24xf32>
    %775 = vector.multi_reduction <add>, %774, %cst_225 [1] : vector<24x32xf32> to vector<24xf32>
    %776 = vector.shape_cast %775 : vector<24xf32> to vector<24x1xf32>
    %cst_226 = arith.constant 3.200000e+01 : f32
    %777 = vector.broadcast %cst_226 : f32 to vector<24x1xf32>
    %778 = arith.divf %776, %777 : vector<24x1xf32>
    %779 = vector.broadcast %771 : vector<24x1xf32> to vector<24x32xf32>
    %780 = arith.subf %747, %779 : vector<24x32xf32>
    %cst_227 = arith.constant 9.99999974E-6 : f32
    %781 = vector.broadcast %cst_227 : f32 to vector<24x1xf32>
    %782 = arith.addf %778, %781 : vector<24x1xf32>
    %783 = math.rsqrt %782 : vector<24x1xf32>
    %784 = vector.broadcast %783 : vector<24x1xf32> to vector<24x32xf32>
    %785 = arith.mulf %780, %784 : vector<24x32xf32>
    %786 = vector.broadcast %753 : vector<1x32xf32> to vector<24x32xf32>
    %787 = arith.mulf %785, %786 : vector<24x32xf32>
    %788 = vector.broadcast %754 : vector<1x32xf32> to vector<24x32xf32>
    %789 = arith.addf %787, %788 : vector<24x32xf32>
    %cst_228 = arith.constant dense<0.000000e+00> : vector<16xf32>
    %790 = vector.multi_reduction <add>, %751, %cst_228 [1] : vector<16x32xf32> to vector<16xf32>
    %791 = vector.shape_cast %790 : vector<16xf32> to vector<16x1xf32>
    %cst_229 = arith.constant 3.200000e+01 : f32
    %792 = vector.broadcast %cst_229 : f32 to vector<16x1xf32>
    %793 = arith.divf %791, %792 : vector<16x1xf32>
    %794 = vector.broadcast %793 : vector<16x1xf32> to vector<16x32xf32>
    %795 = arith.subf %751, %794 : vector<16x32xf32>
    %796 = arith.mulf %795, %795 : vector<16x32xf32>
    %cst_230 = arith.constant dense<0.000000e+00> : vector<16xf32>
    %797 = vector.multi_reduction <add>, %796, %cst_230 [1] : vector<16x32xf32> to vector<16xf32>
    %798 = vector.shape_cast %797 : vector<16xf32> to vector<16x1xf32>
    %cst_231 = arith.constant 3.200000e+01 : f32
    %799 = vector.broadcast %cst_231 : f32 to vector<16x1xf32>
    %800 = arith.divf %798, %799 : vector<16x1xf32>
    %801 = vector.broadcast %793 : vector<16x1xf32> to vector<16x32xf32>
    %802 = arith.subf %751, %801 : vector<16x32xf32>
    %cst_232 = arith.constant 9.99999974E-6 : f32
    %803 = vector.broadcast %cst_232 : f32 to vector<16x1xf32>
    %804 = arith.addf %800, %803 : vector<16x1xf32>
    %805 = math.rsqrt %804 : vector<16x1xf32>
    %806 = vector.broadcast %805 : vector<16x1xf32> to vector<16x32xf32>
    %807 = arith.mulf %802, %806 : vector<16x32xf32>
    %808 = vector.broadcast %755 : vector<1x32xf32> to vector<16x32xf32>
    %809 = arith.mulf %807, %808 : vector<16x32xf32>
    %810 = vector.broadcast %756 : vector<1x32xf32> to vector<16x32xf32>
    %811 = arith.addf %809, %810 : vector<16x32xf32>
    %cst_233 = arith.constant dense<0.000000e+00> : vector<16x32xf32>
    %812 = tpu.matmul %811, %763, %cst_233 {dimension_numbers = #tpu.dot_dimension_numbers<[1], [0], [0], [1], [0, 0, 1, 1], [], []>} : vector<16x32xf32>, vector<32x32xf32>, vector<16x32xf32> -> vector<16x32xf32>
    %813 = vector.broadcast %757 : vector<1x32xf32> to vector<16x32xf32>
    %814 = arith.addf %812, %813 : vector<16x32xf32>
    %cst_234 = arith.constant dense<0.000000e+00> : vector<24x32xf32>
    %815 = tpu.matmul %789, %764, %cst_234 {dimension_numbers = #tpu.dot_dimension_numbers<[1], [0], [0], [1], [0, 0, 1, 1], [], []>} : vector<24x32xf32>, vector<32x32xf32>, vector<24x32xf32> -> vector<24x32xf32>
    %816 = vector.broadcast %758 : vector<1x32xf32> to vector<24x32xf32>
    %817 = arith.addf %815, %816 : vector<24x32xf32>
    %818 = vector.extract_strided_slice %814 {offsets = [0, 0], sizes = [8, 32], strides = [1, 1]} : vector<16x32xf32> to vector<8x32xf32>
    %cst_235 = arith.constant dense<0.000000e+00> : vector<32xf32>
    %819 = vector.multi_reduction <add>, %818, %cst_235 [0] : vector<8x32xf32> to vector<32xf32>
    %820 = vector.shape_cast %819 : vector<32xf32> to vector<1x32xf32>
    %821 = vector.extract_strided_slice %817 {offsets = [0, 0], sizes = [12, 32], strides = [1, 1]} : vector<24x32xf32> to vector<12x32xf32>
    %cst_236 = arith.constant dense<0.000000e+00> : vector<32xf32>
    %822 = vector.multi_reduction <add>, %821, %cst_236 [0] : vector<12x32xf32> to vector<32xf32>
    %823 = vector.shape_cast %822 : vector<32xf32> to vector<1x32xf32>
    %824 = arith.addf %820, %823 : vector<1x32xf32>
    %cst_237 = arith.constant 5.000000e-02 : f32
    %825 = vector.broadcast %cst_237 : f32 to vector<1x32xf32>
    %826 = arith.mulf %824, %825 : vector<1x32xf32>
    %827 = vector.extract_strided_slice %814 {offsets = [8, 0], sizes = [8, 32], strides = [1, 1]} : vector<16x32xf32> to vector<8x32xf32>
    %cst_238 = arith.constant dense<0.000000e+00> : vector<32xf32>
    %828 = vector.multi_reduction <add>, %827, %cst_238 [0] : vector<8x32xf32> to vector<32xf32>
    %829 = vector.shape_cast %828 : vector<32xf32> to vector<1x32xf32>
    %830 = vector.extract_strided_slice %817 {offsets = [12, 0], sizes = [12, 32], strides = [1, 1]} : vector<24x32xf32> to vector<12x32xf32>
    %cst_239 = arith.constant dense<0.000000e+00> : vector<32xf32>
    %831 = vector.multi_reduction <add>, %830, %cst_239 [0] : vector<12x32xf32> to vector<32xf32>
    %832 = vector.shape_cast %831 : vector<32xf32> to vector<1x32xf32>
    %833 = arith.addf %829, %832 : vector<1x32xf32>
    %cst_240 = arith.constant 5.000000e-02 : f32
    %834 = vector.broadcast %cst_240 : f32 to vector<1x32xf32>
    %835 = arith.mulf %833, %834 : vector<1x32xf32>
    %836 = tpu.concatenate %826, %835 in 0 : vector<1x32xf32>, vector<1x32xf32> -> vector<2x32xf32>
    %cst_241 = arith.constant dense<0.000000e+00> : vector<2x32xf32>
    %837 = tpu.matmul %836, %765, %cst_241 {dimension_numbers = #tpu.dot_dimension_numbers<[1], [0], [0], [1], [0, 0, 1, 1], [], []>} : vector<2x32xf32>, vector<32x32xf32>, vector<2x32xf32> -> vector<2x32xf32>
    %838 = vector.broadcast %759 : vector<1x32xf32> to vector<2x32xf32>
    %839 = arith.addf %837, %838 : vector<2x32xf32>
    %cst_242 = arith.constant 5.000000e-01 : f32
    %840 = vector.broadcast %cst_242 : f32 to vector<2x32xf32>
    %841 = arith.mulf %840, %839 : vector<2x32xf32>
    %cst_243 = arith.constant 0.707106769 : f32
    %842 = vector.broadcast %cst_243 : f32 to vector<2x32xf32>
    %843 = arith.mulf %839, %842 : vector<2x32xf32>
    %844 = math.erf %843 : vector<2x32xf32>
    %cst_244 = arith.constant 1.000000e+00 : f32
    %845 = vector.broadcast %cst_244 : f32 to vector<2x32xf32>
    %846 = arith.addf %845, %844 : vector<2x32xf32>
    %847 = arith.mulf %841, %846 : vector<2x32xf32>
    %848 = arith.addf %847, %836 : vector<2x32xf32>
    %cst_245 = arith.constant dense<0.000000e+00> : vector<2x32xf32>
    %849 = tpu.matmul %848, %766, %cst_245 {dimension_numbers = #tpu.dot_dimension_numbers<[1], [0], [0], [1], [0, 0, 1, 1], [], []>} : vector<2x32xf32>, vector<32x32xf32>, vector<2x32xf32> -> vector<2x32xf32>
    %850 = vector.broadcast %760 : vector<1x32xf32> to vector<2x32xf32>
    %851 = arith.addf %849, %850 : vector<2x32xf32>
    %cst_246 = arith.constant 5.000000e-01 : f32
    %852 = vector.broadcast %cst_246 : f32 to vector<2x32xf32>
    %853 = arith.mulf %852, %851 : vector<2x32xf32>
    %cst_247 = arith.constant 0.707106769 : f32
    %854 = vector.broadcast %cst_247 : f32 to vector<2x32xf32>
    %855 = arith.mulf %851, %854 : vector<2x32xf32>
    %856 = math.erf %855 : vector<2x32xf32>
    %cst_248 = arith.constant 1.000000e+00 : f32
    %857 = vector.broadcast %cst_248 : f32 to vector<2x32xf32>
    %858 = arith.addf %857, %856 : vector<2x32xf32>
    %859 = arith.mulf %853, %858 : vector<2x32xf32>
    %860 = arith.addf %859, %848 : vector<2x32xf32>
    %cst_249 = arith.constant dense<0.000000e+00> : vector<2x128xf32>
    %861 = tpu.matmul %860, %767, %cst_249 {dimension_numbers = #tpu.dot_dimension_numbers<[1], [0], [0], [1], [0, 0, 1, 1], [], []>} : vector<2x32xf32>, vector<32x128xf32>, vector<2x128xf32> -> vector<2x128xf32>
    %862 = vector.broadcast %761 : vector<1x128xf32> to vector<2x128xf32>
    %863 = arith.addf %861, %862 : vector<2x128xf32>
    %cst_250 = arith.constant 0.000000e+00 : f32
    %864 = vector.broadcast %cst_250 : f32 to vector<2x128xf32>
    %865 = arith.subf %864, %863 : vector<2x128xf32>
    %866 = math.exp %865 : vector<2x128xf32>
    %cst_251 = arith.constant 1.000000e+00 : f32
    %867 = vector.broadcast %cst_251 : f32 to vector<2x128xf32>
    %868 = arith.addf %867, %866 : vector<2x128xf32>
    %869 = tpu.reciprocal %868 {approx = true} : vector<2x128xf32> -> vector<2x128xf32>
    %c0_252 = arith.constant 0 : index
    %c0_253 = arith.constant 0 : index
    %870 = vector.load %arg11[%c0_252, %c0_253] : memref<2x128xf32, #tpu.memory_space<vmem>>, vector<2x128xf32>
    tpu.vector_store %arg11[%c0_252, %c0_253], %869 {strides = array<i32>} : memref<2x128xf32, #tpu.memory_space<vmem>>, vector<2x128xf32>,
    return
  }
  func.func @transform_0(%arg0: i32) -> (i32, i32) {
    %c0_i32 = arith.constant 0 : i32
    %c0_i32_0 = arith.constant 0 : i32
    %c0_i32_1 = arith.constant 0 : i32
    return %c0_i32, %c0_i32_0 : i32, i32
  }
  func.func @transform_1(%arg0: i32) -> (i32, i32) {
    %c0_i32 = arith.constant 0 : i32
    %c0_i32_0 = arith.constant 0 : i32
    %c0_i32_1 = arith.constant 0 : i32
    return %c0_i32, %c0_i32_0 : i32, i32
  }
  func.func @transform_2(%arg0: i32) -> (i32, i32) {
    %c0_i32 = arith.constant 0 : i32
    %c0_i32_0 = arith.constant 0 : i32
    %c0_i32_1 = arith.constant 0 : i32
    return %c0_i32, %c0_i32_0 : i32, i32
  }
  func.func @transform_3(%arg0: i32) -> (i32, i32) {
    %c0_i32 = arith.constant 0 : i32
    %c0_i32_0 = arith.constant 0 : i32
    %c0_i32_1 = arith.constant 0 : i32
    return %c0_i32, %c0_i32_0 : i32, i32
  }
  func.func @transform_4(%arg0: i32) -> (i32, i32, i32) {
    %c0_i32 = arith.constant 0 : i32
    %c0_i32_0 = arith.constant 0 : i32
    %c0_i32_1 = arith.constant 0 : i32
    %c0_i32_2 = arith.constant 0 : i32
    return %c0_i32, %c0_i32_0, %c0_i32_1 : i32, i32, i32
  }
  func.func @transform_5(%arg0: i32) -> (i32, i32, i32) {
    %c0_i32 = arith.constant 0 : i32
    %c0_i32_0 = arith.constant 0 : i32
    %c0_i32_1 = arith.constant 0 : i32
    %c0_i32_2 = arith.constant 0 : i32
    return %c0_i32, %c0_i32_0, %c0_i32_1 : i32, i32, i32
  }
  func.func @transform_6(%arg0: i32) -> (i32, i32, i32) {
    %c0_i32 = arith.constant 0 : i32
    %c0_i32_0 = arith.constant 0 : i32
    %c0_i32_1 = arith.constant 0 : i32
    %c0_i32_2 = arith.constant 0 : i32
    return %c0_i32, %c0_i32_0, %c0_i32_1 : i32, i32, i32
  }
  func.func @transform_7(%arg0: i32) -> (i32, i32, i32) {
    %c0_i32 = arith.constant 0 : i32
    %c0_i32_0 = arith.constant 0 : i32
    %c0_i32_1 = arith.constant 0 : i32
    %c0_i32_2 = arith.constant 0 : i32
    return %c0_i32, %c0_i32_0, %c0_i32_1 : i32, i32, i32
  }
  func.func @transform_8(%arg0: i32) -> (i32, i32) {
    %c0_i32 = arith.constant 0 : i32
    %c0_i32_0 = arith.constant 0 : i32
    %c0_i32_1 = arith.constant 0 : i32
    return %c0_i32, %c0_i32_0 : i32, i32
  }
  func.func @transform_9(%arg0: i32) -> (i32, i32) {
    %c0_i32 = arith.constant 0 : i32
    %c0_i32_0 = arith.constant 0 : i32
    %c0_i32_1 = arith.constant 0 : i32
    return %c0_i32, %c0_i32_0 : i32, i32
  }
  func.func @transform_10(%arg0: i32) -> (i32, i32) {
    %c0_i32 = arith.constant 0 : i32
    %c0_i32_0 = arith.constant 0 : i32
    %c0_i32_1 = arith.constant 0 : i32
    return %c0_i32, %c0_i32_0 : i32, i32
  }
}

</mosaic_0001>

<bundles_post_ra>
// kernel: tpu_custom_call.1
= control target key start
LH: loop header
LB: loop body
LE: loop exit
PB: predicated region body
PF: predicated region fallthrough
CT: control target
= control target key end

     0   :  { %15 = vsyncpa [#allocation3], 0  ;;  %s11309_s0 = inlined_call_operand.hbm [shape: f32[24,32], index: 0, kind: input, shape index: {}]   ;;  %s11310_s1 = inlined_call_operand.hbm [shape: f32[16,32], index: 1, kind: input, shape index: {}]   ;;  %s11311_s2 = inlined_call_operand.hbm [shape: f32[24,24], index: 2, kind: input, shape index: {}]   ;;  %s11312_s3 = inlined_call_operand.vmem [shape: f32[16,1], index: 3, kind: input, shape index: {}]   ;;  %s11313_s4 = inlined_call_operand.vmem [shape: f32[2,32,192], index: 4, kind: input, shape index: {}]   ;;  %s11314_s5 = inlined_call_operand.vmem [shape: f32[2,64,32], index: 5, kind: input, shape index: {}]   ;;  %s11315_s6 = inlined_call_operand.vmem [shape: f32[2,32,128], index: 6, kind: input, shape index: {}]   ;;  %s11316_s7 = inlined_call_operand.vmem [shape: f32[2,10,128], index: 7, kind: input, shape index: {}]   ;;  %s11317_s8 = inlined_call_operand.vmem [shape: f32[32,256], index: 8, kind: input, shape index: {}]   ;;  %s11318_s9 = inlined_call_operand.vmem [shape: f32[9,128], index: 9, kind: input, shape index: {}]   ;;  %s11319_s10 = inlined_call_operand.hbm [shape: f32[2,128], index: 10, kind: output, shape index: {}]  }
   0x1   :  { %16 = vsyncpa [#allocation6], 0 }
   0x2   :  { %17 = vsyncpa [#allocation4], 0  ;;  %s9518_s13 = smov [#allocation5]   ;;  %s9519_s15 = smov [#allocation2]  }
   0x3   :  { %s35_s14 = sshll.u32 %s9518_s13, 4  ;;  %s23_s16 = sshll.u32 %s9519_s15, 4  ;;  %s36_s14 = int_to_ptr.vmem [resolvable:$true] %s35_s14  ;;  %s24_s16 = int_to_ptr.vmem [resolvable:$true] %s23_s16 }
   0x4   :  { %s9440_s17 = scalar_lea.vmem %s36_s14, 256  ;;  %p9445_p1 = scmp.lt.s32.totalorder %s36_s14, %s36_s14 }
   0x5   :  { %p9441_p0 = scmp.ne.s32.totalorder %s36_s14, %s9440_s17  ;;  %p9446_p2 = scmp.lt.s32.totalorder %s9440_s17, %s9440_s17 }
   0x7   :  { %p9447_p3 = por %p9446_p2, %p9445_p1 }
   0x9   :  { %p9448_p4 = pnand %p9447_p3, %p9441_p0 }
   0xb   :  { %9451 = shalt.err (!%p9448_p4)
}
   0xc   :  { %s9520_s18 = smov 128   ;;  %s9521_s19 = smov 8  }
   0xd   :  { %41 = dma.hbm_to_vmem [thread:$0]  %s11310_s1, 256, %s36_s14, [#allocation6], %s9520_s18, %s9520_s18, %s9521_s19  }
   0xe   :  { %s9460_s22 = scalar_lea.vmem %s24_s16, 384  ;;  %p9465_p6 = scmp.lt.s32.totalorder %s24_s16, %s24_s16 }
   0xf   :  { %p9461_p5 = scmp.ne.s32.totalorder %s24_s16, %s9460_s22  ;;  %p9466_p7 = scmp.lt.s32.totalorder %s9460_s22, %s9460_s22 }
  0x11   :  { %p9467_p8 = por %p9466_p7, %p9465_p6 }
  0x13   :  { %p9468_p9 = pnand %p9467_p8, %p9461_p5 }
  0x15   :  { %9471 = shalt.err (!%p9468_p9)
}
  0x16   :  { %29 = dma.hbm_to_vmem [thread:$0]  %s11309_s0, 384, %s24_s16, [#allocation3], %s9520_s18, %s9520_s18, %s9521_s19  }
  0x17   :  { %s9522_s25 = smov [#allocation7]  }
  0x18   :  { %s47_s26 = sshll.u32 %s9522_s25, 4  ;;  %s48_s26 = int_to_ptr.vmem [resolvable:$true] %s47_s26 }
  0x19   :  { %s9480_s27 = scalar_lea.vmem %s48_s26, 384  ;;  %p9485_p11 = scmp.lt.s32.totalorder %s48_s26, %s48_s26 }
  0x1a   :  { %p9481_p10 = scmp.ne.s32.totalorder %s48_s26, %s9480_s27  ;;  %p9486_p12 = scmp.lt.s32.totalorder %s9480_s27, %s9480_s27 }
  0x1c   :  { %p9487_p13 = por %p9486_p12, %p9485_p11 }
  0x1e   :  { %p9488_p0 = pnand %p9487_p13, %p9481_p10 }
  0x20   :  { %9491 = shalt.err (!%p9488_p0)
}
  0x21   :  { %53 = dma.hbm_to_vmem [thread:$0]  %s11311_s2, 384, %s48_s26, [#allocation6], %s9520_s18, %s9520_s18, %s9521_s19  }
  0x22   :  { %9512 = dma.done.wait [#allocation3], 384  }
  0x23   :  { %9513 = vsyncadd [#allocation3], 4294966912 }
  0x24   :  { %9514 = dma.done.wait [#allocation6], 640  }
  0x25   :  { %9515 = vsyncadd [#allocation6], 4294966656  ;;  %vm109_vm0 = vcmask 261120   ;;  %v77_v0 = vld [vmem:[#allocation2] sm:$0xff]  ;;  %v79_v1 = vld [vmem:[#allocation2 + $0x10] sm:$0xff]  ;;  %v9523_v22 = vmov 0.0   ;;  %v150_v33 = vlaneseq }
  0x26   :  { %v78_v2 = vld [vmem:[#allocation2 + $0x8] sm:$0xff]  ;;  %v110_v3 = vsel %vm109_vm0, %v77_v0, 0.0  ;;  %v116_v4 = vsel %vm109_vm0, %v79_v1, 0.0  ;;  %v9617_v21 = vld [vmem:[%s11313_s4 + $0x30] sm:$0xff]  ;;  %8489 = vmatprep.subr.mxu0 %v9523_v22  ;;  %v9623_v23 = vld [vmem:[%s11313_s4 + $0x20] sm:$0xff]  ;;  %vm9524_vm1 = vmmov 0   ;;  %8506 = vmatprep.subr.mxu1 %v9523_v22 }
  0x27   :  { %111 = vadd.xlane.f32.xlu0 %v110_v3  ;;  %117 = vadd.xlane.f32.xlu1 %v116_v4  ;;  %v113_v5 = vsel %vm109_vm0, %v78_v2, 0.0  ;;  %v9633_v24 = vld [vmem:[%s11313_s4 + $0x10] sm:$0xff]  ;;  %v9642_v25 = vld [vmem:[%s11313_s4] sm:$0xff]  ;;  %v9648_v36 = vshrl.u32 %v150_v33, 7  ;;  %s9525_s17 = smov 96   ;;  %s9526_s18 = smov 88  }
  0x28   :  { %8497 = vmatprep.mubr.msk.f32.mxu0 %vm9524_vm1, %v9523_v22  ;;  %8490 = vmatpush3.msra.mxu0 %v9617_v21  ;;  %v107_v38 = vld [vmem:[%s11316_s7] sm:$0xff]  ;;  %s9527_s20 = smov 120   ;;  %vm266_vm2 = vcmask 64512   ;;  %vm359_vm3 = vcmask 195584   ;;  %s9528_s21 = smov 64   ;;  %vm2211_vm6 = vcmask 392512  }
  0x29   :  { %8491 = vmatprep.subr.mxu0 %v9523_v22  ;;  %8512 = vmatprep.mubr.msk.f32.mxu1 %vm9524_vm1, %v9523_v22  ;;  %v9651_v37 = vsub.s32 0, %v9648_v36  ;;  %v9657_v39 = vsub.s32 1, %v9648_v36  ;;  %v9671_v54 = vsub.s32 2, %v9648_v36  ;;  %s9529_s22 = smov 56   ;;  %s9530_s23 = smov 32   ;;  %vm2626_vm7 = vcmask 458112  }
  0x2a   :  { %8492 = vmatpush3.msra.mxu0 %v9623_v23  ;;  %s9531_s24 = smov 80   ;;  %s9532_s25 = smov 112   ;;  %vm3041_vm8 = vcmask 523712   ;;  %vm1804_vm9 = vcmask 326912   ;;  %vm3543_vm10 = vcmask 523264   ;;  %vm3371_vm11 = vcmask 130048  }
  0x2b   :  { %114 = vadd.xlane.f32.xlu0 %v113_v5  ;;  %8493 = vmatprep.subr.mxu0 %v9523_v22  ;;  %v153_v40 = vrot.slane %v107_v38, %v9651_v37  ;;  %v160_v43 = vrot.slane %v107_v38, %v9657_v39  ;;  %v167_v57 = vrot.slane %v107_v38, %v9671_v54  ;;  %s9533_s26 = smov 48   ;;  %s9534_s27 = smov 72   ;;  %vm7682_vm14 = vcmask 257024  }
  0x2c   :  { %8494 = vmatpush3.msra.mxu0 %v9633_v24  ;;  %s9535_s1 = smov 104   ;;  %s9536_s28 = smov 40   ;;  %vm7702_vm15 = vcmask 1043456  }
  0x2d   :  { %8495 = vmatprep.subr.mxu0 %v9523_v22  ;;  %s9538_s29 = smov 24   ;;  %s9539_s30 = smov 16  }
  0x2e   :  { %8496 = vmatpush3.msra.mxu0 %v9642_v25 }
  0x2f   :  { %8521 = vmatprep.subr.mxu0 %v9523_v22 }
  0xb0   :  { %v112_v6 = vpop.xlane.xlu0 %111  ;;  %v118_v7 = vpop.xlane.xlu1 %117 }
  0xb1   :  { %v120_v8 = vmul.f32 0.03125, %v112_v6  ;;  %v122_v9 = vmul.f32 0.03125, %v118_v7 }
  0xb3   :  { %v123_v10 = vsub.f32 %v77_v0, %v120_v8  ;;  %v125_v11 = vsub.f32 %v79_v1, %v122_v9 }
  0xb4   :  { %v115_v12 = vpop.xlane.xlu0 %114 }
  0xb5   :  { %v121_v13 = vmul.f32 0.03125, %v115_v12  ;;  %v126_v14 = vmul.f32 %v123_v10, %v123_v10  ;;  %v128_v15 = vmul.f32 %v125_v11, %v125_v11 }
  0xb7   :  { %v124_v16 = vsub.f32 %v78_v2, %v121_v13  ;;  %v129_v17 = vsel %vm109_vm0, %v126_v14, 0.0  ;;  %v135_v18 = vsel %vm109_vm0, %v128_v15, 0.0  ;;  %v9734_v14 = vld [vmem:[#allocation7 + $0x8] sm:$0xff] }
  0xb8   :  { %130 = vadd.xlane.f32.xlu1 %v129_v17 }
  0xb9   :  { %v127_v19 = vmul.f32 %v124_v16, %v124_v16 }
  0xbb   :  { %v132_v20 = vsel %vm109_vm0, %v127_v19, 0.0  ;;  %v9738_v19 = vld [vmem:[#allocation7 + $0x10] sm:$0xff] }
  0xbc   :  { %136 = vadd.xlane.f32.xlu1 %v135_v18  ;;  %133 = vadd.xlane.f32.xlu0 %v132_v20 }
 0x141   :  { %v131_v26 = vpop.xlane.xlu1 %130 }
 0x142   :  { %v138_v27 = vmul.f32 0.03125, %v131_v26 }
 0x144   :  { %v141_v28 = vadd.f32 1e-05, %v138_v27 }
 0x145   :  { %v137_v29 = vpop.xlane.xlu1 %136  ;;  %v134_v30 = vpop.xlane.xlu0 %133 }
 0x146   :  { %9225 = vrsqrt.f32 %v141_v28  ;;  %v140_v31 = vmul.f32 0.03125, %v137_v29  ;;  %v139_v32 = vmul.f32 0.03125, %v134_v30 }
 0x148   :  { %v143_v34 = vadd.f32 1e-05, %v140_v31  ;;  %v142_v35 = vadd.f32 1e-05, %v139_v32 }
 0x14a   :  { %9227 = vrsqrt.f32 %v143_v34 }
 0x14b   :  { %9229 = vrsqrt.f32 %v142_v35 }
 0x153   :  { %v9226_v41 = vpop.eup %9225 }
 0x154   :  { %v147_v42 = vmul.f32 %v9226_v41, %v123_v10  ;;  %v9731_v10 = vld [vmem:[#allocation7] sm:$0xff] }
 0x156   :  { %v154_v44 = vmul.f32 %v153_v40, %v147_v42 }
 0x157   :  { %v9228_v45 = vpop.eup %9227 }
 0x158   :  { %v9230_v46 = vpop.eup %9229  ;;  %v161_v47 = vadd.f32 %v160_v43, %v154_v44  ;;  %v149_v49 = vmul.f32 %v9228_v45, %v125_v11 }
 0x159   :  { %v148_v48 = vmul.f32 %v9230_v46, %v124_v16 }
 0x15a   :  { %8498 = vmatmul.mubr.msk.f32.vlgmr.msra.gmra.mxu0 %vm109_vm0, %v161_v47  ;;  %v156_v52 = vmul.f32 %v153_v40, %v149_v49 }
 0x15b   :  { %8500 = vmatprep.mubr.msk.f32.mxu0 %vm9524_vm1, %v9523_v22  ;;  %v155_v50 = vmul.f32 %v153_v40, %v148_v48 }
 0x15c   :  { %v163_v53 = vadd.f32 %v160_v43, %v156_v52 }
 0x15d   :  { %v162_v51 = vadd.f32 %v160_v43, %v155_v50 }
 0x15f   :  { %8501 = vmatmul.mubr.msk.f32.gmra.mxu0 %vm109_vm0, %v162_v51 }
 0x160   :  { %8503 = vmatprep.mubr.msk.f32.mxu0 %vm9524_vm1, %v9523_v22 }
 0x163   :  { %8504 = vmatmul.mubr.msk.f32.gmra.mxu0 %vm109_vm0, %v163_v53 }
 0x164   :  { %8527 = vmatprep.mubr.msk.f32.mxu0 %vm9524_vm1, %v9523_v22 }
 0x21a   :  { %v243_v55 = vpop.f32.mrf.mxu0 }
 0x21b   :  { %v9678_v62 = vadd.f32 %v243_v55, %v167_v57 }
 0x21c   :  { %v8499_v56 = vpop.f32.mrf.mxu0 }
 0x21f   :  { %v248_v58 = vpop.f32.mrf.mxu0 }
 0x220   :  { %v9674_v59 = vadd.f32 %v248_v58, %v167_v57 }
 0x221   :  { %v8502_v60 = vpop.f32.mrf.mxu0 }
 0x222   :  { %262 = vrot.lane.b32.xlu1 %v9674_v59, %s9525_s17 }
 0x223   :  { %v253_v61 = vpop.f32.mrf.mxu0 }
 0x224   :  { %v9680_v63 = vadd.f32 %v253_v61, %v167_v57 }
 0x225   :  { %v8505_v0 = vpop.f32.mrf.mxu0 }
 0x226   :  { %260 = vrot.lane.b32.xlu1 %v9678_v62, %s9525_s17  ;;  %264 = vrot.lane.b32.xlu0 %v9680_v63, %s9525_s17 }
 0x22a   :  { %501 = vrot.lane.b32.xlu1 %v9680_v63, %s9526_s18  ;;  %499 = vrot.lane.b32.xlu0 %v9674_v59, %s9526_s18 }
 0x22e   :  { %497 = vrot.lane.b32.xlu1 %v9678_v62, %s9526_s18  ;;  %491 = vrot.lane.b32.xlu0 %v9678_v62, %s9527_s20 }
 0x232   :  { %493 = vrot.lane.b32.xlu1 %v9674_v59, %s9527_s20  ;;  %495 = vrot.lane.b32.xlu0 %v9680_v63, %s9527_s20 }
 0x294   :  { %v263_v1 = vpop.permute.xlu1 %262 }
 0x298   :  { %v265_v2 = vpop.permute.xlu0 %264  ;;  %v261_v3 = vpop.permute.xlu1 %260 }
 0x299   :  { %8507 = vmatpush3.xpose.msk.msra.mxu1 %vm266_vm2, %v265_v2 }
 0x29a   :  { %8508 = vmatprep.subr.mxu1 %v9523_v22 }
 0x29c   :  { %v502_v4 = vpop.permute.xlu1 %501  ;;  %v500_v5 = vpop.permute.xlu0 %499 }
 0x29d   :  { %8509 = vmatpush3.xpose.msk.msra.mxu1 %vm266_vm2, %v263_v1 }
 0x29e   :  { %8510 = vmatprep.subr.mxu1 %v9523_v22 }
 0x2a0   :  { %v498_v6 = vpop.permute.xlu1 %497  ;;  %v492_v7 = vpop.permute.xlu0 %491 }
 0x2a1   :  { %8511 = vmatpush3.xpose.msk.msra.mxu1 %vm266_vm2, %v261_v3 }
 0x2a2   :  { %8536 = vmatprep.subr.mxu1 %v9523_v22 }
 0x2a4   :  { %8513 = vmatmul.mubr.msk.f32.vlgmr.msra.gmra.mxu1 %vm266_vm2, %v9678_v62  ;;  %v494_v8 = vpop.permute.xlu1 %493  ;;  %v496_v9 = vpop.permute.xlu0 %495 }
 0x2a5   :  { %8537 = vmatpush3.xpose.msk.msra.mxu1 %vm266_vm2, %v502_v4  ;;  %8515 = vmatprep.mubr.msk.f32.mxu1 %vm9524_vm1, %v9523_v22 }
 0x2a6   :  { %8538 = vmatprep.subr.mxu1 %v9523_v22 }
 0x2a8   :  { %8516 = vmatmul.mubr.msk.f32.gmra.mxu1 %vm266_vm2, %v9674_v59 }
 0x2a9   :  { %8539 = vmatpush3.xpose.msk.msra.mxu1 %vm266_vm2, %v500_v5  ;;  %8518 = vmatprep.mubr.msk.f32.mxu1 %vm9524_vm1, %v9523_v22 }
 0x2aa   :  { %8540 = vmatprep.subr.mxu1 %v9523_v22 }
 0x2ac   :  { %8519 = vmatmul.mubr.msk.f32.gmra.mxu1 %vm266_vm2, %v9680_v63 }
 0x2ad   :  { %8541 = vmatpush3.xpose.msk.msra.mxu1 %vm266_vm2, %v498_v6  ;;  %8542 = vmatprep.mubr.msk.f32.mxu1 %vm9524_vm1, %v9523_v22 }
 0x2ae   :  { %8566 = vmatprep.subr.mxu1 %v9523_v22 }
 0x2b0   :  { %8543 = vmatmul.mubr.msk.f32.vlgmr.msra.gmra.mxu1 %vm266_vm2, %v492_v7 }
 0x2b1   :  { %8545 = vmatprep.mubr.msk.f32.mxu1 %vm9524_vm1, %v9523_v22 }
 0x2b4   :  { %8546 = vmatmul.mubr.msk.f32.gmra.mxu1 %vm266_vm2, %v494_v8 }
 0x2b5   :  { %8548 = vmatprep.mubr.msk.f32.mxu1 %vm9524_vm1, %v9523_v22 }
 0x2b8   :  { %8549 = vmatmul.mubr.msk.f32.gmra.mxu1 %vm266_vm2, %v496_v9 }
 0x2b9   :  { %8568 = vmatprep.mubr.msk.f32.mxu1 %vm9524_vm1, %v9523_v22 }
 0x364   :  { %v345_v11 = vpop.f32.mrf.mxu1 }
 0x365   :  { %v346_v12 = vadd.f32 %v345_v11, %v9731_v10 }
 0x366   :  { %v8514_v13 = vpop.f32.mrf.mxu1 }
 0x367   :  { %v360_v15 = vsel %vm359_vm3, %v346_v12, -inf }
 0x368   :  { %361 = vmax.xlane.f32.xlu1 %v360_v15  ;;  %v350_v16 = vpop.f32.mrf.mxu1 }
 0x369   :  { %v351_v17 = vadd.f32 %v350_v16, %v9734_v14 }
 0x36a   :  { %v8517_v18 = vpop.f32.mrf.mxu1 }
 0x36b   :  { %v363_v20 = vsel %vm359_vm3, %v351_v17, -inf }
 0x36c   :  { %364 = vmax.xlane.f32.xlu0 %v363_v20  ;;  %v355_v26 = vpop.f32.mrf.mxu1 }
 0x36d   :  { %v356_v27 = vadd.f32 %v355_v26, %v9738_v19 }
 0x36e   :  { %v8520_v28 = vpop.f32.mrf.mxu1 }
 0x36f   :  { %v366_v29 = vsel %vm359_vm3, %v356_v27, -inf }
 0x370   :  { %367 = vmax.xlane.f32.xlu0 %v366_v29  ;;  %v581_v30 = vpop.f32.mrf.mxu1 }
 0x371   :  { %v582_v31 = vadd.f32 %v581_v30, %v9731_v10 }
 0x372   :  { %v8544_v32 = vpop.f32.mrf.mxu1 }
 0x373   :  { %v595_v33 = vsel %vm359_vm3, %v582_v31, -inf }
 0x374   :  { %596 = vmax.xlane.f32.xlu0 %v595_v33  ;;  %v586_v34 = vpop.f32.mrf.mxu1 }
 0x375   :  { %v587_v35 = vadd.f32 %v586_v34, %v9734_v14 }
 0x376   :  { %v8547_v38 = vpop.f32.mrf.mxu1 }
 0x377   :  { %v598_v40 = vsel %vm359_vm3, %v587_v35, -inf }
 0x378   :  { %599 = vmax.xlane.f32.xlu1 %v598_v40  ;;  %v591_v41 = vpop.f32.mrf.mxu1 }
 0x379   :  { %v592_v42 = vadd.f32 %v591_v41, %v9738_v19 }
 0x37a   :  { %v8550_v43 = vpop.f32.mrf.mxu1 }
 0x37b   :  { %v601_v44 = vsel %vm359_vm3, %v592_v42, -inf }
 0x37c   :  { %602 = vmax.xlane.f32.xlu0 %v601_v44 }
 0x389   :  { %397 = vrot.lane.b32.xlu1 %v9680_v63, %s9528_s21 }
 0x38d   :  { %393 = vrot.lane.b32.xlu1 %v9678_v62, %s9528_s21 }
 0x391   :  { %632 = vrot.lane.b32.xlu1 %v9680_v63, %s9529_s22 }
 0x392   :  { %395 = vrot.lane.b32.xlu0 %v9674_v59, %s9528_s21 }
 0x3f1   :  { %v362_v45 = vpop.xlane.xlu1 %361 }
 0x3f2   :  { %v369_v46 = vsub.f32 %v346_v12, %v362_v45 }
 0x3f4   :  { %v372_v47 = vmul.f32 1.442695, %v369_v46 }
 0x3f5   :  { %v365_v48 = vpop.xlane.xlu0 %364 }
 0x3f6   :  { %9231 = vpow2.f32 %v372_v47  ;;  %v370_v49 = vsub.f32 %v351_v17, %v365_v48 }
 0x3f8   :  { %v374_v50 = vmul.f32 1.442695, %v370_v49 }
 0x3f9   :  { %v368_v51 = vpop.xlane.xlu0 %367 }
 0x3fa   :  { %9233 = vpow2.f32 %v374_v50  ;;  %v371_v52 = vsub.f32 %v356_v27, %v368_v51 }
 0x3fc   :  { %v376_v53 = vmul.f32 1.442695, %v371_v52 }
 0x3fd   :  { %v597_v55 = vpop.xlane.xlu0 %596 }
 0x3fe   :  { %9235 = vpow2.f32 %v376_v53  ;;  %v604_v56 = vsub.f32 %v582_v31, %v597_v55 }
 0x400   :  { %v607_v57 = vmul.f32 1.442695, %v604_v56 }
 0x401   :  { %v600_v58 = vpop.xlane.xlu1 %599 }
 0x402   :  { %9237 = vpow2.f32 %v607_v57  ;;  %v605_v60 = vsub.f32 %v587_v35, %v600_v58 }
 0x403   :  { %v9232_v61 = vpop.eup %9231 }
 0x404   :  { %v609_v0 = vmul.f32 1.442695, %v605_v60  ;;  %v378_v1 = vsel %vm359_vm3, %v9232_v61, 0.0 }
 0x405   :  { %379 = vadd.xlane.f32.xlu1 %v378_v1  ;;  %v398_v2 = vpop.permute.xlu1 %397  ;;  %v603_v3 = vpop.xlane.xlu0 %602 }
 0x406   :  { %9239 = vpow2.f32 %v609_v0  ;;  %v606_v4 = vsub.f32 %v592_v42, %v603_v3  ;;  %8522 = vmatpush3.msra.mxu0 %v398_v2 }
 0x407   :  { %v9234_v5 = vpop.eup %9233  ;;  %8523 = vmatprep.subr.mxu0 %v9523_v22 }
 0x408   :  { %v611_v6 = vmul.f32 1.442695, %v606_v4  ;;  %v381_v7 = vsel %vm359_vm3, %v9234_v5, 0.0 }
 0x409   :  { %382 = vadd.xlane.f32.xlu0 %v381_v7  ;;  %v396_v8 = vpop.permute.xlu0 %395  ;;  %v394_v11 = vpop.permute.xlu1 %393 }
 0x40a   :  { %9241 = vpow2.f32 %v611_v6  ;;  %8524 = vmatpush3.msra.mxu0 %v396_v8 }
 0x40b   :  { %v9236_v9 = vpop.eup %9235  ;;  %8525 = vmatprep.subr.mxu0 %v9523_v22 }
 0x40c   :  { %8526 = vmatpush3.msra.mxu0 %v394_v11  ;;  %v384_v12 = vsel %vm359_vm3, %v9236_v9, 0.0 }
 0x40d   :  { %385 = vadd.xlane.f32.xlu1 %v384_v12  ;;  %8551 = vmatprep.subr.mxu0 %v9523_v22 }
 0x40f   :  { %v9238_v13 = vpop.eup %9237 }
 0x410   :  { %v613_v15 = vsel %vm359_vm3, %v9238_v13, 0.0 }
 0x411   :  { %614 = vadd.xlane.f32.xlu0 %v613_v15 }
 0x413   :  { %v9240_v16 = vpop.eup %9239 }
 0x414   :  { %v616_v17 = vsel %vm359_vm3, %v9240_v16, 0.0 }
 0x415   :  { %617 = vadd.xlane.f32.xlu1 %v616_v17 }
 0x417   :  { %v9242_v18 = vpop.eup %9241 }
 0x418   :  { %v619_v20 = vsel %vm359_vm3, %v9242_v18, 0.0 }
 0x419   :  { %620 = vadd.xlane.f32.xlu0 %v619_v20 }
 0x426   :  { %630 = vrot.lane.b32.xlu1 %v9674_v59, %s9529_s22 }
 0x42a   :  { %727 = vrot.lane.b32.xlu1 %v9633_v24, %s9530_s23  ;;  %v633_v24 = vpop.permute.xlu1 %632 }
 0x42e   :  { %920 = vrot.lane.b32.xlu1 %v9674_v59, %s9531_s24 }
 0x42f   :  { %628 = vrot.lane.b32.xlu0 %v9678_v62, %s9529_s22 }
 0x432   :  { %912 = vrot.lane.b32.xlu1 %v9678_v62, %s9532_s25 }
 0x433   :  { %922 = vrot.lane.b32.xlu0 %v9680_v63, %s9531_s24 }
 0x436   :  { %916 = vrot.lane.b32.xlu1 %v9680_v63, %s9532_s25 }
 0x437   :  { %918 = vrot.lane.b32.xlu0 %v9678_v62, %s9531_s24 }
 0x43b   :  { %914 = vrot.lane.b32.xlu0 %v9674_v59, %s9532_s25 }
 0x48e   :  { %v380_v26 = vpop.xlane.xlu1 %379 }
 0x48f   :  { %9243 = vrcp.f32 %v380_v26 }
 0x492   :  { %v383_v27 = vpop.xlane.xlu0 %382 }
 0x493   :  { %9245 = vrcp.f32 %v383_v27 }
 0x496   :  { %v386_v28 = vpop.xlane.xlu1 %385 }
 0x497   :  { %9247 = vrcp.f32 %v386_v28 }
 0x49a   :  { %v615_v29 = vpop.xlane.xlu0 %614 }
 0x49b   :  { %9249 = vrcp.f32 %v615_v29 }
 0x49c   :  { %v9244_v30 = vpop.eup %9243 }
 0x49d   :  { %v390_v31 = vmul.f32 %v9244_v30, %v9232_v61 }
 0x49e   :  { %v618_v32 = vpop.xlane.xlu1 %617 }
 0x49f   :  { %9251 = vrcp.f32 %v618_v32  ;;  %8528 = vmatmul.mubr.msk.f32.vlgmr.msra.gmra.mxu0 %vm359_vm3, %v390_v31 }
 0x4a0   :  { %v9246_v33 = vpop.eup %9245  ;;  %8552 = vmatpush3.msra.mxu0 %v633_v24  ;;  %8530 = vmatprep.mubr.msk.f32.mxu0 %vm9524_vm1, %v9523_v22 }
 0x4a1   :  { %8553 = vmatprep.subr.mxu0 %v9523_v22  ;;  %v391_v34 = vmul.f32 %v9246_v33, %v9234_v5 }
 0x4a2   :  { %v631_v35 = vpop.permute.xlu1 %630  ;;  %v621_v38 = vpop.xlane.xlu0 %620 }
 0x4a3   :  { %9253 = vrcp.f32 %v621_v38  ;;  %8531 = vmatmul.mubr.msk.f32.gmra.mxu0 %vm359_vm3, %v391_v34 }
 0x4a4   :  { %v9248_v40 = vpop.eup %9247  ;;  %8554 = vmatpush3.msra.mxu0 %v631_v35  ;;  %8533 = vmatprep.mubr.msk.f32.mxu0 %vm9524_vm1, %v9523_v22 }
 0x4a5   :  { %8555 = vmatprep.subr.mxu0 %v9523_v22  ;;  %v392_v41 = vmul.f32 %v9248_v40, %v9236_v9 }
 0x4a6   :  { %v728_v42 = vpop.permute.xlu1 %727  ;;  %v629_v43 = vpop.permute.xlu0 %628 }
 0x4a7   :  { %8534 = vmatmul.mubr.msk.f32.gmra.mxu0 %vm359_vm3, %v392_v41  ;;  %8567 = vmatpush3.msra.mxu1 %v728_v42 }
 0x4a8   :  { %v9250_v44 = vpop.eup %9249  ;;  %8556 = vmatpush3.msra.mxu0 %v629_v43  ;;  %8557 = vmatprep.mubr.msk.f32.mxu0 %vm9524_vm1, %v9523_v22 }
 0x4a9   :  { %v625_v45 = vmul.f32 %v9250_v44, %v9238_v13  ;;  %8588 = vmatprep.subr.mxu1 %v9523_v22  ;;  %8577 = vmatprep.subr.mxu0 %v9523_v22 }
 0x4aa   :  { %v923_v58 = vpop.permute.xlu0 %922  ;;  %v921_v0 = vpop.permute.xlu1 %920 }
 0x4ab   :  { %8558 = vmatmul.mubr.msk.f32.vlgmr.msra.gmra.mxu0 %vm359_vm3, %v625_v45 }
 0x4ac   :  { %v9252_v46 = vpop.eup %9251  ;;  %8560 = vmatprep.mubr.msk.f32.mxu0 %vm9524_vm1, %v9523_v22 }
 0x4ad   :  { %v626_v47 = vmul.f32 %v9252_v46, %v9240_v16 }
 0x4ae   :  { %v919_v3 = vpop.permute.xlu0 %918  ;;  %v913_v5 = vpop.permute.xlu1 %912 }
 0x4af   :  { %8561 = vmatmul.mubr.msk.f32.gmra.mxu0 %vm359_vm3, %v626_v47 }
 0x4b0   :  { %v9254_v48 = vpop.eup %9253  ;;  %8563 = vmatprep.mubr.msk.f32.mxu0 %vm9524_vm1, %v9523_v22 }
 0x4b1   :  { %v627_v49 = vmul.f32 %v9254_v48, %v9242_v18 }
 0x4b2   :  { %v915_v6 = vpop.permute.xlu0 %914  ;;  %v917_v7 = vpop.permute.xlu1 %916 }
 0x4b3   :  { %8564 = vmatmul.mubr.msk.f32.gmra.mxu0 %vm359_vm3, %v627_v49 }
 0x4b4   :  { %8579 = vmatprep.mubr.msk.f32.mxu0 %vm9524_vm1, %v9523_v22 }
 0x55f   :  { %v9806_v50 = vpop.f32.mrf.mxu0 }
 0x561   :  { %v8529_v51 = vpop.f32.mrf.mxu0 }
 0x563   :  { %v9808_v52 = vpop.f32.mrf.mxu0 }
 0x565   :  { %v8532_v53 = vpop.f32.mrf.mxu0 }
 0x567   :  { %v9810_v55 = vpop.f32.mrf.mxu0 }
 0x569   :  { %v8535_v56 = vpop.f32.mrf.mxu0 }
 0x56b   :  { %v712_v57 = vpop.f32.mrf.mxu0 }
 0x56c   :  { %8569 = vmatmul.mubr.msk.f32.vlgmr.msra.gmra.mxu1 %vm266_vm2, %v712_v57 }
 0x56d   :  { %8589 = vmatpush3.xpose.msk.msra.mxu1 %vm266_vm2, %v923_v58  ;;  %v8559_v60 = vpop.f32.mrf.mxu0  ;;  %8571 = vmatprep.mubr.msk.f32.mxu1 %vm9524_vm1, %v9523_v22 }
 0x56e   :  { %8590 = vmatprep.subr.mxu1 %v9523_v22 }
 0x56f   :  { %v717_v61 = vpop.f32.mrf.mxu0 }
 0x570   :  { %8572 = vmatmul.mubr.msk.f32.gmra.mxu1 %vm266_vm2, %v717_v61 }
 0x571   :  { %8591 = vmatpush3.xpose.msk.msra.mxu1 %vm266_vm2, %v921_v0  ;;  %v8562_v1 = vpop.f32.mrf.mxu0  ;;  %8574 = vmatprep.mubr.msk.f32.mxu1 %vm9524_vm1, %v9523_v22 }
 0x572   :  { %8592 = vmatprep.subr.mxu1 %v9523_v22 }
 0x573   :  { %v722_v2 = vpop.f32.mrf.mxu0 }
 0x574   :  { %8575 = vmatmul.mubr.msk.f32.gmra.mxu1 %vm266_vm2, %v722_v2 }
 0x575   :  { %8593 = vmatpush3.xpose.msk.msra.mxu1 %vm266_vm2, %v919_v3  ;;  %v8565_v4 = vpop.f32.mrf.mxu0  ;;  %8594 = vmatprep.mubr.msk.f32.mxu1 %vm9524_vm1, %v9523_v22 }
 0x576   :  { %8618 = vmatprep.subr.mxu1 %v9523_v22 }
 0x578   :  { %8595 = vmatmul.mubr.msk.f32.vlgmr.msra.gmra.mxu1 %vm266_vm2, %v913_v5 }
 0x579   :  { %8597 = vmatprep.mubr.msk.f32.mxu1 %vm9524_vm1, %v9523_v22 }
 0x57c   :  { %8598 = vmatmul.mubr.msk.f32.gmra.mxu1 %vm266_vm2, %v915_v6 }
 0x57d   :  { %8600 = vmatprep.mubr.msk.f32.mxu1 %vm9524_vm1, %v9523_v22 }
 0x580   :  { %8601 = vmatmul.mubr.msk.f32.gmra.mxu1 %vm266_vm2, %v917_v7 }
 0x581   :  { %8620 = vmatprep.mubr.msk.f32.mxu1 %vm9524_vm1, %v9523_v22 }
 0x62c   :  { %v9836_v8 = vpop.f32.mrf.mxu1 }
 0x62e   :  { %v8570_v9 = vpop.f32.mrf.mxu1 }
 0x630   :  { %v9838_v11 = vpop.f32.mrf.mxu1 }
 0x632   :  { %v8573_v12 = vpop.f32.mrf.mxu1 }
 0x634   :  { %v9840_v13 = vpop.f32.mrf.mxu1 }
 0x636   :  { %v8576_v15 = vpop.f32.mrf.mxu1 }
 0x638   :  { %v1002_v16 = vpop.f32.mrf.mxu1 }
 0x639   :  { %v1003_v17 = vadd.f32 %v1002_v16, %v9731_v10 }
 0x63a   :  { %v8596_v18 = vpop.f32.mrf.mxu1 }
 0x63b   :  { %v1016_v20 = vsel %vm359_vm3, %v1003_v17, -inf }
 0x63c   :  { %1017 = vmax.xlane.f32.xlu0 %v1016_v20  ;;  %v1007_v24 = vpop.f32.mrf.mxu1 }
 0x63d   :  { %v1008_v26 = vadd.f32 %v1007_v24, %v9734_v14 }
 0x63e   :  { %v8599_v27 = vpop.f32.mrf.mxu1 }
 0x63f   :  { %v1019_v28 = vsel %vm359_vm3, %v1008_v26, -inf }
 0x640   :  { %1020 = vmax.xlane.f32.xlu1 %v1019_v28  ;;  %v1012_v29 = vpop.f32.mrf.mxu1 }
 0x641   :  { %v1013_v30 = vadd.f32 %v1012_v29, %v9738_v19 }
 0x642   :  { %v8602_v31 = vpop.f32.mrf.mxu1 }
 0x643   :  { %v1022_v32 = vsel %vm359_vm3, %v1013_v30, -inf }
 0x644   :  { %1023 = vmax.xlane.f32.xlu0 %v1022_v32 }
 0x651   :  { %1053 = vrot.lane.b32.xlu1 %v9680_v63, %s9533_s26 }
 0x655   :  { %1051 = vrot.lane.b32.xlu1 %v9674_v59, %s9533_s26 }
 0x659   :  { %1049 = vrot.lane.b32.xlu1 %v9678_v62, %s9533_s26 }
 0x65a   :  { %820 = vrot.lane.b32.xlu0 %v9642_v25, %s9530_s23 }
 0x65d   :  { %1251 = vrot.lane.b32.xlu1 %v9674_v59, %s9534_s27 }
 0x6c5   :  { %v1018_v33 = vpop.xlane.xlu0 %1017 }
 0x6c6   :  { %v1025_v34 = vsub.f32 %v1003_v17, %v1018_v33 }
 0x6c8   :  { %v1028_v35 = vmul.f32 1.442695, %v1025_v34 }
 0x6c9   :  { %v1021_v38 = vpop.xlane.xlu1 %1020 }
 0x6ca   :  { %9255 = vpow2.f32 %v1028_v35  ;;  %v1026_v40 = vsub.f32 %v1008_v26, %v1021_v38 }
 0x6cc   :  { %v1030_v41 = vmul.f32 1.442695, %v1026_v40 }
 0x6cd   :  { %v1054_v42 = vpop.permute.xlu1 %1053  ;;  %v1024_v43 = vpop.xlane.xlu0 %1023 }
 0x6ce   :  { %9257 = vpow2.f32 %v1030_v41  ;;  %v1027_v44 = vsub.f32 %v1013_v30, %v1024_v43 }
 0x6d0   :  { %v1032_v45 = vmul.f32 1.442695, %v1027_v44 }
 0x6d1   :  { %v1052_v46 = vpop.permute.xlu1 %1051  ;;  %v821_v47 = vpop.permute.xlu0 %820 }
 0x6d2   :  { %9259 = vpow2.f32 %v1032_v45  ;;  %8578 = vmatpush3.msra.mxu0 %v821_v47 }
 0x6d3   :  { %8580 = vmatmul.mubr.msk.f32.vlgmr.msra.gmra.mxu0 %vm266_vm2, %v9806_v50  ;;  %8603 = vmatprep.subr.mxu0 %v9523_v22 }
 0x6d4   :  { %8604 = vmatpush3.msra.mxu0 %v1054_v42  ;;  %8582 = vmatprep.mubr.msk.f32.mxu0 %vm9524_vm1, %v9523_v22 }
 0x6d5   :  { %8605 = vmatprep.subr.mxu0 %v9523_v22  ;;  %v1050_v48 = vpop.permute.xlu1 %1049 }
 0x6d6   :  { %8606 = vmatpush3.msra.mxu0 %v1052_v46 }
 0x6d7   :  { %v9256_v25 = vpop.eup %9255  ;;  %8583 = vmatmul.mubr.msk.f32.gmra.mxu0 %vm266_vm2, %v9808_v52  ;;  %8607 = vmatprep.subr.mxu0 %v9523_v22 }
 0x6d8   :  { %8608 = vmatpush3.msra.mxu0 %v1050_v48  ;;  %v1034_v49 = vsel %vm359_vm3, %v9256_v25, 0.0  ;;  %8585 = vmatprep.mubr.msk.f32.mxu0 %vm9524_vm1, %v9523_v22 }
 0x6d9   :  { %1035 = vadd.xlane.f32.xlu0 %v1034_v49  ;;  %8629 = vmatprep.subr.mxu0 %v9523_v22  ;;  %v1252_v56 = vpop.permute.xlu1 %1251 }
 0x6db   :  { %v9258_v50 = vpop.eup %9257  ;;  %8586 = vmatmul.mubr.msk.f32.gmra.mxu0 %vm266_vm2, %v9810_v55 }
 0x6dc   :  { %v1037_v51 = vsel %vm359_vm3, %v9258_v50, 0.0  ;;  %8609 = vmatprep.mubr.msk.f32.mxu0 %vm9524_vm1, %v9523_v22 }
 0x6dd   :  { %1038 = vadd.xlane.f32.xlu0 %v1037_v51 }
 0x6df   :  { %v9260_v52 = vpop.eup %9259 }
 0x6e0   :  { %v1040_v53 = vsel %vm359_vm3, %v9260_v52, 0.0 }
 0x6e1   :  { %1041 = vadd.xlane.f32.xlu1 %v1040_v53 }
 0x6f2   :  { %1243 = vrot.lane.b32.xlu1 %v9678_v62, %s9535_s1 }
 0x6f3   :  { %1253 = vrot.lane.b32.xlu0 %v9680_v63, %s9534_s27 }
 0x6f6   :  { %1247 = vrot.lane.b32.xlu1 %v9680_v63, %s9535_s1 }
 0x6f7   :  { %1249 = vrot.lane.b32.xlu0 %v9678_v62, %s9534_s27 }
 0x6fb   :  { %1245 = vrot.lane.b32.xlu0 %v9674_v59, %s9535_s1 }
 0x762   :  { %v1036_v55 = vpop.xlane.xlu0 %1035 }
 0x763   :  { %9261 = vrcp.f32 %v1036_v55 }
 0x766   :  { %v1039_v57 = vpop.xlane.xlu0 %1038 }
 0x767   :  { %9263 = vrcp.f32 %v1039_v57  ;;  %v85_v57 = vld [vmem:[%s11312_s3] sm:$0xff] }
 0x76a   :  { %v1042_v58 = vpop.xlane.xlu1 %1041  ;;  %v1254_v0 = vpop.permute.xlu0 %1253 }
 0x76b   :  { %9265 = vrcp.f32 %v1042_v58  ;;  %v9537_v58 = vmov 0  }
 0x76c   :  { %9224 = vset.pattern.permute.xlu0 %v9537_v58  ;;  %9223 = vset.pattern.permute.xlu1 %v9537_v58 }
 0x76e   :  { %v1250_v5 = vpop.permute.xlu0 %1249  ;;  %v1244_v6 = vpop.permute.xlu1 %1243 }
 0x770   :  { %v9262_v60 = vpop.eup %9261 }
 0x771   :  { %v1046_v61 = vmul.f32 %v9262_v60, %v9256_v25 }
 0x772   :  { %v1246_v7 = vpop.permute.xlu0 %1245  ;;  %v1248_v9 = vpop.permute.xlu1 %1247 }
 0x773   :  { %8610 = vmatmul.mubr.msk.f32.vlgmr.msra.gmra.mxu0 %vm359_vm3, %v1046_v61 }
 0x774   :  { %v9264_v1 = vpop.eup %9263  ;;  %8630 = vmatpush3.xpose.msk.msra.mxu0 %vm266_vm2, %v1254_v0  ;;  %8612 = vmatprep.mubr.msk.f32.mxu0 %vm9524_vm1, %v9523_v22 }
 0x775   :  { %8631 = vmatprep.subr.mxu0 %v9523_v22  ;;  %v1047_v2 = vmul.f32 %v9264_v1, %v9258_v50  ;;  %v106_v1 = vld [vmem:[%s11315_s6 + $0x18] sm:$0xff] }
 0x777   :  { %8613 = vmatmul.mubr.msk.f32.gmra.mxu0 %vm359_vm3, %v1047_v2 }
 0x778   :  { %v9266_v3 = vpop.eup %9265  ;;  %8632 = vmatpush3.xpose.msk.msra.mxu0 %vm266_vm2, %v1252_v56  ;;  %8615 = vmatprep.mubr.msk.f32.mxu0 %vm9524_vm1, %v9523_v22  ;;  %v86_v56 = vld [vmem:[%s11312_s3 + $0x8] sm:$0xff] }
 0x779   :  { %8633 = vmatprep.subr.mxu0 %v9523_v22  ;;  %v1048_v4 = vmul.f32 %v9266_v3, %v9260_v52 }
 0x77b   :  { %8616 = vmatmul.mubr.msk.f32.gmra.mxu0 %vm359_vm3, %v1048_v4 }
 0x77c   :  { %8634 = vmatpush3.xpose.msk.msra.mxu0 %vm266_vm2, %v1250_v5  ;;  %8635 = vmatprep.mubr.msk.f32.mxu0 %vm9524_vm1, %v9523_v22 }
 0x77d   :  { %8659 = vmatprep.subr.mxu0 %v9523_v22 }
 0x77f   :  { %8636 = vmatmul.mubr.msk.f32.vlgmr.msra.gmra.mxu0 %vm266_vm2, %v1244_v6  ;;  %v105_v6 = vld [vmem:[%s11315_s6 + $0x10] sm:$0xff] }
 0x780   :  { %8638 = vmatprep.mubr.msk.f32.mxu0 %vm9524_vm1, %v9523_v22 }
 0x783   :  { %8639 = vmatmul.mubr.msk.f32.gmra.mxu0 %vm266_vm2, %v1246_v7  ;;  %v104_v7 = vld [vmem:[%s11315_s6 + $0x8] sm:$0xff] }
 0x784   :  { %8641 = vmatprep.mubr.msk.f32.mxu0 %vm9524_vm1, %v9523_v22 }
 0x787   :  { %8642 = vmatmul.mubr.msk.f32.gmra.mxu0 %vm266_vm2, %v1248_v9 }
 0x788   :  { %8661 = vmatprep.mubr.msk.f32.mxu0 %vm9524_vm1, %v9523_v22 }
 0x793   :  { %v9911_v12 = vpop.f32.mrf.mxu0 }
 0x795   :  { %v8581_v15 = vpop.f32.mrf.mxu0 }
 0x797   :  { %v9913_v16 = vpop.f32.mrf.mxu0 }
 0x799   :  { %v8584_v17 = vpop.f32.mrf.mxu0 }
 0x79a   :  { %v103_v17 = vld [vmem:[%s11315_s6] sm:$0xff] }
 0x79b   :  { %v9915_v18 = vpop.f32.mrf.mxu0 }
 0x79d   :  { %v8587_v20 = vpop.f32.mrf.mxu0 }
 0x833   :  { %v9917_v24 = vpop.f32.mrf.mxu0 }
 0x835   :  { %v8611_v26 = vpop.f32.mrf.mxu0 }
 0x836   :  { %v81_v26 = vld [vmem:[#allocation5 + $0x8] sm:$0xff] }
 0x837   :  { %v9919_v27 = vpop.f32.mrf.mxu0 }
 0x839   :  { %v8614_v28 = vpop.f32.mrf.mxu0 }
 0x83a   :  { %v899_v28 = vadd.f32 %v9911_v12, %v9836_v8 }
 0x83b   :  { %v9921_v29 = vpop.f32.mrf.mxu0 }
 0x83d   :  { %v8617_v30 = vpop.f32.mrf.mxu0 }
 0x83f   :  { %v1333_v31 = vpop.f32.mrf.mxu0 }
 0x840   :  { %v1334_v32 = vadd.f32 %v1333_v31, %v9731_v10 }
 0x841   :  { %v8637_v33 = vpop.f32.mrf.mxu0 }
 0x842   :  { %v1347_v34 = vsel %vm359_vm3, %v1334_v32, -inf }
 0x843   :  { %1348 = vmax.xlane.f32.xlu0 %v1347_v34  ;;  %v1338_v35 = vpop.f32.mrf.mxu0 }
 0x844   :  { %v1339_v38 = vadd.f32 %v1338_v35, %v9734_v14 }
 0x845   :  { %v8640_v40 = vpop.f32.mrf.mxu0 }
 0x846   :  { %v1350_v41 = vsel %vm359_vm3, %v1339_v38, -inf }
 0x847   :  { %1351 = vmax.xlane.f32.xlu1 %v1350_v41  ;;  %v1343_v42 = vpop.f32.mrf.mxu0 }
 0x848   :  { %v1344_v43 = vadd.f32 %v1343_v42, %v9738_v19 }
 0x849   :  { %v8643_v44 = vpop.f32.mrf.mxu0 }
 0x84a   :  { %v1353_v45 = vsel %vm359_vm3, %v1344_v43, -inf }
 0x84b   :  { %1354 = vmax.xlane.f32.xlu0 %v1353_v45 }
 0x858   :  { %1384 = vrot.lane.b32.xlu1 %v9680_v63, %s9536_s28 }
 0x85c   :  { %1382 = vrot.lane.b32.xlu1 %v9674_v59, %s9536_s28 }
 0x8cc   :  { %v1349_v10 = vpop.xlane.xlu0 %1348 }
 0x8cd   :  { %v1356_v14 = vsub.f32 %v1334_v32, %v1349_v10  ;;  %v904_v32 = vadd.f32 %v9913_v16, %v9838_v11 }
 0x8cf   :  { %v1359_v46 = vmul.f32 1.442695, %v1356_v14 }
 0x8d0   :  { %v1352_v47 = vpop.xlane.xlu1 %1351 }
 0x8d1   :  { %9267 = vpow2.f32 %v1359_v46  ;;  %v1357_v25 = vsub.f32 %v1339_v38, %v1352_v47  ;;  %v909_v38 = vadd.f32 %v9915_v18, %v9840_v13  ;;  %v108_v13 = vld [vmem:[%s11316_s7 + $0x8] sm:$0x3] }
 0x8d2   :  { %v1587_v18 = vrot.slane %v108_v13, %v9651_v37 }
 0x8d3   :  { %v1361_v48 = vmul.f32 1.442695, %v1357_v25 }
 0x8d4   :  { %v1355_v49 = vpop.xlane.xlu0 %1354 }
 0x8d5   :  { %9269 = vpow2.f32 %v1361_v48  ;;  %v1358_v19 = vsub.f32 %v1344_v43, %v1355_v49 }
 0x8d7   :  { %v1363_v50 = vmul.f32 1.442695, %v1358_v19 }
 0x8d9   :  { %9271 = vpow2.f32 %v1363_v50 }
 0x8de   :  { %v9268_v51 = vpop.eup %9267 }
 0x8df   :  { %v1365_v52 = vsel %vm359_vm3, %v9268_v51, 0.0 }
 0x8e0   :  { %1366 = vadd.xlane.f32.xlu0 %v1365_v52 }
 0x8e2   :  { %v9270_v63 = vpop.eup %9269 }
 0x8e3   :  { %v1368_v53 = vsel %vm359_vm3, %v9270_v63, 0.0 }
 0x8e4   :  { %1369 = vadd.xlane.f32.xlu0 %v1368_v53 }
 0x8e6   :  { %v9272_v59 = vpop.eup %9271 }
 0x8e7   :  { %v1371_v55 = vsel %vm359_vm3, %v9272_v59, 0.0 }
 0x8e8   :  { %1372 = vadd.xlane.f32.xlu1 %v1371_v55 }
 0x8f9   :  { %1380 = vrot.lane.b32.xlu1 %v9678_v62, %s9536_s28  ;;  %v1385_v62 = vpop.permute.xlu1 %1384 }
 0x8fa   :  { %1148 = vrot.lane.b32.xlu0 %v9623_v23, %s9530_s23 }
 0x8fd   :  { %1681 = vperm.xlu1 %9223, %v85_v57   ;;  %v1383_v61 = vpop.permute.xlu1 %1382 }
 0x8fe   :  { %1479 = vrot.lane.b32.xlu0 %v9617_v21, %s9530_s23 }
 0x902   :  { %1686 = vperm.xlu0 %9224, %v86_v56  }
 0x969   :  { %v1367_v60 = vpop.xlane.xlu0 %1366 }
 0x96a   :  { %9273 = vrcp.f32 %v1367_v60 }
 0x96d   :  { %v1370_v23 = vpop.xlane.xlu0 %1369 }
 0x96e   :  { %9275 = vrcp.f32 %v1370_v23 }
 0x971   :  { %v1373_v21 = vpop.xlane.xlu1 %1372  ;;  %v1149_v0 = vpop.permute.xlu0 %1148 }
 0x972   :  { %8619 = vmatpush3.msra.mxu1 %v1149_v0  ;;  %9277 = vrcp.f32 %v1373_v21  ;;  %v10063_v0 = vld [vmem:[%s11316_s7] sm:$0xff] }
 0x973   :  { %8621 = vmatmul.mubr.msk.f32.vlgmr.msra.gmra.mxu1 %vm266_vm2, %v9917_v24  ;;  %8644 = vmatprep.subr.mxu1 %v9523_v22  ;;  %v80_v24 = vld [vmem:[#allocation5] sm:$0xff] }
 0x974   :  { %8645 = vmatpush3.msra.mxu1 %v1385_v62  ;;  %8623 = vmatprep.mubr.msk.f32.mxu1 %vm9524_vm1, %v9523_v22 }
 0x975   :  { %8646 = vmatprep.subr.mxu1 %v9523_v22  ;;  %v1381_v2 = vpop.permute.xlu1 %1380 }
 0x976   :  { %8647 = vmatpush3.msra.mxu1 %v1383_v61  ;;  %v10058_v61 = vsub.s32 3, %v9648_v36 }
 0x977   :  { %8624 = vmatmul.mubr.msk.f32.gmra.mxu1 %vm266_vm2, %v9919_v27  ;;  %8648 = vmatprep.subr.mxu1 %v9523_v22  ;;  %v9274_v3 = vpop.eup %9273  ;;  %v1480_v27 = vpop.permute.xlu0 %1479 }
 0x978   :  { %8649 = vmatpush3.msra.mxu1 %v1381_v2  ;;  %8626 = vmatprep.mubr.msk.f32.mxu1 %vm9524_vm1, %v9523_v22  ;;  %v1377_v4 = vmul.f32 %v9274_v3, %v9268_v51  ;;  %v9416_v3 = vld [vmem:[#allocation2] sm:$0xff] }
 0x979   :  { %8670 = vmatprep.subr.mxu1 %v106_v1  ;;  %8660 = vmatpush3.msra.mxu0 %v1480_v27  ;;  %v10031_v53 = vpop.permute.xlu1 %1681 }
 0x97a   :  { %8686 = vmatprep.subr.mxu0 %v9523_v22 }
 0x97b   :  { %8627 = vmatmul.mubr.msk.f32.gmra.mxu1 %vm266_vm2, %v9921_v29  ;;  %v9276_v5 = vpop.eup %9275 }
 0x97c   :  { %8650 = vmatprep.mubr.msk.f32.mxu1 %vm9524_vm1, %v9523_v22  ;;  %v1378_v9 = vmul.f32 %v9276_v5, %v9270_v63 }
 0x97d   :  { %v10020_v49 = vpop.permute.xlu0 %1686 }
 0x97f   :  { %8651 = vmatmul.mubr.msk.f32.vlgmr.msra.gmra.mxu1 %vm359_vm3, %v1377_v4  ;;  %v9278_v15 = vpop.eup %9277 }
 0x980   :  { %8653 = vmatprep.mubr.msk.f32.mxu1 %vm9524_vm1, %v9523_v22  ;;  %8671 = vmatpush3.msra.mxu1 %v106_v1  ;;  %v1379_v20 = vmul.f32 %v9278_v15, %v9272_v59  ;;  %v1580_v1 = vrot.slane %v10063_v0, %v10058_v61  ;;  %v9417_v15 = vld [vmem:[#allocation2 + $0x8] sm:$0xff] }
 0x981   :  { %8672 = vmatprep.subr.mxu1 %v105_v6 }
 0x982   :  { %8673 = vmatpush3.msra.mxu1 %v105_v6 }
 0x983   :  { %8654 = vmatmul.mubr.msk.f32.gmra.mxu1 %vm359_vm3, %v1378_v9  ;;  %8674 = vmatprep.subr.mxu1 %v104_v7 }
 0x984   :  { %8656 = vmatprep.mubr.msk.f32.mxu1 %vm9524_vm1, %v9523_v22  ;;  %8675 = vmatpush3.msra.mxu1 %v104_v7 }
 0x985   :  { %8676 = vmatprep.subr.mxu1 %v103_v17 }
 0x986   :  { %8677 = vmatpush3.msra.mxu1 %v103_v17 }
 0x987   :  { %8657 = vmatmul.mubr.msk.f32.gmra.mxu1 %vm359_vm3, %v1379_v20  ;;  %8681 = vmatprep.subr.mxu1 %v9523_v22 }
 0x988   :  { %8678 = vmatprep.mubr.msk.f32.mxu1 %vm109_vm0, %v80_v24 }
 0x98b   :  { %8679 = vmatmul.mubr.msk.f32.vlgmr.msra.gmra.mxu1 %vm109_vm0, %v81_v26 }
 0x98c   :  { %8683 = vmatprep.mubr.msk.f32.mxu1 %vm9524_vm1, %v9523_v22 }
 0xa33   :  { %v1226_v29 = vpop.f32.mrf.mxu1 }
 0xa34   :  { %v1240_v30 = vadd.f32 %v1226_v29, %v899_v28  ;;  %v9418_v29 = vld [vmem:[#allocation2 + $0x10] sm:$0xff] }
 0xa35   :  { %v8622_v31 = vpop.f32.mrf.mxu1 }
 0xa37   :  { %v1231_v33 = vpop.f32.mrf.mxu1 }
 0xa38   :  { %v9992_v34 = vadd.f32 %v1231_v33, %v904_v32 }
 0xa39   :  { %v8625_v35 = vpop.f32.mrf.mxu1 }
 0xa3b   :  { %v1236_v40 = vpop.f32.mrf.mxu1 }
 0xa3c   :  { %v9996_v41 = vadd.f32 %v1236_v40, %v909_v38 }
 0xa3d   :  { %v8628_v42 = vpop.f32.mrf.mxu1 }
 0xa3f   :  { %v1464_v43 = vpop.f32.mrf.mxu1 }
 0xa40   :  { %8662 = vmatmul.mubr.msk.f32.vlgmr.msra.gmra.mxu0 %vm266_vm2, %v1464_v43 }
 0xa41   :  { %v8652_v8 = vpop.f32.mrf.mxu1  ;;  %8664 = vmatprep.mubr.msk.f32.mxu0 %vm9524_vm1, %v9523_v22 }
 0xa43   :  { %v1469_v12 = vpop.f32.mrf.mxu1 }
 0xa44   :  { %8665 = vmatmul.mubr.msk.f32.gmra.mxu0 %vm266_vm2, %v1469_v12 }
 0xa45   :  { %v8655_v11 = vpop.f32.mrf.mxu1  ;;  %8667 = vmatprep.mubr.msk.f32.mxu0 %vm9524_vm1, %v9523_v22 }
 0xa47   :  { %v1474_v16 = vpop.f32.mrf.mxu1 }
 0xa48   :  { %8668 = vmatmul.mubr.msk.f32.gmra.mxu0 %vm266_vm2, %v1474_v16 }
 0xa49   :  { %v8658_v44 = vpop.f32.mrf.mxu1  ;;  %8688 = vmatprep.mubr.msk.f32.mxu0 %vm9524_vm1, %v9523_v22 }
 0xa4b   :  { %v8680_v45 = vpop.f32.mrf.mxu1 }
 0xa4c   :  { %v10011_v10 = vadd.f32 %v8680_v45, %v1587_v18 }
 0xa4d   :  { %v1660_v14 = vpop.f32.mrf.mxu1 }
 0xa4e   :  { %v1675_v46 = vmul.f32 1.442695, %v10011_v10  ;;  %v10014_v47 = vadd.f32 %v1660_v14, %v1587_v18  ;;  %v1672_v48 = vadd.f32 1.0, %v10011_v10  ;;  %vm1670_vm4 = vcmp.gt.f32.partialorder %v10011_v10, 0.0 }
 0xa50   :  { %9279 = vpow2.f32 %v1675_v46  ;;  %v1673_v25 = vmul.f32 1.442695, %v10014_v47  ;;  %2135 = vrot.lane.b32.xlu0 %v10014_v47, %s9529_s22  ;;  %v1671_v50 = vadd.f32 1.0, %v10014_v47  ;;  %vm1669_vm5 = vcmp.gt.f32.partialorder %v10014_v47, 0.0 }
 0xa52   :  { %9281 = vpow2.f32 %v1673_v25 }
 0xa5d   :  { %v9280_v19 = vpop.eup %9279 }
 0xa5e   :  { %v10024_v51 = vsel %vm1670_vm4, %v1672_v48, %v9280_v19 }
 0xa5f   :  { %v9282_v52 = vpop.eup %9281  ;;  %v10029_v63 = vmul.f32 %v10020_v49, %v10024_v51 }
 0xa60   :  { %v10033_v59 = vsel %vm1669_vm5, %v1671_v50, %v9282_v52 }
 0xa61   :  { %2308 = vrot.lane.b32.xlu1 %v10029_v63, %s9526_s18  ;;  %1897 = vrot.lane.b32.xlu0 %v10029_v63, %s9525_s17  ;;  %v10041_v55 = vmul.f32 %v10031_v53, %v10033_v59 }
 0xa65   :  { %1692 = vrot.lane.b32.xlu1 %v10041_v55, %s9525_s17  ;;  %2723 = vrot.lane.b32.xlu0 %v10029_v63, %s9531_s24 }
 0xa69   :  { %2100 = vrot.lane.b32.xlu1 %v10041_v55, %s9526_s18  ;;  %3138 = vrot.lane.b32.xlu0 %v10029_v63, %s9534_s27 }
 0xa6d   :  { %2515 = vrot.lane.b32.xlu1 %v10041_v55, %s9531_s24 }
 0xac2   :  { %v10053_v56 = vpop.permute.xlu0 %2135 }
 0xad3   :  { %v10055_v57 = vpop.permute.xlu1 %2308  ;;  %v1898_v58 = vpop.permute.xlu0 %1897 }
 0xad4   :  { %1900 = vxpose.xlu0.b32.start.end [1/1] (short) (narrow) %v1898_v58, 8 }
 0xad7   :  { %v1693_v62 = vpop.permute.xlu1 %1692  ;;  %v2724_v35 = vpop.permute.xlu0 %2723 }
 0xad8   :  { %1695 = vxpose.xlu1.b32.start.end [1/1] (short) (narrow) %v1693_v62, 8  ;;  %v2212_v62 = vsel %vm2211_vm6, %v10041_v55, 0.0 }
 0xadb   :  { %v2101_v60 = vpop.permute.xlu1 %2100  ;;  %v3139_v38 = vpop.permute.xlu0 %3138 }
 0xadc   :  { %2103 = vxpose.xlu0.b32.start.end [1/1] (short) (narrow) %v2101_v60, 8  ;;  %v2213_v60 = vrot.slane %v2212_v62, 4 }
 0xb00   :  { %v1557_v23 = vpop.f32.mrf.mxu0 }
 0xb01   :  { %v1571_v21 = vadd.f32 %v1557_v23, %v1240_v30  ;;  %v2214_v23 = vadd.f32 %v2213_v60, %v2212_v62 }
 0xb02   :  { %v8663_v2 = vpop.f32.mrf.mxu0 }
 0xb03   :  { %v1574_v4 = vadd.f32 %v9416_v3, %v1571_v21  ;;  %v2215_v2 = vrot.slane %v2214_v23, 2 }
 0xb04   :  { %v1562_v5 = vpop.f32.mrf.mxu0 }
 0xb05   :  { %v10067_v6 = vadd.f32 %v1580_v1, %v1574_v4  ;;  %v1572_v7 = vadd.f32 %v1562_v5, %v9992_v34  ;;  %v2516_v34 = vpop.permute.xlu1 %2515  ;;  %v2419_v5 = vsel %vm2211_vm6, %v10029_v63, 0.0 }
 0xb06   :  { %v8666_v9 = vpop.f32.mrf.mxu0 }
 0xb07   :  { %v1575_v17 = vadd.f32 %v9417_v15, %v1572_v7  ;;  %v3378_v20 = vsel %vm109_vm0, %v10067_v6, 0.0  ;;  %v2420_v7 = vrot.slane %v2419_v5, 4  ;;  %v2216_v9 = vadd.f32 %v2215_v2, %v2214_v23 }
 0xb08   :  { %3379 = vadd.xlane.f32.xlu1 %v3378_v20  ;;  %v1567_v24 = vpop.f32.mrf.mxu0  ;;  %v2834_v20 = vsel %vm2626_vm7, %v10029_v63, 0.0 }
 0xb09   :  { %v10072_v26 = vadd.f32 %v1580_v1, %v1575_v17  ;;  %v1573_v27 = vadd.f32 %v1567_v24, %v9996_v41  ;;  %v2421_v24 = vadd.f32 %v2420_v7, %v2419_v5 }
 0xb0a   :  { %v8669_v28 = vpop.f32.mrf.mxu0 }
 0xb0b   :  { %v1576_v30 = vadd.f32 %v9418_v29, %v1573_v27  ;;  %v3381_v31 = vsel %vm109_vm0, %v10072_v26, 0.0  ;;  %v2835_v27 = vrot.slane %v2834_v20, 4  ;;  %v2217_v28 = vrot.slane %v2216_v9, 1 }
 0xb0c   :  { %3382 = vadd.xlane.f32.xlu0 %v3381_v31  ;;  %v3249_v31 = vsel %vm3041_vm8, %v10029_v63, 0.0 }
 0xb0d   :  { %v10077_v32 = vadd.f32 %v1580_v1, %v1576_v30  ;;  %v3042_v1 = vsel %vm3041_vm8, %v10041_v55, 0.0 }
 0xb0e   :  { %v3043_v4 = vrot.slane %v3042_v1, 4 }
 0xb0f   :  { %v3384_v33 = vsel %vm109_vm0, %v10077_v32, 0.0 }
 0xb10   :  { %3385 = vadd.xlane.f32.xlu0 %v3384_v33  ;;  %v3044_v17 = vadd.f32 %v3043_v4, %v3042_v1  ;;  %v2422_v33 = vrot.slane %v2421_v24, 2 }
 0xb12   :  { %v3045_v30 = vrot.slane %v3044_v17, 2 }
 0xb26   :  { %2550 = vrot.lane.b32.xlu0 %v10014_v47, %s9533_s26 }
 0xb2a   :  { %2758 = vrot.lane.b32.xlu0 %v10011_v10, %s9533_s26 }
 0xb2e   :  { %2965 = vrot.lane.b32.xlu0 %v10014_v47, %s9536_s28 }
 0xb32   :  { %3173 = vrot.lane.b32.xlu0 %v10011_v10, %s9536_s28 }
 0xb3b   :  { %2518 = vxpose.xlu1.b32.start.end [1/1] (short) (narrow) %v2516_v34, 8  ;;  %v2836_v34 = vadd.f32 %v2835_v27, %v2834_v20  ;;  %v94_v27 = vld [vmem:[%s11313_s4 + $0x38] sm:$0xff] }
 0xb50   :  { %v1916_v40 = vpop.trf.xlu0 }
 0xb54   :  { %v1711_v41 = vpop.trf.xlu1 }
 0xb58   :  { %v2119_v42 = vpop.trf.xlu0 }
 0xb59   :  { %2930 = vrot.lane.b32.xlu1 %v10041_v55, %s9534_s27 }
 0xb5d   :  { %1728 = vrot.lane.b32.xlu1 %v10014_v47, %s9528_s21 }
 0xb61   :  { %1933 = vrot.lane.b32.xlu1 %v10011_v10, %s9528_s21 }
 0xb65   :  { %2343 = vrot.lane.b32.xlu1 %v10011_v10, %s9529_s22 }
 0xb91   :  { %v3380_v43 = vpop.xlane.xlu1 %3379 }
 0xb92   :  { %v3387_v8 = vmul.f32 0.03125, %v3380_v43  ;;  %v2837_v43 = vrot.slane %v2836_v34, 2 }
 0xb94   :  { %v10098_v12 = vsub.f32 %v10067_v6, %v3387_v8 }
 0xb95   :  { %v3383_v11 = vpop.xlane.xlu0 %3382 }
 0xb96   :  { %v3388_v13 = vmul.f32 0.03125, %v3383_v11  ;;  %v3393_v16 = vmul.f32 %v10098_v12, %v10098_v12 }
 0xb98   :  { %v10103_v18 = vsub.f32 %v10072_v26, %v3388_v13  ;;  %v3396_v44 = vsel %vm109_vm0, %v3393_v16, 0.0 }
 0xb99   :  { %3397 = vadd.xlane.f32.xlu0 %v3396_v44  ;;  %v3386_v45 = vpop.xlane.xlu0 %3385  ;;  %v2838_v44 = vadd.f32 %v2837_v43, %v2836_v34 }
 0xb9a   :  { %v3389_v10 = vmul.f32 0.03125, %v3386_v45  ;;  %v3394_v14 = vmul.f32 %v10103_v18, %v10103_v18 }
 0xb9c   :  { %v10109_v46 = vsub.f32 %v10077_v32, %v3389_v10  ;;  %v3399_v47 = vsel %vm109_vm0, %v3394_v14, 0.0 }
 0xb9d   :  { %3400 = vadd.xlane.f32.xlu1 %v3399_v47  ;;  %v2839_v47 = vrot.slane %v2838_v44, 1 }
 0xb9e   :  { %v3395_v25 = vmul.f32 %v10109_v46, %v10109_v46 }
 0xba0   :  { %v3402_v48 = vsel %vm109_vm0, %v3395_v25, 0.0 }
 0xba1   :  { %3403 = vadd.xlane.f32.xlu1 %v3402_v48  ;;  %v2840_v48 = vadd.f32 %v2839_v47, %v2838_v44 }
 0xbb7   :  { %v10115_v19 = vpop.trf.xlu1 }
 0xbc6   :  { %2311 = vxpose.xlu0.b32.start.end [1/1] (short) (narrow) %v10055_v57, 8 }
 0xbca   :  { %2726 = vxpose.xlu0.b32.start.end [1/1] (short) (narrow) %v2724_v35, 8  ;;  %v3250_v35 = vrot.slane %v3249_v31, 4 }
 0xbcb   :  { %v2931_v50 = vpop.permute.xlu1 %2930 }
 0xbcc   :  { %v3251_v8 = vadd.f32 %v3250_v35, %v3249_v31 }
 0xbce   :  { %3141 = vxpose.xlu0.b32.start.end [1/1] (short) (narrow) %v3139_v38, 8  ;;  %v2218_v38 = vadd.f32 %v2217_v28, %v2216_v9  ;;  %v3252_v45 = vrot.slane %v3251_v8, 2 }
 0xbcf   :  { %v1729_v52 = vpop.permute.xlu1 %1728 }
 0xbd0   :  { %8682 = vmatpush3.msra.mxu1 %v1729_v52  ;;  %v3253_v25 = vadd.f32 %v3252_v45, %v3251_v8 }
 0xbd1   :  { %8684 = vmatmul.mubr.msk.f32.vlgmr.msra.gmra.mxu1 %vm266_vm2, %v1711_v41  ;;  %8691 = vmatprep.subr.mxu1 %v9523_v22  ;;  %v3046_v41 = vadd.f32 %v3045_v30, %v3044_v17  ;;  %v10176_v17 = vsub.s32 4, %v9648_v36  ;;  %v10189_v30 = vsub.s32 5, %v9648_v36 }
 0xbd2   :  { %8693 = vmatprep.mubr.msk.f32.mxu1 %vm9524_vm1, %v9523_v22 }
 0xbd3   :  { %v1934_v58 = vpop.permute.xlu1 %1933  ;;  %v3047_v13 = vrot.slane %v3046_v41, 1  ;;  %v3427_v35 = vrot.slane %v10063_v0, %v10189_v30 }
 0xbd4   :  { %8692 = vmatpush3.msra.mxu1 %v1934_v58  ;;  %2933 = vxpose.xlu1.b32.start.end [1/1] (short) (narrow) %v2931_v50, 8  ;;  %v3254_v50 = vrot.slane %v3253_v25, 1  ;;  %v2551_v58 = vpop.permute.xlu0 %2550 }
 0xbd5   :  { %8694 = vmatmul.mubr.msk.f32.vlgmr.msra.gmra.mxu1 %vm266_vm2, %v1916_v40  ;;  %8701 = vmatprep.subr.mxu1 %v9523_v22  ;;  %v3048_v10 = vadd.f32 %v3047_v13, %v3046_v41  ;;  %v88_v41 = vld [vmem:[%s11313_s4 + $0x8] sm:$0xff] }
 0xbd6   :  { %8702 = vmatpush3.msra.mxu1 %v10053_v56  ;;  %8703 = vmatprep.mubr.msk.f32.mxu1 %vm9524_vm1, %v9523_v22  ;;  %v2627_v56 = vsel %vm2626_vm7, %v10041_v55, 0.0  ;;  %v3255_v52 = vadd.f32 %v3254_v50, %v3253_v25 }
 0xbd7   :  { %v2344_v57 = vpop.permute.xlu1 %2343  ;;  %8711 = vmatprep.subr.mxu1 %v9523_v22  ;;  %v2628_v21 = vrot.slane %v2627_v56, 4 }
 0xbd9   :  { %8704 = vmatmul.mubr.msk.f32.vlgmr.msra.gmra.mxu1 %vm266_vm2, %v2119_v42  ;;  %v2629_v3 = vadd.f32 %v2628_v21, %v2627_v56  ;;  %v2423_v42 = vadd.f32 %v2422_v33, %v2421_v24  ;;  %v92_v33 = vld [vmem:[%s11313_s4 + $0x28] sm:$0xff] }
 0xbda   :  { %8712 = vmatpush3.msra.mxu1 %v2344_v57  ;;  %8713 = vmatprep.mubr.msk.f32.mxu1 %vm9524_vm1, %v9523_v22  ;;  %v2759_v57 = vpop.permute.xlu0 %2758 }
 0xbdb   :  { %8721 = vmatprep.subr.mxu1 %v9523_v22  ;;  %v2630_v15 = vrot.slane %v2629_v3, 2  ;;  %v2424_v16 = vrot.slane %v2423_v42, 1 }
 0xbdd   :  { %v2631_v29 = vadd.f32 %v2630_v15, %v2629_v3  ;;  %v2425_v14 = vadd.f32 %v2424_v16, %v2423_v42  ;;  %v1805_v16 = vsel %vm1804_vm9, %v10041_v55, 0.0 }
 0xbde   :  { %v2966_v62 = vpop.permute.xlu0 %2965 }
 0xbdf   :  { %v2632_v40 = vrot.slane %v2631_v29, 1 }
 0xbe1   :  { %v2633_v11 = vadd.f32 %v2632_v40, %v2631_v29  ;;  %v3420_v29 = vrot.slane %v10063_v0, %v10176_v17 }
 0xbe2   :  { %v3174_v60 = vpop.permute.xlu0 %3173 }
 0xbf2   :  { %2233 = vrot.lane.b32.xlu1 %v10033_v59, %s9527_s20 }
 0xbf6   :  { %2648 = vrot.lane.b32.xlu1 %v10033_v59, %s9532_s25 }
 0xbf7   :  { %2440 = vrot.lane.b32.xlu0 %v10024_v51, %s9527_s20 }
 0xbfa   :  { %2855 = vrot.lane.b32.xlu1 %v10024_v51, %s9532_s25 }
 0xbfb   :  { %2220 = vrot.lane.b32.xlu0 %v2218_v38, %s9525_s17 }
 0xbfe   :  { %3063 = vrot.lane.b32.xlu1 %v10033_v59, %s9535_s1 }
 0xbff   :  { %2635 = vrot.lane.b32.xlu0 %v2633_v11, %s9525_s17 }
 0xc02   :  { %3270 = vrot.lane.b32.xlu1 %v10024_v51, %s9535_s1 }
 0xc03   :  { %3050 = vrot.lane.b32.xlu0 %v3048_v10, %s9525_s17 }
 0xc06   :  { %2427 = vrot.lane.b32.xlu1 %v2425_v14, %s9525_s17 }
 0xc0a   :  { %2842 = vrot.lane.b32.xlu1 %v2840_v48, %s9525_s17 }
 0xc0e   :  { %3257 = vrot.lane.b32.xlu1 %v3255_v52, %s9525_s17  ;;  %v2009_v52 = vsel %vm1804_vm9, %v10029_v63, 0.0 }
 0xc22   :  { %v3398_v56 = vpop.xlane.xlu0 %3397 }
 0xc23   :  { %v3405_v21 = vmul.f32 0.03125, %v3398_v56 }
 0xc25   :  { %v3408_v1 = vadd.f32 1e-05, %v3405_v21 }
 0xc26   :  { %v3401_v23 = vpop.xlane.xlu1 %3400 }
 0xc27   :  { %v3406_v2 = vmul.f32 0.03125, %v3401_v23  ;;  %9283 = vrsqrt.f32 %v3408_v1 }
 0xc29   :  { %v3409_v5 = vadd.f32 1e-05, %v3406_v2 }
 0xc2a   :  { %v3404_v3 = vpop.xlane.xlu1 %3403 }
 0xc2b   :  { %v3407_v7 = vmul.f32 0.03125, %v3404_v3  ;;  %9285 = vrsqrt.f32 %v3409_v5 }
 0xc2d   :  { %v3410_v9 = vadd.f32 1e-05, %v3407_v7 }
 0xc2f   :  { %9287 = vrsqrt.f32 %v3410_v9 }
 0xc42   :  { %v2327_v4 = vpop.trf.xlu0 }
 0xc43   :  { %8714 = vmatmul.mubr.msk.f32.vlgmr.msra.gmra.mxu1 %vm266_vm2, %v2327_v4 }
 0xc44   :  { %8722 = vmatpush3.msra.mxu1 %v2551_v58  ;;  %8723 = vmatprep.mubr.msk.f32.mxu1 %vm9524_vm1, %v9523_v22 }
 0xc45   :  { %8731 = vmatprep.subr.mxu1 %v9523_v22 }
 0xc46   :  { %v2742_v15 = vpop.trf.xlu0 }
 0xc47   :  { %8724 = vmatmul.mubr.msk.f32.vlgmr.msra.gmra.mxu1 %vm266_vm2, %v10115_v19  ;;  %v9284_v19 = vpop.eup %9283 }
 0xc48   :  { %8732 = vmatpush3.msra.mxu1 %v2759_v57  ;;  %8733 = vmatprep.mubr.msk.f32.mxu1 %vm9524_vm1, %v9523_v22  ;;  %v3414_v28 = vmul.f32 %v9284_v19, %v10098_v12  ;;  %v9286_v31 = vpop.eup %9285  ;;  %v90_v12 = vld [vmem:[%s11313_s4 + $0x18] sm:$0xff]  ;;  %v2010_v57 = vrot.slane %v2009_v52, 4 }
 0xc49   :  { %8741 = vmatprep.subr.mxu1 %v9523_v22  ;;  %v3415_v38 = vmul.f32 %v9286_v31, %v10103_v18  ;;  %v9288_v40 = vpop.eup %9287 }
 0xc4a   :  { %v3157_v24 = vpop.trf.xlu0  ;;  %v3421_v34 = vmul.f32 %v3420_v29, %v3414_v28  ;;  %v3416_v8 = vmul.f32 %v9288_v40, %v10109_v46  ;;  %v1806_v46 = vrot.slane %v1805_v16, 4  ;;  %v2011_v21 = vadd.f32 %v2010_v57, %v2009_v52 }
 0xc4b   :  { %8734 = vmatmul.mubr.msk.f32.vlgmr.msra.gmra.mxu1 %vm266_vm2, %v2742_v15  ;;  %v3422_v43 = vmul.f32 %v3420_v29, %v3415_v38  ;;  %v10290_v57 = vsub.s32 6, %v9648_v36 }
 0xc4c   :  { %8742 = vmatpush3.msra.mxu1 %v2966_v62  ;;  %8743 = vmatprep.mubr.msk.f32.mxu1 %vm9524_vm1, %v9523_v22  ;;  %v3428_v42 = vadd.f32 %v3427_v35, %v3421_v34  ;;  %v3423_v11 = vmul.f32 %v3420_v29, %v3416_v8  ;;  %v1807_v14 = vadd.f32 %v1806_v46, %v1805_v16  ;;  %v2012_v4 = vrot.slane %v2011_v21, 2 }
 0xc4d   :  { %8751 = vmatprep.subr.mxu1 %v9523_v22  ;;  %v3429_v18 = vadd.f32 %v3427_v35, %v3422_v43 }
 0xc4e   :  { %v3430_v13 = vadd.f32 %v3427_v35, %v3423_v11  ;;  %v1808_v50 = vrot.slane %v1807_v14, 2  ;;  %v2013_v15 = vadd.f32 %v2012_v4, %v2011_v21 }
 0xc50   :  { %v2949_v20 = vpop.trf.xlu1 }
 0xc51   :  { %8744 = vmatmul.mubr.msk.f32.vlgmr.msra.gmra.mxu1 %vm266_vm2, %v2949_v20 }
 0xc52   :  { %8752 = vmatpush3.msra.mxu1 %v3174_v60  ;;  %8753 = vmatprep.mubr.msk.f32.mxu1 %vm9524_vm1, %v9523_v22  ;;  %v1809_v60 = vadd.f32 %v1808_v50, %v1807_v14 }
 0xc53   :  { %8761 = vmatprep.subr.mxu1 %v9523_v22 }
 0xc54   :  { %v1810_v2 = vrot.slane %v1809_v60, 1 }
 0xc55   :  { %8754 = vmatmul.mubr.msk.f32.vlgmr.msra.gmra.mxu1 %vm266_vm2, %v3157_v24  ;;  %v2014_v24 = vrot.slane %v2013_v15, 1 }
 0xc56   :  { %8762 = vmatpush3.msra.mxu1 %v94_v27  ;;  %8769 = vmatprep.mubr.msk.f32.mxu1 %vm9524_vm1, %v9523_v22  ;;  %v1811_v5 = vadd.f32 %v1810_v2, %v1809_v60  ;;  %v100_v60 = vld [vmem:[%s11314_s5 + $0x28] sm:$0xff] }
 0xc57   :  { %8763 = vmatprep.subr.mxu1 %v9523_v22  ;;  %v2015_v27 = vadd.f32 %v2014_v24, %v2013_v15 }
 0xc58   :  { %8764 = vmatpush3.msra.mxu1 %v92_v33 }
 0xc59   :  { %8765 = vmatprep.subr.mxu1 %v9523_v22 }
 0xc5a   :  { %8766 = vmatpush3.msra.mxu1 %v90_v12 }
 0xc5b   :  { %8767 = vmatprep.subr.mxu1 %v9523_v22 }
 0xc5c   :  { %8768 = vmatpush3.msra.mxu1 %v88_v41 }
 0xc5d   :  { %8770 = vmatmul.mubr.msk.f32.vlgmr.msra.gmra.mxu1 %vm109_vm0, %v3428_v42 }
 0xc5e   :  { %8772 = vmatprep.mubr.msk.f32.mxu1 %vm9524_vm1, %v9523_v22 }
 0xc61   :  { %8773 = vmatmul.mubr.msk.f32.gmra.mxu1 %vm109_vm0, %v3429_v18 }
 0xc62   :  { %8775 = vmatprep.mubr.msk.f32.mxu1 %vm9524_vm1, %v9523_v22 }
 0xc64   :  { %v2234_v44 = vpop.permute.xlu1 %2233 }
 0xc65   :  { %8776 = vmatmul.mubr.msk.f32.gmra.mxu1 %vm109_vm0, %v3430_v13 }
 0xc68   :  { %v10219_v45 = vpop.permute.xlu1 %2648 }
 0xc69   :  { %v10221_v10 = vpop.permute.xlu0 %2440 }
 0xc6c   :  { %v10223_v47 = vpop.permute.xlu1 %2855 }
 0xc6d   :  { %v2221_v25 = vpop.permute.xlu0 %2220 }
 0xc6e   :  { %v2223_v48 = vmul.f32 %v2221_v25, %v10033_v59 }
 0xc70   :  { %v10228_v58 = vpop.permute.xlu1 %3063  ;;  %2225 = vrot.lane.b32.xlu0 %v2223_v48, %s9527_s20 }
 0xc71   :  { %v2636_v55 = vpop.permute.xlu0 %2635 }
 0xc72   :  { %v2638_v62 = vmul.f32 %v2636_v55, %v10033_v59 }
 0xc74   :  { %v10232_v56 = vpop.permute.xlu1 %3270  ;;  %2640 = vrot.lane.b32.xlu0 %v2638_v62, %s9532_s25 }
 0xc75   :  { %v3051_v23 = vpop.permute.xlu0 %3050 }
 0xc76   :  { %v3053_v1 = vmul.f32 %v3051_v23, %v10033_v59  ;;  %v3434_v23 = vrot.slane %v10063_v0, %v10290_v57 }
 0xc78   :  { %v2428_v3 = vpop.permute.xlu1 %2427  ;;  %3055 = vrot.lane.b32.xlu0 %v3053_v1, %s9535_s1  ;;  %v98_v1 = vld [vmem:[%s11314_s5 + $0x18] sm:$0xff] }
 0xc79   :  { %v2430_v63 = vmul.f32 %v2428_v3, %v10024_v51 }
 0xc7b   :  { %2432 = vrot.lane.b32.xlu1 %v2430_v63, %s9527_s20  ;;  %v97_v63 = vld [vmem:[%s11314_s5 + $0x10] sm:$0xff] }
 0xc7c   :  { %v2843_v7 = vpop.permute.xlu1 %2842  ;;  %1813 = vrot.lane.b32.xlu0 %v1811_v5, %s9525_s17 }
 0xc7d   :  { %v2845_v9 = vmul.f32 %v2843_v7, %v10024_v51  ;;  %v96_v7 = vld [vmem:[%s11314_s5 + $0x8] sm:$0xff] }
 0xc7f   :  { %2847 = vrot.lane.b32.xlu1 %v2845_v9, %s9532_s25 }
 0xc80   :  { %v3258_v19 = vpop.permute.xlu1 %3257 }
 0xc81   :  { %v3260_v20 = vmul.f32 %v3258_v19, %v10024_v51  ;;  %v95_v19 = vld [vmem:[%s11314_s5] sm:$0xff] }
 0xc83   :  { %3262 = vrot.lane.b32.xlu1 %v3260_v20, %s9535_s1 }
 0xc87   :  { %2017 = vrot.lane.b32.xlu1 %v2015_v27, %s9525_s17 }
 0xc91   :  { %v1800_v28 = vpop.f32.mrf.mxu1 }
 0xc92   :  { %8687 = vmatpush3.msra.mxu0 %v1800_v28 }
 0xc93   :  { %v8685_v29 = vpop.f32.mrf.mxu1  ;;  %8689 = vmatmul.mubr.msk.f32.vlgmr.msra.gmra.mxu0 %vm266_vm2, %v10033_v59  ;;  %8696 = vmatprep.subr.mxu0 %v9523_v22 }
 0xc94   :  { %8698 = vmatprep.mubr.msk.f32.mxu0 %vm9524_vm1, %v9523_v22 }
 0xc95   :  { %v2005_v31 = vpop.f32.mrf.mxu1 }
 0xc96   :  { %8697 = vmatpush3.msra.mxu0 %v2005_v31 }
 0xc97   :  { %v8695_v33 = vpop.f32.mrf.mxu1  ;;  %8699 = vmatmul.mubr.msk.f32.vlgmr.msra.gmra.mxu0 %vm266_vm2, %v10024_v51  ;;  %8706 = vmatprep.subr.mxu0 %v9523_v22 }
 0xc98   :  { %8708 = vmatprep.mubr.msk.f32.mxu0 %vm9524_vm1, %v9523_v22 }
 0xc99   :  { %v2207_v12 = vpop.f32.mrf.mxu1 }
 0xc9a   :  { %8707 = vmatpush3.msra.mxu0 %v2207_v12 }
 0xc9b   :  { %v8705_v34 = vpop.f32.mrf.mxu1  ;;  %8709 = vmatmul.mubr.msk.f32.vlgmr.msra.gmra.mxu0 %vm266_vm2, %v2234_v44  ;;  %8716 = vmatprep.subr.mxu0 %v9523_v22 }
 0xc9c   :  { %8718 = vmatprep.mubr.msk.f32.mxu0 %vm9524_vm1, %v9523_v22 }
 0xce2   :  { %v2226_v35 = vpop.permute.xlu0 %2225 }
 0xce3   :  { %v2228_v38 = vsel %vm266_vm2, %v2226_v35, 0.0 }
 0xce4   :  { %2229 = vadd.xlane.f32.xlu1 %v2228_v38 }
 0xce6   :  { %v2641_v40 = vpop.permute.xlu0 %2640 }
 0xce7   :  { %v2643_v16 = vsel %vm266_vm2, %v2641_v40, 0.0 }
 0xcea   :  { %v3056_v41 = vpop.permute.xlu0 %3055 }
 0xceb   :  { %v3058_v42 = vsel %vm266_vm2, %v3056_v41, 0.0 }
 0xcec   :  { %3059 = vadd.xlane.f32.xlu1 %v3058_v42 }
 0xced   :  { %v2433_v43 = vpop.permute.xlu1 %2432 }
 0xcee   :  { %v1814_v8 = vpop.permute.xlu0 %1813  ;;  %v2435_v18 = vsel %vm266_vm2, %v2433_v43, 0.0 }
 0xcef   :  { %v1816_v11 = vmul.f32 %v1814_v8, %v10033_v59  ;;  %2436 = vadd.xlane.f32.xlu0 %v2435_v18 }
 0xcf1   :  { %v1817_v13 = vsel %vm266_vm2, %v1816_v11, 0.0  ;;  %v2848_v44 = vpop.permute.xlu1 %2847 }
 0xcf2   :  { %1818 = vadd.xlane.f32.xlu1 %v1817_v13  ;;  %v2850_v46 = vsel %vm266_vm2, %v2848_v44, 0.0 }
 0xcf3   :  { %2644 = vadd.xlane.f32.xlu0 %v2643_v16 }
 0xcf7   :  { %2851 = vadd.xlane.f32.xlu0 %v2850_v46 }
 0xd03   :  { %v2415_v14 = vpop.f32.mrf.mxu1 }
 0xd04   :  { %8717 = vmatpush3.msra.mxu0 %v2415_v14 }
 0xd05   :  { %v8715_v25 = vpop.f32.mrf.mxu1  ;;  %8719 = vmatmul.mubr.msk.f32.vlgmr.msra.gmra.mxu0 %vm266_vm2, %v10221_v10  ;;  %8726 = vmatprep.subr.mxu0 %v9523_v22 }
 0xd06   :  { %8728 = vmatprep.mubr.msk.f32.mxu0 %vm9524_vm1, %v9523_v22 }
 0xd07   :  { %v2622_v59 = vpop.f32.mrf.mxu1 }
 0xd08   :  { %8727 = vmatpush3.msra.mxu0 %v2622_v59 }
 0xd09   :  { %v8725_v48 = vpop.f32.mrf.mxu1  ;;  %8729 = vmatmul.mubr.msk.f32.vlgmr.msra.gmra.mxu0 %vm266_vm2, %v10219_v45  ;;  %8736 = vmatprep.subr.mxu0 %v9523_v22 }
 0xd0a   :  { %8738 = vmatprep.mubr.msk.f32.mxu0 %vm9524_vm1, %v9523_v22 }
 0xd0b   :  { %v2830_v50 = vpop.f32.mrf.mxu1 }
 0xd0c   :  { %8737 = vmatpush3.msra.mxu0 %v2830_v50 }
 0xd0d   :  { %v8735_v52 = vpop.f32.mrf.mxu1  ;;  %8739 = vmatmul.mubr.msk.f32.vlgmr.msra.gmra.mxu0 %vm266_vm2, %v10223_v47  ;;  %8746 = vmatprep.subr.mxu0 %v9523_v22  ;;  %v102_v47 = vld [vmem:[%s11314_s5 + $0x38] sm:$0xff] }
 0xd0e   :  { %8748 = vmatprep.mubr.msk.f32.mxu0 %vm9524_vm1, %v9523_v22 }
 0xd11   :  { %v3037_v10 = vpop.f32.mrf.mxu1 }
 0xd12   :  { %8747 = vmatpush3.msra.mxu0 %v3037_v10 }
 0xd13   :  { %v8745_v55 = vpop.f32.mrf.mxu1  ;;  %8749 = vmatmul.mubr.msk.f32.vlgmr.msra.gmra.mxu0 %vm266_vm2, %v10228_v58  ;;  %8756 = vmatprep.subr.mxu0 %v9523_v22  ;;  %v101_v58 = vld [vmem:[%s11314_s5 + $0x30] sm:$0xff] }
 0xd14   :  { %8758 = vmatprep.mubr.msk.f32.mxu0 %vm9524_vm1, %v9523_v22 }
 0xd15   :  { %v3245_v45 = vpop.f32.mrf.mxu1 }
 0xd16   :  { %8757 = vmatpush3.msra.mxu0 %v3245_v45 }
 0xd17   :  { %v8755_v62 = vpop.f32.mrf.mxu1  ;;  %8759 = vmatmul.mubr.msk.f32.vlgmr.msra.gmra.mxu0 %vm266_vm2, %v10232_v56  ;;  %8778 = vmatprep.subr.mxu0 %v9523_v22  ;;  %v99_v56 = vld [vmem:[%s11314_s5 + $0x20] sm:$0xff] }
 0xd18   :  { %8779 = vmatpush3.msra.mxu0 %v102_v47  ;;  %8794 = vmatprep.mubr.msk.f32.mxu0 %vm9524_vm1, %v9523_v22 }
 0xd19   :  { %8780 = vmatprep.subr.mxu0 %v9523_v22 }
 0xd1a   :  { %8781 = vmatpush3.msra.mxu0 %v101_v58  ;;  %v10348_v58 = vsub.s32 7, %v9648_v36 }
 0xd1b   :  { %8782 = vmatprep.subr.mxu0 %v9523_v22 }
 0xd1c   :  { %8783 = vmatpush3.msra.mxu0 %v100_v60  ;;  %v3263_v60 = vpop.permute.xlu1 %3262 }
 0xd1d   :  { %v3510_v21 = vpop.f32.mrf.mxu1  ;;  %8784 = vmatprep.subr.mxu0 %v9523_v22 }
 0xd1e   :  { %v3511_v2 = vadd.f32 %v3510_v21, %v3434_v23  ;;  %8785 = vmatpush3.msra.mxu0 %v99_v56 }
 0xd1f   :  { %v8771_v3 = vpop.f32.mrf.mxu1  ;;  %8786 = vmatprep.subr.mxu0 %v9523_v22 }
 0xd20   :  { %v3527_v4 = vmul.f32 0.70710677, %v3511_v2  ;;  %8787 = vmatpush3.msra.mxu0 %v98_v1  ;;  %v3524_v33 = vmul.f32 0.5, %v3511_v2  ;;  %v2018_v1 = vpop.permute.xlu1 %2017 }
 0xd21   :  { %v3515_v5 = vpop.f32.mrf.mxu1  ;;  %8788 = vmatprep.subr.mxu0 %v9523_v22 }
 0xd22   :  { %9289 = verf.f32 %v3527_v4  ;;  %v3516_v9 = vadd.f32 %v3515_v5, %v3434_v23  ;;  %8789 = vmatpush3.msra.mxu0 %v97_v63 }
 0xd23   :  { %v8774_v15 = vpop.f32.mrf.mxu1  ;;  %8790 = vmatprep.subr.mxu0 %v9523_v22 }
 0xd24   :  { %v3528_v20 = vmul.f32 0.70710677, %v3516_v9  ;;  %8791 = vmatpush3.msra.mxu0 %v96_v7  ;;  %v3525_v38 = vmul.f32 0.5, %v3516_v9 }
 0xd25   :  { %v3520_v24 = vpop.f32.mrf.mxu1  ;;  %8792 = vmatprep.subr.mxu0 %v9523_v22 }
 0xd26   :  { %9291 = verf.f32 %v3528_v20  ;;  %v3521_v27 = vadd.f32 %v3520_v24, %v3434_v23  ;;  %8793 = vmatpush3.msra.mxu0 %v95_v19  ;;  %v3542_v23 = vrot.slane %v10063_v0, %v10348_v58  ;;  %v3265_v20 = vsel %vm266_vm2, %v3263_v60, 0.0 }
 0xd27   :  { %v8777_v28 = vpop.f32.mrf.mxu1  ;;  %8831 = vmatprep.subr.mxu0 %v9523_v22 }
 0xd28   :  { %v3529_v29 = vmul.f32 0.70710677, %v3521_v27  ;;  %v3526_v43 = vmul.f32 0.5, %v3521_v27 }
 0xd2a   :  { %9293 = verf.f32 %v3529_v29  ;;  %v2020_v29 = vmul.f32 %v2018_v1, %v10024_v51  ;;  %v9419_v51 = vld [vmem:[%s11315_s6 + $0x10] sm:$0xff] }
 0xd2f   :  { %v9290_v31 = vpop.eup %9289 }
 0xd30   :  { %v3533_v12 = vadd.f32 1.0, %v9290_v31 }
 0xd32   :  { %v3536_v34 = vmul.f32 %v3533_v12, %v3524_v33  ;;  %v2021_v33 = vsel %vm266_vm2, %v2020_v29, 0.0 }
 0xd33   :  { %v9292_v35 = vpop.eup %9291 }
 0xd34   :  { %v3534_v40 = vadd.f32 1.0, %v9292_v35  ;;  %8795 = vmatmul.mubr.msk.f32.vlgmr.msra.gmra.mxu0 %vm3543_vm10, %v3536_v34 }
 0xd35   :  { %8797 = vmatprep.mubr.msk.f32.mxu0 %vm9524_vm1, %v9523_v22 }
 0xd36   :  { %v3537_v41 = vmul.f32 %v3534_v40, %v3525_v38 }
 0xd37   :  { %v9294_v42 = vpop.eup %9293 }
 0xd38   :  { %v3535_v8 = vadd.f32 1.0, %v9294_v42  ;;  %8798 = vmatmul.mubr.msk.f32.gmra.mxu0 %vm3543_vm10, %v3537_v41 }
 0xd39   :  { %8800 = vmatprep.mubr.msk.f32.mxu0 %vm9524_vm1, %v9523_v22 }
 0xd3a   :  { %v3538_v18 = vmul.f32 %v3535_v8, %v3526_v43 }
 0xd3c   :  { %8801 = vmatmul.mubr.msk.f32.gmra.mxu0 %vm3543_vm10, %v3538_v18  ;;  %v9420_v18 = vld [vmem:[%s11315_s6 + $0x8] sm:$0xff] }
 0xd3d   :  { %8837 = vmatprep.mubr.msk.f32.mxu0 %vm9524_vm1, %v9523_v22 }
 0xd53   :  { %v10337_v11 = vpop.f32.mrf.mxu0 }
 0xd55   :  { %v8690_v13 = vpop.f32.mrf.mxu0 }
 0xd57   :  { %v10339_v16 = vpop.f32.mrf.mxu0 }
 0xd59   :  { %v8700_v44 = vpop.f32.mrf.mxu0 }
 0xd5a   :  { %v9421_v44 = vld [vmem:[%s11315_s6 + $0x18] sm:$0xff] }
 0xd5b   :  { %v2303_v46 = vpop.f32.mrf.mxu0 }
 0xd5d   :  { %v8710_v14 = vpop.f32.mrf.mxu0 }
 0xd6d   :  { %v2230_v7 = vpop.xlane.xlu1 %2229 }
 0xd6e   :  { %v2231_v0 = vadd.f32 1e-06, %v2230_v7 }
 0xd70   :  { %9295 = vrcp.f32 %v2231_v0 }
 0xd75   :  { %v3060_v34 = vpop.xlane.xlu1 %3059 }
 0xd76   :  { %v3061_v35 = vadd.f32 1e-06, %v3060_v34 }
 0xd78   :  { %v2437_v28 = vpop.xlane.xlu0 %2436 }
 0xd79   :  { %v2438_v31 = vadd.f32 1e-06, %v2437_v28 }
 0xd7b   :  { %9297 = vrcp.f32 %v2438_v31 }
 0xd7c   :  { %v2645_v12 = vpop.xlane.xlu0 %2644  ;;  %9299 = vrcp.f32 %v3061_v35 }
 0xd7d   :  { %v2646_v38 = vadd.f32 1e-06, %v2645_v12 }
 0xd7f   :  { %9301 = vrcp.f32 %v2646_v38 }
 0xd80   :  { %v2852_v40 = vpop.xlane.xlu0 %2851 }
 0xd81   :  { %v2853_v41 = vadd.f32 1e-06, %v2852_v40  ;;  %v9422_v40 = vld [vmem:[#allocation5] sm:$0xff] }
 0xd83   :  { %9303 = vrcp.f32 %v2853_v41  ;;  %v9423_v41 = vld [vmem:[%s11315_s6] sm:$0xff] }
 0xdc5   :  { %v2510_v25 = vpop.f32.mrf.mxu0 }
 0xdc7   :  { %v8720_v59 = vpop.f32.mrf.mxu0 }
 0xdc9   :  { %v10341_v48 = vpop.f32.mrf.mxu0 }
 0xdcb   :  { %v8730_v50 = vpop.f32.mrf.mxu0 }
 0xdcd   :  { %v10343_v52 = vpop.f32.mrf.mxu0 }
 0xdcf   :  { %v8740_v10 = vpop.f32.mrf.mxu0 }
 0xdd0   :  { %v1819_v10 = vpop.xlane.xlu1 %1818 }
 0xdd3   :  { %v3133_v55 = vpop.f32.mrf.mxu0 }
 0xdd5   :  { %v8750_v45 = vpop.f32.mrf.mxu0 }
 0xdd7   :  { %v10345_v47 = vpop.f32.mrf.mxu0 }
 0xdd9   :  { %v8760_v62 = vpop.f32.mrf.mxu0 }
 0xdda   :  { %v1820_v62 = vadd.f32 1e-06, %v1819_v10 }
 0xddc   :  { %9305 = vrcp.f32 %v1820_v62 }
 0xdf4   :  { %v3619_v56 = vpop.f32.mrf.mxu0 }
 0xdf5   :  { %v3620_v21 = vadd.f32 %v3619_v56, %v3542_v23 }
 0xdf6   :  { %v8796_v2 = vpop.f32.mrf.mxu0 }
 0xdf7   :  { %v10353_v3 = vadd.f32 %v3620_v21, %v10067_v6 }
 0xdf8   :  { %v3624_v63 = vpop.f32.mrf.mxu0 }
 0xdf9   :  { %v3625_v4 = vadd.f32 %v3624_v63, %v3542_v23  ;;  %v3767_v5 = vsel %vm109_vm0, %v10353_v3, 0.0 }
 0xdfa   :  { %3768 = vadd.xlane.f32.xlu0 %v3767_v5  ;;  %v8799_v36 = vpop.f32.mrf.mxu0 }
 0xdfb   :  { %v10358_v9 = vadd.f32 %v3625_v4, %v10072_v26 }
 0xdfc   :  { %v3629_v15 = vpop.f32.mrf.mxu0 }
 0xdfd   :  { %v3630_v19 = vadd.f32 %v3629_v15, %v3542_v23  ;;  %v3770_v6 = vsel %vm109_vm0, %v10358_v9, 0.0 }
 0xdfe   :  { %3266 = vadd.xlane.f32.xlu0 %v3265_v20  ;;  %3771 = vadd.xlane.f32.xlu1 %v3770_v6  ;;  %v8802_v24 = vpop.f32.mrf.mxu0 }
 0xdff   :  { %v10364_v27 = vadd.f32 %v3630_v19, %v10077_v32  ;;  %v9296_v32 = vpop.eup %9295 }
 0xe00   :  { %v2307_v42 = vmul.f32 %v9296_v32, %v2303_v46  ;;  %v9298_v43 = vpop.eup %9297 }
 0xe01   :  { %v3773_v26 = vsel %vm109_vm0, %v10364_v27, 0.0  ;;  %v2514_v8 = vmul.f32 %v9298_v43, %v2510_v25  ;;  %v9300_v13 = vpop.eup %9299 }
 0xe02   :  { %3774 = vadd.xlane.f32.xlu0 %v3773_v26  ;;  %v9302_v46 = vpop.eup %9301  ;;  %v3137_v14 = vmul.f32 %v9300_v13, %v3133_v55 }
 0xe03   :  { %v2722_v59 = vmul.f32 %v9302_v46, %v10341_v48  ;;  %v9304_v25 = vpop.eup %9303 }
 0xe04   :  { %v2929_v50 = vmul.f32 %v9304_v25, %v10343_v52  ;;  %v9306_v29 = vpop.eup %9305 }
 0xe05   :  { %v1895_v31 = vmul.f32 %v9306_v29, %v10337_v11 }
 0xe06   :  { %2022 = vadd.xlane.f32.xlu0 %v2021_v33 }
 0xe0f   :  { %3644 = vrot.lane.b32.xlu1 %v9419_v51, %s9530_s23 }
 0xe13   :  { %3347 = vrot.lane.b32.xlu1 %v2307_v42, %s9521_s19 }
 0xe17   :  { %3349 = vrot.lane.b32.xlu1 %v2514_v8, %s9521_s19 }
 0xe1b   :  { %3642 = vrot.lane.b32.xlu1 %v9420_v18, %s9530_s23 }
 0xe1c   :  { %3646 = vrot.lane.b32.xlu0 %v9421_v44, %s9530_s23 }
 0xe1f   :  { %3363 = vrot.lane.b32.xlu1 %v3137_v14, %s9538_s29 }
 0xe20   :  { %3355 = vrot.lane.b32.xlu0 %v2722_v59, %s9539_s30 }
 0xe24   :  { %3357 = vrot.lane.b32.xlu0 %v2929_v50, %s9539_s30 }
 0xe83   :  { %v3769_v45 = vpop.xlane.xlu0 %3768 }
 0xe84   :  { %v3776_v60 = vmul.f32 0.03125, %v3769_v45 }
 0xe86   :  { %v10390_v23 = vsub.f32 %v10353_v3, %v3776_v60 }
 0xe87   :  { %v3267_v55 = vpop.xlane.xlu0 %3266  ;;  %v3772_v48 = vpop.xlane.xlu1 %3771 }
 0xe88   :  { %v3777_v56 = vmul.f32 0.03125, %v3772_v48  ;;  %v3782_v21 = vmul.f32 %v10390_v23, %v10390_v23  ;;  %v3268_v15 = vadd.f32 1e-06, %v3267_v55 }
 0xe8a   :  { %v10395_v1 = vsub.f32 %v10358_v9, %v3777_v56  ;;  %v3785_v52 = vsel %vm109_vm0, %v3782_v21, 0.0  ;;  %9307 = vrcp.f32 %v3268_v15  ;;  %v9424_v56 = vld [vmem:[#allocation5 + $0x8] sm:$0xff]  ;;  %v10430_v21 = vld [vmem:[%s11313_s4 + $0x70] sm:$0xff] }
 0xe8b   :  { %3786 = vadd.xlane.f32.xlu1 %v3785_v52  ;;  %v3645_v2 = vpop.permute.xlu1 %3644  ;;  %v3775_v63 = vpop.xlane.xlu0 %3774  ;;  %v8107_v52 = vld [vmem:[%s11316_s7 + $0x10] sm:$0xff] }
 0xe8c   :  { %v3778_v4 = vmul.f32 0.03125, %v3775_v63  ;;  %v3783_v5 = vmul.f32 %v10395_v1, %v10395_v1  ;;  %v10450_v63 = vld [vmem:[%s11313_s4 + $0x50] sm:$0xff] }
 0xe8e   :  { %v10401_v7 = vsub.f32 %v10364_v27, %v3778_v4  ;;  %v3788_v36 = vsel %vm109_vm0, %v3783_v5, 0.0  ;;  %v3809_v4 = vrot.slane %v8107_v52, %v9651_v37 }
 0xe8f   :  { %v3348_v0 = vpop.permute.xlu1 %3347  ;;  %3789 = vadd.xlane.f32.xlu0 %v3788_v36  ;;  %v2023_v19 = vpop.xlane.xlu0 %2022  ;;  %v10458_v36 = vld [vmem:[%s11313_s4 + $0x40] sm:$0xff] }
 0xe90   :  { %v3784_v20 = vmul.f32 %v10401_v7, %v10401_v7  ;;  %v3369_v12 = vsel %vm266_vm2, %v1895_v31, %v3348_v0  ;;  %v2024_v42 = vadd.f32 1e-06, %v2023_v19  ;;  %v3816_v0 = vrot.slane %v8107_v52, %v9657_v39 }
 0xe92   :  { %v3791_v6 = vsel %vm109_vm0, %v3784_v20, 0.0  ;;  %9309 = vrcp.f32 %v2024_v42 }
 0xe93   :  { %v3350_v24 = vpop.permute.xlu1 %3349  ;;  %3792 = vadd.xlane.f32.xlu1 %v3791_v6  ;;  %v3647_v28 = vpop.permute.xlu0 %3646 }
 0xe94   :  { %8803 = vmatprep.subr.mxu1 %v3647_v28 }
 0xe95   :  { %8804 = vmatpush3.msra.mxu1 %v3647_v28 }
 0xe96   :  { %8805 = vmatprep.subr.mxu1 %v3645_v2 }
 0xe97   :  { %v3643_v26 = vpop.permute.xlu1 %3642  ;;  %8806 = vmatpush3.msra.mxu1 %v3645_v2  ;;  %v3356_v33 = vpop.permute.xlu0 %3355  ;;  %v10441_v2 = vld [vmem:[%s11313_s4 + $0x60] sm:$0xff] }
 0xe98   :  { %8807 = vmatprep.subr.mxu1 %v3643_v26  ;;  %v3372_v34 = vsel %vm3371_vm11, %v3369_v12, %v3356_v33  ;;  %v9308_v51 = vpop.eup %9307 }
 0xe99   :  { %8808 = vmatpush3.msra.mxu1 %v3643_v26  ;;  %v3344_v11 = vmul.f32 %v9308_v51, %v10345_v47 }
 0xe9b   :  { %v3364_v35 = vpop.permute.xlu1 %3363  ;;  %v3358_v8 = vpop.permute.xlu0 %3357 }
 0xe9c   :  { %v3374_v38 = vsel %vm359_vm3, %v3372_v34, %v3364_v35 }
 0xe9d   :  { %v10411_v32 = vadd.f32 %v9422_v40, %v3374_v38 }
 0xe9f   :  { %8811 = vmatprep.mubr.msk.f32.mxu1 %vm109_vm0, %v10411_v32  ;;  %v9310_v43 = vpop.eup %9309 }
 0xea0   :  { %v2099_v44 = vmul.f32 %v9310_v43, %v10339_v16 }
 0xea2   :  { %v3370_v59 = vsel %vm266_vm2, %v2099_v44, %v3350_v24 }
 0xea3   :  { %v3373_v45 = vsel %vm3371_vm11, %v3370_v59, %v3358_v8 }
 0xea4   :  { %3640 = vrot.lane.b32.xlu1 %v9423_v41, %s9530_s23 }
 0xea5   :  { %3365 = vrot.lane.b32.xlu0 %v3344_v11, %s9538_s29 }
 0xf14   :  { %v3787_v18 = vpop.xlane.xlu1 %3786 }
 0xf15   :  { %v3794_v13 = vmul.f32 0.03125, %v3787_v18 }
 0xf17   :  { %v3797_v46 = vadd.f32 1e-05, %v3794_v13 }
 0xf18   :  { %v3790_v14 = vpop.xlane.xlu0 %3789 }
 0xf19   :  { %9311 = vrsqrt.f32 %v3797_v46  ;;  %v3795_v47 = vmul.f32 0.03125, %v3790_v14 }
 0xf1b   :  { %v3798_v25 = vadd.f32 1e-05, %v3795_v47 }
 0xf1c   :  { %v3793_v50 = vpop.xlane.xlu1 %3792  ;;  %v3366_v10 = vpop.permute.xlu0 %3365 }
 0xf1d   :  { %9313 = vrsqrt.f32 %v3798_v25  ;;  %v3796_v62 = vmul.f32 0.03125, %v3793_v50  ;;  %v3375_v60 = vsel %vm359_vm3, %v3373_v45, %v3366_v10  ;;  %v10539_v10 = vld [vmem:[#allocation7] sm:$0xff] }
 0xf1e   :  { %v10425_v16 = vadd.f32 %v9424_v56, %v3375_v60 }
 0xf1f   :  { %v3799_v55 = vadd.f32 1e-05, %v3796_v62 }
 0xf20   :  { %v3641_v48 = vpop.permute.xlu1 %3640 }
 0xf21   :  { %9315 = vrsqrt.f32 %v3799_v55  ;;  %8809 = vmatprep.subr.mxu1 %v3641_v48 }
 0xf22   :  { %8810 = vmatpush3.msra.mxu1 %v3641_v48  ;;  %v10543_v48 = vld [vmem:[#allocation7 + $0x8] sm:$0xff] }
 0xf23   :  { %8812 = vmatmul.mubr.msk.f32.vlgmr.msra.gmra.mxu1 %vm109_vm0, %v10425_v16  ;;  %8814 = vmatprep.subr.mxu1 %v9523_v22 }
 0xf24   :  { %8815 = vmatpush3.msra.mxu1 %v10430_v21  ;;  %8822 = vmatprep.mubr.msk.f32.mxu1 %vm9524_vm1, %v9523_v22 }
 0xf25   :  { %8816 = vmatprep.subr.mxu1 %v9523_v22 }
 0xf26   :  { %v9312_v5 = vpop.eup %9311  ;;  %8817 = vmatpush3.msra.mxu1 %v10441_v2 }
 0xf27   :  { %8818 = vmatprep.subr.mxu1 %v9523_v22  ;;  %v3803_v15 = vmul.f32 %v9312_v5, %v10390_v23 }
 0xf28   :  { %8819 = vmatpush3.msra.mxu1 %v10450_v63 }
 0xf29   :  { %8820 = vmatprep.subr.mxu1 %v9523_v22  ;;  %v3810_v19 = vmul.f32 %v3809_v4, %v3803_v15  ;;  %v10547_v15 = vld [vmem:[#allocation7 + $0x10] sm:$0xff] }
 0xf2a   :  { %v9314_v20 = vpop.eup %9313  ;;  %8821 = vmatpush3.msra.mxu1 %v10458_v36 }
 0xf2b   :  { %v3817_v6 = vadd.f32 %v3816_v0, %v3810_v19  ;;  %v3804_v24 = vmul.f32 %v9314_v20, %v10395_v1  ;;  %8846 = vmatprep.subr.mxu1 %v9523_v22 }
 0xf2d   :  { %8823 = vmatmul.mubr.msk.f32.vlgmr.msra.gmra.mxu1 %vm109_vm0, %v3817_v6  ;;  %v3811_v28 = vmul.f32 %v3809_v4, %v3804_v24 }
 0xf2e   :  { %v9316_v29 = vpop.eup %9315  ;;  %8825 = vmatprep.mubr.msk.f32.mxu1 %vm9524_vm1, %v9523_v22 }
 0xf2f   :  { %v3818_v23 = vadd.f32 %v3816_v0, %v3811_v28  ;;  %v3805_v26 = vmul.f32 %v9316_v29, %v10401_v7  ;;  %v3823_v7 = vrot.slane %v8107_v52, %v9671_v54 }
 0xf31   :  { %8826 = vmatmul.mubr.msk.f32.gmra.mxu1 %vm109_vm0, %v3818_v23  ;;  %v3812_v31 = vmul.f32 %v3809_v4, %v3805_v26 }
 0xf32   :  { %8828 = vmatprep.mubr.msk.f32.mxu1 %vm9524_vm1, %v9523_v22 }
 0xf33   :  { %v3819_v33 = vadd.f32 %v3816_v0, %v3812_v31 }
 0xf35   :  { %8829 = vmatmul.mubr.msk.f32.gmra.mxu1 %vm109_vm0, %v3819_v33 }
 0xf36   :  { %8852 = vmatprep.mubr.msk.f32.mxu1 %vm9524_vm1, %v9523_v22 }
 0xfe3   :  { %v10477_v1 = vpop.f32.mrf.mxu1 }
 0xfe5   :  { %v10479_v12 = vpop.f32.mrf.mxu1 }
 0xfed   :  { %v3899_v34 = vpop.f32.mrf.mxu1 }
 0xfee   :  { %v10492_v43 = vadd.f32 %v3899_v34, %v3823_v7 }
 0xfef   :  { %v8824_v35 = vpop.f32.mrf.mxu1 }
 0xff1   :  { %v3904_v38 = vpop.f32.mrf.mxu1 }
 0xff2   :  { %v10482_v40 = vadd.f32 %v3904_v38, %v3823_v7 }
 0xff3   :  { %v8827_v51 = vpop.f32.mrf.mxu1 }
 0xff4   :  { %3918 = vrot.lane.b32.xlu1 %v10482_v40, %s9525_s17 }
 0xff5   :  { %v3909_v11 = vpop.f32.mrf.mxu1 }
 0xff6   :  { %v10486_v41 = vadd.f32 %v3909_v11, %v3823_v7 }
 0xff7   :  { %v8830_v42 = vpop.f32.mrf.mxu1 }
 0xff8   :  { %4155 = vrot.lane.b32.xlu1 %v10486_v41, %s9526_s18  ;;  %3920 = vrot.lane.b32.xlu0 %v10486_v41, %s9525_s17 }
 0xffc   :  { %4151 = vrot.lane.b32.xlu1 %v10492_v43, %s9526_s18  ;;  %3916 = vrot.lane.b32.xlu0 %v10492_v43, %s9525_s17 }
0x1000   :  { %4147 = vrot.lane.b32.xlu1 %v10482_v40, %s9527_s20  ;;  %4153 = vrot.lane.b32.xlu0 %v10482_v40, %s9526_s18 }
0x1004   :  { %4145 = vrot.lane.b32.xlu0 %v10492_v43, %s9527_s20 }
0x1008   :  { %4149 = vrot.lane.b32.xlu0 %v10486_v41, %s9527_s20 }
0x1066   :  { %v3919_v18 = vpop.permute.xlu1 %3918 }
0x106a   :  { %v3921_v8 = vpop.permute.xlu0 %3920  ;;  %v4156_v44 = vpop.permute.xlu1 %4155 }
0x106b   :  { %8832 = vmatpush3.xpose.msk.msra.mxu0 %vm266_vm2, %v3921_v8 }
0x106c   :  { %8833 = vmatprep.subr.mxu0 %v9523_v22 }
0x106e   :  { %v3917_v13 = vpop.permute.xlu0 %3916  ;;  %v4152_v14 = vpop.permute.xlu1 %4151 }
0x106f   :  { %8834 = vmatpush3.xpose.msk.msra.mxu0 %vm266_vm2, %v3919_v18 }
0x1070   :  { %8835 = vmatprep.subr.mxu0 %v9523_v22 }
0x1072   :  { %v4154_v46 = vpop.permute.xlu0 %4153  ;;  %v4148_v59 = vpop.permute.xlu1 %4147 }
0x1073   :  { %8836 = vmatpush3.xpose.msk.msra.mxu0 %vm266_vm2, %v3917_v13 }
0x1074   :  { %8861 = vmatprep.subr.mxu0 %v9523_v22 }
0x1076   :  { %8838 = vmatmul.mubr.msk.f32.vlgmr.msra.gmra.mxu0 %vm266_vm2, %v10492_v43  ;;  %v4146_v47 = vpop.permute.xlu0 %4145 }
0x1077   :  { %8862 = vmatpush3.xpose.msk.msra.mxu0 %vm266_vm2, %v4156_v44  ;;  %8840 = vmatprep.mubr.msk.f32.mxu0 %vm9524_vm1, %v9523_v22 }
0x1078   :  { %8863 = vmatprep.subr.mxu0 %v9523_v22 }
0x107a   :  { %8841 = vmatmul.mubr.msk.f32.gmra.mxu0 %vm266_vm2, %v10482_v40  ;;  %v4150_v25 = vpop.permute.xlu0 %4149 }
0x107b   :  { %8864 = vmatpush3.xpose.msk.msra.mxu0 %vm266_vm2, %v4154_v46  ;;  %8843 = vmatprep.mubr.msk.f32.mxu0 %vm9524_vm1, %v9523_v22 }
0x107c   :  { %8865 = vmatprep.subr.mxu0 %v9523_v22 }
0x107e   :  { %8844 = vmatmul.mubr.msk.f32.gmra.mxu0 %vm266_vm2, %v10486_v41 }
0x107f   :  { %8866 = vmatpush3.xpose.msk.msra.mxu0 %vm266_vm2, %v4152_v14  ;;  %8867 = vmatprep.mubr.msk.f32.mxu0 %vm9524_vm1, %v9523_v22 }
0x1080   :  { %8891 = vmatprep.subr.mxu0 %v9523_v22 }
0x1082   :  { %8868 = vmatmul.mubr.msk.f32.vlgmr.msra.gmra.mxu0 %vm266_vm2, %v4146_v47 }
0x1083   :  { %8870 = vmatprep.mubr.msk.f32.mxu0 %vm9524_vm1, %v9523_v22 }
0x1086   :  { %8871 = vmatmul.mubr.msk.f32.gmra.mxu0 %vm266_vm2, %v4148_v59 }
0x1087   :  { %8873 = vmatprep.mubr.msk.f32.mxu0 %vm9524_vm1, %v9523_v22 }
0x108a   :  { %8874 = vmatmul.mubr.msk.f32.gmra.mxu0 %vm266_vm2, %v4150_v25 }
0x108b   :  { %8893 = vmatprep.mubr.msk.f32.mxu0 %vm9524_vm1, %v9523_v22 }
0x1136   :  { %v4000_v50 = vpop.f32.mrf.mxu0 }
0x1137   :  { %v4001_v45 = vadd.f32 %v10539_v10, %v4000_v50 }
0x1138   :  { %v8839_v62 = vpop.f32.mrf.mxu0 }
0x1139   :  { %v4014_v60 = vsel %vm359_vm3, %v4001_v45, -inf }
0x113a   :  { %4015 = vmax.xlane.f32.xlu1 %v4014_v60  ;;  %v4005_v55 = vpop.f32.mrf.mxu0 }
0x113b   :  { %v4006_v56 = vadd.f32 %v10543_v48, %v4005_v55 }
0x113c   :  { %v8842_v52 = vpop.f32.mrf.mxu0 }
0x113d   :  { %v4017_v4 = vsel %vm359_vm3, %v4006_v56, -inf }
0x113e   :  { %4018 = vmax.xlane.f32.xlu0 %v4017_v4  ;;  %v4010_v5 = vpop.f32.mrf.mxu0 }
0x113f   :  { %v4011_v0 = vadd.f32 %v10547_v15, %v4010_v5 }
0x1140   :  { %v8845_v19 = vpop.f32.mrf.mxu0 }
0x1141   :  { %v4020_v20 = vsel %vm359_vm3, %v4011_v0, -inf }
0x1142   :  { %4021 = vmax.xlane.f32.xlu0 %v4020_v20  ;;  %v4235_v6 = vpop.f32.mrf.mxu0 }
0x1143   :  { %v4236_v24 = vadd.f32 %v10539_v10, %v4235_v6 }
0x1144   :  { %v8869_v28 = vpop.f32.mrf.mxu0 }
0x1145   :  { %v4249_v29 = vsel %vm359_vm3, %v4236_v24, -inf }
0x1146   :  { %4250 = vmax.xlane.f32.xlu0 %v4249_v29  ;;  %v4240_v23 = vpop.f32.mrf.mxu0 }
0x1147   :  { %v4241_v26 = vadd.f32 %v10543_v48, %v4240_v23 }
0x1148   :  { %v8872_v31 = vpop.f32.mrf.mxu0 }
0x1149   :  { %v4252_v33 = vsel %vm359_vm3, %v4241_v26, -inf }
0x114a   :  { %4253 = vmax.xlane.f32.xlu1 %v4252_v33  ;;  %v4245_v34 = vpop.f32.mrf.mxu0 }
0x114b   :  { %v4246_v35 = vadd.f32 %v10547_v15, %v4245_v34 }
0x114c   :  { %v8875_v7 = vpop.f32.mrf.mxu0 }
0x114d   :  { %v4255_v38 = vsel %vm359_vm3, %v4246_v35, -inf }
0x114e   :  { %4256 = vmax.xlane.f32.xlu0 %v4255_v38 }
0x115b   :  { %4051 = vrot.lane.b32.xlu1 %v10486_v41, %s9528_s21 }
0x115f   :  { %4047 = vrot.lane.b32.xlu1 %v10492_v43, %s9528_s21 }
0x1163   :  { %4286 = vrot.lane.b32.xlu1 %v10486_v41, %s9529_s22 }
0x1164   :  { %4049 = vrot.lane.b32.xlu0 %v10482_v40, %s9528_s21 }
0x11c3   :  { %v4016_v51 = vpop.xlane.xlu1 %4015 }
0x11c4   :  { %v4023_v11 = vsub.f32 %v4001_v45, %v4016_v51 }
0x11c6   :  { %v4026_v42 = vmul.f32 1.442695, %v4023_v11 }
0x11c7   :  { %v4019_v8 = vpop.xlane.xlu0 %4018 }
0x11c8   :  { %9317 = vpow2.f32 %v4026_v42  ;;  %v4024_v18 = vsub.f32 %v4006_v56, %v4019_v8 }
0x11ca   :  { %v4028_v13 = vmul.f32 1.442695, %v4024_v18 }
0x11cb   :  { %v4022_v44 = vpop.xlane.xlu0 %4021 }
0x11cc   :  { %9319 = vpow2.f32 %v4028_v13  ;;  %v4025_v46 = vsub.f32 %v4011_v0, %v4022_v44 }
0x11ce   :  { %v4030_v14 = vmul.f32 1.442695, %v4025_v46 }
0x11cf   :  { %v4251_v47 = vpop.xlane.xlu0 %4250 }
0x11d0   :  { %9321 = vpow2.f32 %v4030_v14  ;;  %v4258_v59 = vsub.f32 %v4236_v24, %v4251_v47 }
0x11d2   :  { %v4261_v25 = vmul.f32 1.442695, %v4258_v59 }
0x11d3   :  { %v4254_v50 = vpop.xlane.xlu1 %4253 }
0x11d4   :  { %9323 = vpow2.f32 %v4261_v25  ;;  %v4259_v62 = vsub.f32 %v4241_v26, %v4254_v50 }
0x11d5   :  { %v9318_v60 = vpop.eup %9317 }
0x11d6   :  { %v4263_v55 = vmul.f32 1.442695, %v4259_v62  ;;  %v4032_v45 = vsel %vm359_vm3, %v9318_v60, 0.0 }
0x11d7   :  { %4033 = vadd.xlane.f32.xlu1 %v4032_v45  ;;  %v4052_v52 = vpop.permute.xlu1 %4051  ;;  %v4257_v4 = vpop.xlane.xlu0 %4256 }
0x11d8   :  { %9325 = vpow2.f32 %v4263_v55  ;;  %v4260_v56 = vsub.f32 %v4246_v35, %v4257_v4  ;;  %8847 = vmatpush3.msra.mxu1 %v4052_v52 }
0x11d9   :  { %v9320_v5 = vpop.eup %9319  ;;  %8848 = vmatprep.subr.mxu1 %v9523_v22 }
0x11da   :  { %v4265_v0 = vmul.f32 1.442695, %v4260_v56  ;;  %v4035_v19 = vsel %vm359_vm3, %v9320_v5, 0.0 }
0x11db   :  { %4036 = vadd.xlane.f32.xlu0 %v4035_v19  ;;  %v4050_v20 = vpop.permute.xlu0 %4049  ;;  %v4048_v24 = vpop.permute.xlu1 %4047 }
0x11dc   :  { %9327 = vpow2.f32 %v4265_v0  ;;  %8849 = vmatpush3.msra.mxu1 %v4050_v20 }
0x11dd   :  { %v9322_v6 = vpop.eup %9321  ;;  %8850 = vmatprep.subr.mxu1 %v9523_v22 }
0x11de   :  { %8851 = vmatpush3.msra.mxu1 %v4048_v24  ;;  %v4038_v28 = vsel %vm359_vm3, %v9322_v6, 0.0 }
0x11df   :  { %4039 = vadd.xlane.f32.xlu1 %v4038_v28  ;;  %8876 = vmatprep.subr.mxu1 %v9523_v22 }
0x11e1   :  { %v9324_v29 = vpop.eup %9323 }
0x11e2   :  { %v4267_v23 = vsel %vm359_vm3, %v9324_v29, 0.0 }
0x11e3   :  { %4268 = vadd.xlane.f32.xlu0 %v4267_v23 }
0x11e5   :  { %v9326_v26 = vpop.eup %9325 }
0x11e6   :  { %v4270_v31 = vsel %vm359_vm3, %v9326_v26, 0.0 }
0x11e7   :  { %4271 = vadd.xlane.f32.xlu1 %v4270_v31 }
0x11e9   :  { %v9328_v33 = vpop.eup %9327 }
0x11ea   :  { %v4273_v34 = vsel %vm359_vm3, %v9328_v33, 0.0 }
0x11eb   :  { %4274 = vadd.xlane.f32.xlu0 %v4273_v34 }
0x11f8   :  { %4284 = vrot.lane.b32.xlu1 %v10482_v40, %s9529_s22 }
0x11fc   :  { %4381 = vrot.lane.b32.xlu1 %v10450_v63, %s9530_s23  ;;  %v4287_v63 = vpop.permute.xlu1 %4286 }
0x1200   :  { %4574 = vrot.lane.b32.xlu1 %v10482_v40, %s9531_s24 }
0x1201   :  { %4282 = vrot.lane.b32.xlu0 %v10492_v43, %s9529_s22 }
0x1204   :  { %4566 = vrot.lane.b32.xlu1 %v10492_v43, %s9532_s25 }
0x1205   :  { %4576 = vrot.lane.b32.xlu0 %v10486_v41, %s9531_s24 }
0x1208   :  { %4570 = vrot.lane.b32.xlu1 %v10486_v41, %s9532_s25 }
0x1209   :  { %4572 = vrot.lane.b32.xlu0 %v10492_v43, %s9531_s24 }
0x120d   :  { %4568 = vrot.lane.b32.xlu0 %v10482_v40, %s9532_s25 }
0x1260   :  { %v4034_v35 = vpop.xlane.xlu1 %4033 }
0x1261   :  { %9329 = vrcp.f32 %v4034_v35 }
0x1264   :  { %v4037_v7 = vpop.xlane.xlu0 %4036 }
0x1265   :  { %9331 = vrcp.f32 %v4037_v7 }
0x1268   :  { %v4040_v38 = vpop.xlane.xlu1 %4039 }
0x1269   :  { %9333 = vrcp.f32 %v4040_v38 }
0x126c   :  { %v4269_v51 = vpop.xlane.xlu0 %4268 }
0x126d   :  { %9335 = vrcp.f32 %v4269_v51 }
0x126e   :  { %v9330_v11 = vpop.eup %9329 }
0x126f   :  { %v4044_v42 = vmul.f32 %v9330_v11, %v9318_v60 }
0x1270   :  { %v4272_v8 = vpop.xlane.xlu1 %4271 }
0x1271   :  { %9337 = vrcp.f32 %v4272_v8  ;;  %8853 = vmatmul.mubr.msk.f32.vlgmr.msra.gmra.mxu1 %vm359_vm3, %v4044_v42 }
0x1272   :  { %v9332_v18 = vpop.eup %9331  ;;  %8877 = vmatpush3.msra.mxu1 %v4287_v63  ;;  %8855 = vmatprep.mubr.msk.f32.mxu1 %vm9524_vm1, %v9523_v22 }
0x1273   :  { %8878 = vmatprep.subr.mxu1 %v9523_v22  ;;  %v4045_v13 = vmul.f32 %v9332_v18, %v9320_v5 }
0x1274   :  { %v4285_v44 = vpop.permute.xlu1 %4284  ;;  %v4275_v46 = vpop.xlane.xlu0 %4274 }
0x1275   :  { %9339 = vrcp.f32 %v4275_v46  ;;  %8856 = vmatmul.mubr.msk.f32.gmra.mxu1 %vm359_vm3, %v4045_v13 }
0x1276   :  { %v9334_v14 = vpop.eup %9333  ;;  %8879 = vmatpush3.msra.mxu1 %v4285_v44  ;;  %8858 = vmatprep.mubr.msk.f32.mxu1 %vm9524_vm1, %v9523_v22 }
0x1277   :  { %8880 = vmatprep.subr.mxu1 %v9523_v22  ;;  %v4046_v47 = vmul.f32 %v9334_v14, %v9322_v6 }
0x1278   :  { %v4382_v59 = vpop.permute.xlu1 %4381  ;;  %v4283_v25 = vpop.permute.xlu0 %4282 }
0x1279   :  { %8859 = vmatmul.mubr.msk.f32.gmra.mxu1 %vm359_vm3, %v4046_v47  ;;  %8892 = vmatpush3.msra.mxu0 %v4382_v59 }
0x127a   :  { %v9336_v50 = vpop.eup %9335  ;;  %8881 = vmatpush3.msra.mxu1 %v4283_v25  ;;  %8882 = vmatprep.mubr.msk.f32.mxu1 %vm9524_vm1, %v9523_v22 }
0x127b   :  { %v4279_v62 = vmul.f32 %v9336_v50, %v9324_v29  ;;  %8913 = vmatprep.subr.mxu0 %v9523_v22  ;;  %8902 = vmatprep.subr.mxu1 %v9523_v22 }
0x127c   :  { %v4577_v24 = vpop.permute.xlu0 %4576  ;;  %v4575_v23 = vpop.permute.xlu1 %4574 }
0x127d   :  { %8883 = vmatmul.mubr.msk.f32.vlgmr.msra.gmra.mxu1 %vm359_vm3, %v4279_v62 }
0x127e   :  { %v9338_v60 = vpop.eup %9337  ;;  %8885 = vmatprep.mubr.msk.f32.mxu1 %vm9524_vm1, %v9523_v22 }
0x127f   :  { %v4280_v55 = vmul.f32 %v9338_v60, %v9326_v26 }
0x1280   :  { %v4567_v63 = vpop.permute.xlu1 %4566 }
0x1281   :  { %8886 = vmatmul.mubr.msk.f32.gmra.mxu1 %vm359_vm3, %v4280_v55 }
0x1282   :  { %v9340_v45 = vpop.eup %9339  ;;  %8888 = vmatprep.mubr.msk.f32.mxu1 %vm9524_vm1, %v9523_v22 }
0x1283   :  { %v4281_v52 = vmul.f32 %v9340_v45, %v9328_v33  ;;  %v4573_v33 = vpop.permute.xlu0 %4572 }
0x1284   :  { %v4571_v7 = vpop.permute.xlu1 %4570 }
0x1285   :  { %8889 = vmatmul.mubr.msk.f32.gmra.mxu1 %vm359_vm3, %v4281_v52 }
0x1286   :  { %8904 = vmatprep.mubr.msk.f32.mxu1 %vm9524_vm1, %v9523_v22 }
0x1287   :  { %v4569_v35 = vpop.permute.xlu0 %4568 }
0x1331   :  { %v10614_v4 = vpop.f32.mrf.mxu1 }
0x1333   :  { %v8854_v56 = vpop.f32.mrf.mxu1 }
0x1335   :  { %v10616_v5 = vpop.f32.mrf.mxu1 }
0x1337   :  { %v8857_v0 = vpop.f32.mrf.mxu1 }
0x1339   :  { %v10618_v19 = vpop.f32.mrf.mxu1 }
0x133b   :  { %v8860_v20 = vpop.f32.mrf.mxu1 }
0x133d   :  { %v4366_v6 = vpop.f32.mrf.mxu1 }
0x133e   :  { %8894 = vmatmul.mubr.msk.f32.vlgmr.msra.gmra.mxu0 %vm266_vm2, %v4366_v6 }
0x133f   :  { %8914 = vmatpush3.xpose.msk.msra.mxu0 %vm266_vm2, %v4577_v24  ;;  %v8884_v28 = vpop.f32.mrf.mxu1  ;;  %8896 = vmatprep.mubr.msk.f32.mxu0 %vm9524_vm1, %v9523_v22 }
0x1340   :  { %8915 = vmatprep.subr.mxu0 %v9523_v22 }
0x1341   :  { %v4371_v29 = vpop.f32.mrf.mxu1 }
0x1342   :  { %8897 = vmatmul.mubr.msk.f32.gmra.mxu0 %vm266_vm2, %v4371_v29 }
0x1343   :  { %8916 = vmatpush3.xpose.msk.msra.mxu0 %vm266_vm2, %v4575_v23  ;;  %v8887_v26 = vpop.f32.mrf.mxu1  ;;  %8899 = vmatprep.mubr.msk.f32.mxu0 %vm9524_vm1, %v9523_v22 }
0x1344   :  { %8917 = vmatprep.subr.mxu0 %v9523_v22 }
0x1345   :  { %v4376_v31 = vpop.f32.mrf.mxu1 }
0x1346   :  { %8900 = vmatmul.mubr.msk.f32.gmra.mxu0 %vm266_vm2, %v4376_v31 }
0x1347   :  { %8918 = vmatpush3.xpose.msk.msra.mxu0 %vm266_vm2, %v4573_v33  ;;  %v8890_v34 = vpop.f32.mrf.mxu1  ;;  %8919 = vmatprep.mubr.msk.f32.mxu0 %vm9524_vm1, %v9523_v22 }
0x1348   :  { %8943 = vmatprep.subr.mxu0 %v9523_v22 }
0x134a   :  { %8920 = vmatmul.mubr.msk.f32.vlgmr.msra.gmra.mxu0 %vm266_vm2, %v4567_v63 }
0x134b   :  { %8922 = vmatprep.mubr.msk.f32.mxu0 %vm9524_vm1, %v9523_v22 }
0x134e   :  { %8923 = vmatmul.mubr.msk.f32.gmra.mxu0 %vm266_vm2, %v4569_v35 }
0x134f   :  { %8925 = vmatprep.mubr.msk.f32.mxu0 %vm9524_vm1, %v9523_v22 }
0x1352   :  { %8926 = vmatmul.mubr.msk.f32.gmra.mxu0 %vm266_vm2, %v4571_v7 }
0x1353   :  { %8945 = vmatprep.mubr.msk.f32.mxu0 %vm9524_vm1, %v9523_v22 }
0x13fe   :  { %v10644_v38 = vpop.f32.mrf.mxu0 }
0x1400   :  { %v8895_v51 = vpop.f32.mrf.mxu0 }
0x1402   :  { %v10646_v11 = vpop.f32.mrf.mxu0 }
0x1404   :  { %v8898_v42 = vpop.f32.mrf.mxu0 }
0x1406   :  { %v10648_v8 = vpop.f32.mrf.mxu0 }
0x1408   :  { %v8901_v18 = vpop.f32.mrf.mxu0 }
0x140a   :  { %v4656_v13 = vpop.f32.mrf.mxu0 }
0x140b   :  { %v4657_v44 = vadd.f32 %v10539_v10, %v4656_v13 }
0x140c   :  { %v8921_v46 = vpop.f32.mrf.mxu0 }
0x140d   :  { %v4670_v14 = vsel %vm359_vm3, %v4657_v44, -inf }
0x140e   :  { %4671 = vmax.xlane.f32.xlu0 %v4670_v14  ;;  %v4661_v47 = vpop.f32.mrf.mxu0 }
0x140f   :  { %v4662_v59 = vadd.f32 %v10543_v48, %v4661_v47 }
0x1410   :  { %v8924_v25 = vpop.f32.mrf.mxu0 }
0x1411   :  { %v4673_v50 = vsel %vm359_vm3, %v4662_v59, -inf }
0x1412   :  { %4674 = vmax.xlane.f32.xlu1 %v4673_v50  ;;  %v4666_v62 = vpop.f32.mrf.mxu0 }
0x1413   :  { %v4667_v60 = vadd.f32 %v10547_v15, %v4666_v62 }
0x1414   :  { %v8927_v55 = vpop.f32.mrf.mxu0 }
0x1415   :  { %v4676_v45 = vsel %vm359_vm3, %v4667_v60, -inf }
0x1416   :  { %4677 = vmax.xlane.f32.xlu0 %v4676_v45 }
0x1423   :  { %4707 = vrot.lane.b32.xlu1 %v10486_v41, %s9533_s26 }
0x1427   :  { %4705 = vrot.lane.b32.xlu1 %v10482_v40, %s9533_s26 }
0x142b   :  { %4703 = vrot.lane.b32.xlu1 %v10492_v43, %s9533_s26 }
0x142c   :  { %4474 = vrot.lane.b32.xlu0 %v10458_v36, %s9530_s23 }
0x142f   :  { %4905 = vrot.lane.b32.xlu1 %v10482_v40, %s9534_s27 }
0x1497   :  { %v4672_v52 = vpop.xlane.xlu0 %4671 }
0x1498   :  { %v4679_v56 = vsub.f32 %v4657_v44, %v4672_v52 }
0x149a   :  { %v4682_v0 = vmul.f32 1.442695, %v4679_v56 }
0x149b   :  { %v4675_v20 = vpop.xlane.xlu1 %4674 }
0x149c   :  { %9341 = vpow2.f32 %v4682_v0  ;;  %v4680_v6 = vsub.f32 %v4662_v59, %v4675_v20 }
0x149e   :  { %v4684_v24 = vmul.f32 1.442695, %v4680_v6 }
0x149f   :  { %v4708_v28 = vpop.permute.xlu1 %4707  ;;  %v4678_v29 = vpop.xlane.xlu0 %4677 }
0x14a0   :  { %9343 = vpow2.f32 %v4684_v24  ;;  %v4681_v23 = vsub.f32 %v4667_v60, %v4678_v29 }
0x14a2   :  { %v4686_v26 = vmul.f32 1.442695, %v4681_v23 }
0x14a3   :  { %v4706_v31 = vpop.permute.xlu1 %4705  ;;  %v4475_v33 = vpop.permute.xlu0 %4474 }
0x14a4   :  { %9345 = vpow2.f32 %v4686_v26  ;;  %8903 = vmatpush3.msra.mxu1 %v4475_v33 }
0x14a5   :  { %8905 = vmatmul.mubr.msk.f32.vlgmr.msra.gmra.mxu1 %vm266_vm2, %v10614_v4  ;;  %8928 = vmatprep.subr.mxu1 %v9523_v22 }
0x14a6   :  { %8929 = vmatpush3.msra.mxu1 %v4708_v28  ;;  %8907 = vmatprep.mubr.msk.f32.mxu1 %vm9524_vm1, %v9523_v22 }
0x14a7   :  { %8930 = vmatprep.subr.mxu1 %v9523_v22  ;;  %v4704_v34 = vpop.permute.xlu1 %4703 }
0x14a8   :  { %8931 = vmatpush3.msra.mxu1 %v4706_v31 }
0x14a9   :  { %v9342_v36 = vpop.eup %9341  ;;  %8908 = vmatmul.mubr.msk.f32.gmra.mxu1 %vm266_vm2, %v10616_v5  ;;  %8932 = vmatprep.subr.mxu1 %v9523_v22 }
0x14aa   :  { %8933 = vmatpush3.msra.mxu1 %v4704_v34  ;;  %v4688_v63 = vsel %vm359_vm3, %v9342_v36, 0.0  ;;  %8910 = vmatprep.mubr.msk.f32.mxu1 %vm9524_vm1, %v9523_v22 }
0x14ab   :  { %4689 = vadd.xlane.f32.xlu0 %v4688_v63  ;;  %8954 = vmatprep.subr.mxu1 %v9523_v22  ;;  %v4906_v51 = vpop.permute.xlu1 %4905 }
0x14ad   :  { %v9344_v4 = vpop.eup %9343  ;;  %8911 = vmatmul.mubr.msk.f32.gmra.mxu1 %vm266_vm2, %v10618_v19 }
0x14ae   :  { %v4691_v35 = vsel %vm359_vm3, %v9344_v4, 0.0  ;;  %8934 = vmatprep.mubr.msk.f32.mxu1 %vm9524_vm1, %v9523_v22 }
0x14af   :  { %4692 = vadd.xlane.f32.xlu0 %v4691_v35 }
0x14b1   :  { %v9346_v5 = vpop.eup %9345 }
0x14b2   :  { %v4694_v7 = vsel %vm359_vm3, %v9346_v5, 0.0 }
0x14b3   :  { %4695 = vadd.xlane.f32.xlu1 %v4694_v7 }
0x14c4   :  { %4897 = vrot.lane.b32.xlu1 %v10492_v43, %s9535_s1 }
0x14c5   :  { %4907 = vrot.lane.b32.xlu0 %v10486_v41, %s9534_s27 }
0x14c8   :  { %4901 = vrot.lane.b32.xlu1 %v10486_v41, %s9535_s1 }
0x14c9   :  { %4903 = vrot.lane.b32.xlu0 %v10492_v43, %s9534_s27 }
0x14cd   :  { %4899 = vrot.lane.b32.xlu0 %v10482_v40, %s9535_s1 }
0x1534   :  { %v4690_v19 = vpop.xlane.xlu0 %4689 }
0x1535   :  { %9347 = vrcp.f32 %v4690_v19 }
0x1538   :  { %v4693_v42 = vpop.xlane.xlu0 %4692 }
0x1539   :  { %9349 = vrcp.f32 %v4693_v42 }
0x153c   :  { %v4696_v18 = vpop.xlane.xlu1 %4695  ;;  %v4908_v46 = vpop.permute.xlu0 %4907 }
0x153d   :  { %9351 = vrcp.f32 %v4696_v18 }
0x1540   :  { %v4904_v50 = vpop.permute.xlu0 %4903  ;;  %v4898_v62 = vpop.permute.xlu1 %4897 }
0x1542   :  { %v9348_v13 = vpop.eup %9347 }
0x1543   :  { %v4700_v44 = vmul.f32 %v9348_v13, %v9342_v36 }
0x1544   :  { %v4900_v60 = vpop.permute.xlu0 %4899  ;;  %v4902_v55 = vpop.permute.xlu1 %4901 }
0x1545   :  { %8935 = vmatmul.mubr.msk.f32.vlgmr.msra.gmra.mxu1 %vm359_vm3, %v4700_v44 }
0x1546   :  { %v9350_v14 = vpop.eup %9349  ;;  %8955 = vmatpush3.xpose.msk.msra.mxu1 %vm266_vm2, %v4908_v46  ;;  %8937 = vmatprep.mubr.msk.f32.mxu1 %vm9524_vm1, %v9523_v22 }
0x1547   :  { %8956 = vmatprep.subr.mxu1 %v9523_v22  ;;  %v4701_v47 = vmul.f32 %v9350_v14, %v9344_v4 }
0x1549   :  { %8938 = vmatmul.mubr.msk.f32.gmra.mxu1 %vm359_vm3, %v4701_v47 }
0x154a   :  { %v9352_v59 = vpop.eup %9351  ;;  %8957 = vmatpush3.xpose.msk.msra.mxu1 %vm266_vm2, %v4906_v51  ;;  %8940 = vmatprep.mubr.msk.f32.mxu1 %vm9524_vm1, %v9523_v22 }
0x154b   :  { %8958 = vmatprep.subr.mxu1 %v9523_v22  ;;  %v4702_v25 = vmul.f32 %v9352_v59, %v9346_v5 }
0x154d   :  { %8941 = vmatmul.mubr.msk.f32.gmra.mxu1 %vm359_vm3, %v4702_v25 }
0x154e   :  { %8959 = vmatpush3.xpose.msk.msra.mxu1 %vm266_vm2, %v4904_v50  ;;  %8960 = vmatprep.mubr.msk.f32.mxu1 %vm9524_vm1, %v9523_v22 }
0x154f   :  { %8984 = vmatprep.subr.mxu1 %v9523_v22 }
0x1551   :  { %8961 = vmatmul.mubr.msk.f32.vlgmr.msra.gmra.mxu1 %vm266_vm2, %v4898_v62 }
0x1552   :  { %8963 = vmatprep.mubr.msk.f32.mxu1 %vm9524_vm1, %v9523_v22 }
0x1555   :  { %8964 = vmatmul.mubr.msk.f32.gmra.mxu1 %vm266_vm2, %v4900_v60 }
0x1556   :  { %8966 = vmatprep.mubr.msk.f32.mxu1 %vm9524_vm1, %v9523_v22 }
0x1559   :  { %8967 = vmatmul.mubr.msk.f32.gmra.mxu1 %vm266_vm2, %v4902_v55 }
0x155a   :  { %8986 = vmatprep.mubr.msk.f32.mxu1 %vm9524_vm1, %v9523_v22 }
0x1565   :  { %v10719_v45 = vpop.f32.mrf.mxu1 }
0x1567   :  { %v8906_v52 = vpop.f32.mrf.mxu1 }
0x1569   :  { %v10721_v56 = vpop.f32.mrf.mxu1 }
0x156b   :  { %v8909_v0 = vpop.f32.mrf.mxu1 }
0x156d   :  { %v10723_v20 = vpop.f32.mrf.mxu1 }
0x156f   :  { %v8912_v6 = vpop.f32.mrf.mxu1 }
0x1605   :  { %v4787_v24 = vpop.f32.mrf.mxu1 }
0x1607   :  { %v8936_v28 = vpop.f32.mrf.mxu1 }
0x1609   :  { %v10725_v29 = vpop.f32.mrf.mxu1 }
0x160b   :  { %v8939_v23 = vpop.f32.mrf.mxu1 }
0x160d   :  { %v10727_v26 = vpop.f32.mrf.mxu1 }
0x160f   :  { %v8942_v31 = vpop.f32.mrf.mxu1 }
0x1611   :  { %v4987_v33 = vpop.f32.mrf.mxu1 }
0x1612   :  { %v4988_v36 = vadd.f32 %v10539_v10, %v4987_v33 }
0x1613   :  { %v8962_v34 = vpop.f32.mrf.mxu1 }
0x1614   :  { %v5001_v63 = vsel %vm359_vm3, %v4988_v36, -inf  ;;  %v3733_v34 = vadd.f32 %v10479_v12, %v10411_v32  ;;  %v3734_v32 = vadd.f32 %v10477_v1, %v10425_v16  ;;  %v4553_v1 = vadd.f32 %v10719_v45, %v10644_v38 }
0x1615   :  { %5002 = vmax.xlane.f32.xlu0 %v5001_v63  ;;  %v4992_v4 = vpop.f32.mrf.mxu1  ;;  %v8103_v63 = vld [vmem:[%s11315_s6 + $0x20] sm:$0xff] }
0x1616   :  { %v4993_v35 = vadd.f32 %v10543_v48, %v4992_v4  ;;  %v9428_v4 = vld [vmem:[%s11316_s7 + $0x8] sm:$0x3] }
0x1617   :  { %v8965_v5 = vpop.f32.mrf.mxu1 }
0x1618   :  { %v5004_v7 = vsel %vm359_vm3, %v4993_v35, -inf }
0x1619   :  { %5005 = vmax.xlane.f32.xlu1 %v5004_v7  ;;  %v4997_v19 = vpop.f32.mrf.mxu1 }
0x161a   :  { %v4998_v51 = vadd.f32 %v10547_v15, %v4997_v19 }
0x161b   :  { %v8968_v42 = vpop.f32.mrf.mxu1 }
0x161c   :  { %v5007_v18 = vsel %vm359_vm3, %v4998_v51, -inf }
0x161d   :  { %5008 = vmax.xlane.f32.xlu0 %v5007_v18  ;;  %v4558_v18 = vadd.f32 %v10721_v56, %v10646_v11 }
0x162a   :  { %5038 = vrot.lane.b32.xlu1 %v10486_v41, %s9536_s28 }
0x162e   :  { %5036 = vrot.lane.b32.xlu1 %v10482_v40, %s9536_s28 }
0x169e   :  { %v5003_v10 = vpop.xlane.xlu0 %5002 }
0x169f   :  { %v5010_v13 = vsub.f32 %v4988_v36, %v5003_v10 }
0x16a1   :  { %v5013_v48 = vmul.f32 1.442695, %v5010_v13 }
0x16a2   :  { %v5006_v44 = vpop.xlane.xlu1 %5005 }
0x16a3   :  { %9353 = vpow2.f32 %v5013_v48  ;;  %v5011_v46 = vsub.f32 %v4993_v35, %v5006_v44  ;;  %v3738_v35 = vrot.slane %v9428_v4, %v9657_v39  ;;  %v4563_v44 = vadd.f32 %v10723_v20, %v10648_v8  ;;  %v8108_v8 = vld [vmem:[%s11316_s7 + $0x18] sm:$0x3] }
0x16a4   :  { %v5241_v20 = vrot.slane %v8108_v8, %v9651_v37 }
0x16a5   :  { %v5015_v14 = vmul.f32 1.442695, %v5011_v46  ;;  %v10800_v5 = vadd.f32 %v3738_v35, %v3733_v34  ;;  %v10806_v7 = vadd.f32 %v3738_v35, %v3734_v32 }
0x16a6   :  { %v5009_v47 = vpop.xlane.xlu0 %5008  ;;  %v5039_v55 = vpop.permute.xlu1 %5038 }
0x16a7   :  { %9355 = vpow2.f32 %v5015_v14  ;;  %v5012_v15 = vsub.f32 %v4998_v51, %v5009_v47 }
0x16a9   :  { %v5017_v59 = vmul.f32 1.442695, %v5012_v15 }
0x16aa   :  { %v5037_v0 = vpop.permute.xlu1 %5036 }
0x16ab   :  { %9357 = vpow2.f32 %v5017_v59 }
0x16b0   :  { %v9354_v25 = vpop.eup %9353 }
0x16b1   :  { %v5019_v50 = vsel %vm359_vm3, %v9354_v25, 0.0 }
0x16b2   :  { %5020 = vadd.xlane.f32.xlu0 %v5019_v50 }
0x16b4   :  { %v9356_v41 = vpop.eup %9355 }
0x16b5   :  { %v5022_v62 = vsel %vm359_vm3, %v9356_v41, 0.0 }
0x16b6   :  { %5023 = vadd.xlane.f32.xlu0 %v5022_v62 }
0x16b8   :  { %v9358_v40 = vpop.eup %9357 }
0x16b9   :  { %v5025_v60 = vsel %vm359_vm3, %v9358_v40, 0.0 }
0x16ba   :  { %5026 = vadd.xlane.f32.xlu1 %v5025_v60 }
0x16cb   :  { %5034 = vrot.lane.b32.xlu1 %v10492_v43, %s9536_s28 }
0x16cc   :  { %4802 = vrot.lane.b32.xlu0 %v10441_v2, %s9530_s23 }
0x16d0   :  { %5133 = vrot.lane.b32.xlu0 %v10430_v21, %s9530_s23  ;;  %v10756_v21 = vld [vmem:[%s11315_s6 + $0x38] sm:$0xff] }
0x173b   :  { %v5021_v52 = vpop.xlane.xlu0 %5020 }
0x173c   :  { %9359 = vrcp.f32 %v5021_v52 }
0x173f   :  { %v5024_v6 = vpop.xlane.xlu0 %5023 }
0x1740   :  { %9361 = vrcp.f32 %v5024_v6 }
0x1743   :  { %v5027_v28 = vpop.xlane.xlu1 %5026  ;;  %v4803_v23 = vpop.permute.xlu0 %4802 }
0x1744   :  { %8944 = vmatpush3.msra.mxu0 %v4803_v23  ;;  %9363 = vrcp.f32 %v5027_v28 }
0x1745   :  { %8946 = vmatmul.mubr.msk.f32.vlgmr.msra.gmra.mxu0 %vm266_vm2, %v4787_v24  ;;  %8969 = vmatprep.subr.mxu0 %v9523_v22 }
0x1746   :  { %8970 = vmatpush3.msra.mxu0 %v5039_v55  ;;  %8948 = vmatprep.mubr.msk.f32.mxu0 %vm9524_vm1, %v9523_v22 }
0x1747   :  { %8971 = vmatprep.subr.mxu0 %v9523_v22  ;;  %v5035_v2 = vpop.permute.xlu1 %5034  ;;  %v5134_v16 = vpop.permute.xlu0 %5133 }
0x1748   :  { %8972 = vmatpush3.msra.mxu0 %v5037_v0  ;;  %8985 = vmatpush3.msra.mxu1 %v5134_v16 }
0x1749   :  { %8949 = vmatmul.mubr.msk.f32.gmra.mxu0 %vm266_vm2, %v10725_v29  ;;  %8973 = vmatprep.subr.mxu0 %v9523_v22  ;;  %v9360_v43 = vpop.eup %9359  ;;  %v10771_v29 = vld [vmem:[%s11315_s6 + $0x30] sm:$0xff] }
0x174a   :  { %8974 = vmatpush3.msra.mxu0 %v5035_v2  ;;  %8951 = vmatprep.mubr.msk.f32.mxu0 %vm9524_vm1, %v9523_v22  ;;  %v5031_v24 = vmul.f32 %v9360_v43, %v9354_v25 }
0x174b   :  { %8995 = vmatprep.subr.mxu0 %v10756_v21  ;;  %9016 = vmatprep.subr.mxu1 %v9523_v22 }
0x174d   :  { %8952 = vmatmul.mubr.msk.f32.gmra.mxu0 %vm266_vm2, %v10727_v26  ;;  %v9362_v31 = vpop.eup %9361  ;;  %v10780_v26 = vld [vmem:[%s11315_s6 + $0x28] sm:$0xff] }
0x174e   :  { %8975 = vmatprep.mubr.msk.f32.mxu0 %vm9524_vm1, %v9523_v22  ;;  %v5032_v33 = vmul.f32 %v9362_v31, %v9356_v41 }
0x1751   :  { %8976 = vmatmul.mubr.msk.f32.vlgmr.msra.gmra.mxu0 %vm359_vm3, %v5031_v24  ;;  %v9364_v36 = vpop.eup %9363 }
0x1752   :  { %8978 = vmatprep.mubr.msk.f32.mxu0 %vm9524_vm1, %v9523_v22  ;;  %8996 = vmatpush3.msra.mxu0 %v10756_v21  ;;  %v5033_v12 = vmul.f32 %v9364_v36, %v9358_v40 }
0x1753   :  { %8997 = vmatprep.subr.mxu0 %v10771_v29 }
0x1754   :  { %8998 = vmatpush3.msra.mxu0 %v10771_v29 }
0x1755   :  { %8979 = vmatmul.mubr.msk.f32.gmra.mxu0 %vm359_vm3, %v5032_v33  ;;  %8999 = vmatprep.subr.mxu0 %v10780_v26 }
0x1756   :  { %8981 = vmatprep.mubr.msk.f32.mxu0 %vm9524_vm1, %v9523_v22  ;;  %9000 = vmatpush3.msra.mxu0 %v10780_v26 }
0x1757   :  { %9001 = vmatprep.subr.mxu0 %v8103_v63 }
0x1758   :  { %9002 = vmatpush3.msra.mxu0 %v8103_v63 }
0x1759   :  { %8982 = vmatmul.mubr.msk.f32.gmra.mxu0 %vm359_vm3, %v5033_v12  ;;  %9006 = vmatprep.subr.mxu0 %v9523_v22 }
0x175a   :  { %9003 = vmatprep.mubr.msk.f32.mxu0 %vm109_vm0, %v10800_v5 }
0x175d   :  { %9004 = vmatmul.mubr.msk.f32.vlgmr.msra.gmra.mxu0 %vm109_vm0, %v10806_v7 }
0x175e   :  { %9008 = vmatprep.mubr.msk.f32.mxu0 %vm9524_vm1, %v9523_v22 }
0x1805   :  { %v4880_v19 = vpop.f32.mrf.mxu0 }
0x1806   :  { %v10815_v51 = vadd.f32 %v4880_v19, %v4553_v1 }
0x1807   :  { %v8947_v42 = vpop.f32.mrf.mxu0 }
0x1809   :  { %v4885_v10 = vpop.f32.mrf.mxu0 }
0x180a   :  { %v10819_v13 = vadd.f32 %v4885_v10, %v4558_v18 }
0x180b   :  { %v8950_v48 = vpop.f32.mrf.mxu0 }
0x180d   :  { %v4890_v46 = vpop.f32.mrf.mxu0 }
0x180e   :  { %v10823_v14 = vadd.f32 %v4890_v46, %v4563_v44  ;;  %v10883_v46 = vld [vmem:[%s11316_s7 + $0x10] sm:$0xff] }
0x180f   :  { %v8953_v47 = vpop.f32.mrf.mxu0 }
0x1810   :  { %v5234_v47 = vrot.slane %v10883_v46, %v10058_v61 }
0x1811   :  { %v5118_v15 = vpop.f32.mrf.mxu0 }
0x1812   :  { %8987 = vmatmul.mubr.msk.f32.vlgmr.msra.gmra.mxu1 %vm266_vm2, %v5118_v15 }
0x1813   :  { %v8977_v38 = vpop.f32.mrf.mxu0  ;;  %8989 = vmatprep.mubr.msk.f32.mxu1 %vm9524_vm1, %v9523_v22 }
0x1815   :  { %v5123_v45 = vpop.f32.mrf.mxu0 }
0x1816   :  { %8990 = vmatmul.mubr.msk.f32.gmra.mxu1 %vm266_vm2, %v5123_v45 }
0x1817   :  { %v8980_v11 = vpop.f32.mrf.mxu0  ;;  %8992 = vmatprep.mubr.msk.f32.mxu1 %vm9524_vm1, %v9523_v22 }
0x1819   :  { %v5128_v56 = vpop.f32.mrf.mxu0 }
0x181a   :  { %8993 = vmatmul.mubr.msk.f32.gmra.mxu1 %vm266_vm2, %v5128_v56 }
0x181b   :  { %v8983_v59 = vpop.f32.mrf.mxu0  ;;  %9018 = vmatprep.mubr.msk.f32.mxu1 %vm9524_vm1, %v9523_v22 }
0x181d   :  { %v9005_v25 = vpop.f32.mrf.mxu0 }
0x181e   :  { %v5320_v50 = vadd.f32 %v9005_v25, %v5241_v20 }
0x181f   :  { %v5314_v41 = vpop.f32.mrf.mxu0 }
0x1820   :  { %v5329_v62 = vmul.f32 1.442695, %v5320_v50  ;;  %v5315_v40 = vadd.f32 %v5314_v41, %v5241_v20  ;;  %v5326_v55 = vadd.f32 1.0, %v5320_v50  ;;  %vm5324_vm12 = vcmp.gt.f32.partialorder %v5320_v50, 0.0 }
0x1822   :  { %9365 = vpow2.f32 %v5329_v62  ;;  %v5327_v60 = vmul.f32 1.442695, %v5315_v40  ;;  %5372 = vrot.lane.b32.xlu1 %v5315_v40, %s9528_s21  ;;  %v5325_v6 = vadd.f32 1.0, %v5315_v40  ;;  %vm5323_vm13 = vcmp.gt.f32.partialorder %v5315_v40, 0.0 }
0x1824   :  { %9367 = vpow2.f32 %v5327_v60 }
0x1826   :  { %5778 = vrot.lane.b32.xlu1 %v5315_v40, %s9529_s22 }
0x182f   :  { %v9366_v52 = vpop.eup %9365 }
0x1830   :  { %v10840_v0 = vsel %vm5324_vm12, %v5326_v55, %v9366_v52 }
0x1831   :  { %v9368_v28 = vpop.eup %9367  ;;  %v10844_v23 = vmul.f32 %v10840_v0, %v10020_v49 }
0x1832   :  { %v10846_v2 = vsel %vm5323_vm13, %v5325_v6, %v9368_v28 }
0x1833   :  { %5540 = vrot.lane.b32.xlu0 %v10844_v23, %s9525_s17  ;;  %v10852_v43 = vmul.f32 %v10846_v2, %v10031_v53 }
0x1835   :  { %5336 = vrot.lane.b32.xlu1 %v10852_v43, %s9525_s17 }
0x1837   :  { %5576 = vrot.lane.b32.xlu0 %v5320_v50, %s9528_s21 }
0x1839   :  { %6192 = vrot.lane.b32.xlu1 %v5315_v40, %s9533_s26 }
0x183b   :  { %5950 = vrot.lane.b32.xlu0 %v10844_v23, %s9526_s18 }
0x183d   :  { %5743 = vrot.lane.b32.xlu1 %v10852_v43, %s9526_s18 }
0x183f   :  { %5985 = vrot.lane.b32.xlu0 %v5320_v50, %s9529_s22 }
0x1841   :  { %6606 = vrot.lane.b32.xlu1 %v5315_v40, %s9536_s28 }
0x1843   :  { %6364 = vrot.lane.b32.xlu0 %v10844_v23, %s9531_s24 }
0x1845   :  { %6157 = vrot.lane.b32.xlu1 %v10852_v43, %s9531_s24  ;;  %s9540_s24 = smov [#allocation8]  }
0x1847   :  { %6778 = vrot.lane.b32.xlu0 %v10844_v23, %s9534_s27 }
0x1849   :  { %6571 = vrot.lane.b32.xlu1 %v10852_v43, %s9534_s27 }
0x184b   :  { %6399 = vrot.lane.b32.xlu0 %v5320_v50, %s9533_s26  ;;  %s8000_s26 = sshll.u32 %s9540_s24, 4  ;;  %s8001_s26 = int_to_ptr.vmem [resolvable:$true] %s8000_s26 }
0x184c   :  { %s9492_s27 = scalar_lea.vmem %s8001_s26, 32  ;;  %p9497_p2 = scmp.lt.s32.totalorder %s8001_s26, %s8001_s26 }
0x184d   :  { %6813 = vrot.lane.b32.xlu1 %v5320_v50, %s9536_s28  ;;  %p9493_p1 = scmp.ne.s32.totalorder %s8001_s26, %s9492_s27  ;;  %p9498_p3 = scmp.lt.s32.totalorder %s9492_s27, %s9492_s27 }
0x184f   :  { %p9499_p4 = por %p9498_p3, %p9497_p2 }
0x1851   :  { %p9500_p5 = pnand %p9499_p4, %p9493_p1 }
0x1894   :  { %v5373_v49 = vpop.permute.xlu1 %5372 }
0x1895   :  { %9007 = vmatpush3.msra.mxu0 %v5373_v49 }
0x1896   :  { %9011 = vmatprep.subr.mxu0 %v9523_v22 }
0x1898   :  { %v5779_v53 = vpop.permute.xlu1 %5778 }
0x18a5   :  { %v5541_v24 = vpop.permute.xlu0 %5540 }
0x18a6   :  { %5543 = vxpose.xlu1.b32.start.end [1/1] (short) (narrow) %v5541_v24, 8 }
0x18a7   :  { %v5337_v31 = vpop.permute.xlu1 %5336 }
0x18a8   :  { %5339 = vxpose.xlu0.b32.start.end [1/1] (short) (narrow) %v5337_v31, 8 }
0x18a9   :  { %v5577_v33 = vpop.permute.xlu0 %5576 }
0x18aa   :  { %9017 = vmatpush3.msra.mxu1 %v5577_v33 }
0x18ab   :  { %v6193_v36 = vpop.permute.xlu1 %6192  ;;  %9026 = vmatprep.subr.mxu1 %v9523_v22 }
0x18ad   :  { %v5951_v34 = vpop.permute.xlu0 %5950 }
0x18af   :  { %v5744_v63 = vpop.permute.xlu1 %5743 }
0x18b0   :  { %5746 = vxpose.xlu0.b32.start.end [1/1] (short) (narrow) %v5744_v63, 8  ;;  %v6061_v63 = vsel %vm2211_vm6, %v10844_v23, 0.0 }
0x18b1   :  { %v5986_v4 = vpop.permute.xlu0 %5985 }
0x18b3   :  { %v10876_v35 = vpop.permute.xlu1 %6606 }
0x18b4   :  { %5953 = vxpose.xlu0.b32.start.end [1/1] (short) (narrow) %v5951_v34, 8 }
0x18b5   :  { %v6365_v32 = vpop.permute.xlu0 %6364 }
0x18b7   :  { %v6158_v12 = vpop.permute.xlu1 %6157 }
0x18b8   :  { %6160 = vxpose.xlu0.b32.start.end [1/1] (short) (narrow) %v6158_v12, 8  ;;  %v5854_v12 = vsel %vm2211_vm6, %v10852_v43, 0.0 }
0x18b9   :  { %v6779_v16 = vpop.permute.xlu0 %6778 }
0x18ba   :  { %6781 = vxpose.xlu1.b32.start.end [1/1] (short) (narrow) %v6779_v16, 8 }
0x18bb   :  { %v6572_v1 = vpop.permute.xlu1 %6571 }
0x18bc   :  { %6367 = vxpose.xlu0.b32.start.end [1/1] (short) (narrow) %v6365_v32, 8  ;;  %v6062_v32 = vrot.slane %v6061_v63, 4 }
0x18c0   :  { %6574 = vxpose.xlu0.b32.start.end [1/1] (short) (narrow) %v6572_v1, 8  ;;  %v6889_v1 = vsel %vm3041_vm8, %v10844_v23, 0.0 }
0x18d2   :  { %v5211_v19 = vpop.f32.mrf.mxu1 }
0x18d4   :  { %v8988_v42 = vpop.f32.mrf.mxu1 }
0x18d5   :  { %v5855_v42 = vrot.slane %v5854_v12, 4 }
0x18d6   :  { %v5216_v18 = vpop.f32.mrf.mxu1 }
0x18d7   :  { %v5226_v10 = vadd.f32 %v5216_v18, %v10819_v13  ;;  %v5225_v13 = vadd.f32 %v5211_v19, %v10815_v51  ;;  %v6063_v18 = vadd.f32 %v6062_v32, %v6061_v63 }
0x18d8   :  { %v8991_v48 = vpop.f32.mrf.mxu1 }
0x18d9   :  { %v5229_v44 = vadd.f32 %v5226_v10, %v10358_v9  ;;  %v5228_v20 = vadd.f32 %v5225_v13, %v10353_v3  ;;  %v6814_v3 = vpop.permute.xlu1 %6813  ;;  %v6890_v10 = vrot.slane %v6889_v1, 4  ;;  %v6268_v48 = vsel %vm2626_vm7, %v10852_v43, 0.0 }
0x18da   :  { %v5221_v15 = vpop.f32.mrf.mxu1  ;;  %v6475_v13 = vsel %vm2626_vm7, %v10844_v23, 0.0 }
0x18db   :  { %v5227_v38 = vadd.f32 %v5221_v15, %v10823_v14  ;;  %v10888_v45 = vadd.f32 %v5234_v47, %v5229_v44  ;;  %v10899_v14 = vadd.f32 %v5234_v47, %v5228_v20  ;;  %v5856_v15 = vadd.f32 %v5855_v42, %v5854_v12 }
0x18dc   :  { %v8994_v11 = vpop.f32.mrf.mxu1 }
0x18dd   :  { %v5230_v8 = vadd.f32 %v5227_v38, %v10364_v27  ;;  %v7020_v9 = vsel %vm109_vm0, %v10888_v45, 0.0  ;;  %v7017_v25 = vsel %vm109_vm0, %v10899_v14, 0.0  ;;  %v6400_v27 = vpop.permute.xlu0 %6399  ;;  %v6269_v38 = vrot.slane %v6268_v48, 4 }
0x18de   :  { %v6064_v11 = vrot.slane %v6063_v18, 2 }
0x18df   :  { %v10892_v56 = vadd.f32 %v5234_v47, %v5230_v8  ;;  %v6891_v8 = vadd.f32 %v6890_v10, %v6889_v1  ;;  %v6270_v20 = vadd.f32 %v6269_v38, %v6268_v48  ;;  %v8092_v10 = vld [vmem:[%s11313_s4 + $0x68] sm:$0xff]  ;;  %v8090_v48 = vld [vmem:[%s11313_s4 + $0x58] sm:$0xff] }
0x18e1   :  { %7021 = vadd.xlane.f32.xlu1 %v7020_v9  ;;  %v7023_v59 = vsel %vm109_vm0, %v10892_v56, 0.0  ;;  %v5857_v9 = vrot.slane %v5856_v15, 2 }
0x18e5   :  { %7024 = vadd.xlane.f32.xlu1 %v7023_v59  ;;  %v6476_v59 = vrot.slane %v6475_v13, 4 }
0x18ed   :  { %7018 = vadd.xlane.f32.xlu0 %v7017_v25  ;;  %v6065_v25 = vadd.f32 %v6064_v11, %v6063_v18  ;;  %v8094_v18 = vld [vmem:[%s11313_s4 + $0x78] sm:$0xff] }
0x18f6   :  { %6082 = vrot.lane.b32.xlu1 %v10840_v0, %s9527_s20 }
0x18fa   :  { %6289 = vrot.lane.b32.xlu1 %v10846_v2, %s9532_s25 }
0x18fe   :  { %6496 = vrot.lane.b32.xlu1 %v10840_v0, %s9532_s25 }
0x1903   :  { %5875 = vrot.lane.b32.xlu0 %v10846_v2, %s9527_s20 }
0x1907   :  { %6703 = vrot.lane.b32.xlu0 %v10846_v2, %s9535_s1 }
0x190b   :  { %6910 = vrot.lane.b32.xlu0 %v10840_v0, %s9535_s1 }
0x1922   :  { %v5559_v51 = vpop.trf.xlu1 }
0x1923   :  { %9019 = vmatmul.mubr.msk.f32.vlgmr.msra.gmra.mxu1 %vm266_vm2, %v5559_v51  ;;  %v5858_v51 = vadd.f32 %v5857_v9, %v5856_v15 }
0x1924   :  { %9027 = vmatpush3.msra.mxu1 %v5779_v53  ;;  %v5355_v50 = vpop.trf.xlu0  ;;  %9028 = vmatprep.mubr.msk.f32.mxu1 %vm9524_vm1, %v9523_v22 }
0x1925   :  { %9009 = vmatmul.mubr.msk.f32.vlgmr.msra.gmra.mxu0 %vm266_vm2, %v5355_v50  ;;  %9036 = vmatprep.subr.mxu1 %v9523_v22  ;;  %v6271_v50 = vrot.slane %v6270_v20, 2 }
0x1926   :  { %9013 = vmatprep.mubr.msk.f32.mxu0 %vm9524_vm1, %v9523_v22 }
0x192c   :  { %v5762_v41 = vpop.trf.xlu0 }
0x192d   :  { %9029 = vmatmul.mubr.msk.f32.vlgmr.msra.gmra.mxu1 %vm266_vm2, %v5762_v41  ;;  %v6477_v41 = vadd.f32 %v6476_v59, %v6475_v13 }
0x192e   :  { %9037 = vmatpush3.msra.mxu1 %v5986_v4  ;;  %9038 = vmatprep.mubr.msk.f32.mxu1 %vm9524_vm1, %v9523_v22 }
0x192f   :  { %9046 = vmatprep.subr.mxu1 %v9523_v22 }
0x1930   :  { %v5969_v62 = vpop.trf.xlu0 }
0x1931   :  { %9039 = vmatmul.mubr.msk.f32.vlgmr.msra.gmra.mxu1 %vm266_vm2, %v5969_v62 }
0x1932   :  { %9047 = vmatpush3.msra.mxu1 %v6193_v36  ;;  %9048 = vmatprep.mubr.msk.f32.mxu1 %vm9524_vm1, %v9523_v22 }
0x1933   :  { %9056 = vmatprep.subr.mxu1 %v9523_v22 }
0x1934   :  { %v6176_v40 = vpop.trf.xlu0 }
0x1935   :  { %9049 = vmatmul.mubr.msk.f32.vlgmr.msra.gmra.mxu1 %vm266_vm2, %v6176_v40  ;;  %v6066_v40 = vrot.slane %v6065_v25, 1 }
0x1936   :  { %9057 = vmatpush3.msra.mxu1 %v6400_v27  ;;  %9058 = vmatprep.mubr.msk.f32.mxu1 %vm9524_vm1, %v9523_v22  ;;  %v6797_v52 = vpop.trf.xlu1  ;;  %v6682_v27 = vsel %vm3041_vm8, %v10852_v43, 0.0 }
0x1937   :  { %9066 = vmatprep.subr.mxu1 %v9523_v22  ;;  %v6683_v62 = vrot.slane %v6682_v27, 4 }
0x1938   :  { %v6383_v60 = vpop.trf.xlu0 }
0x1939   :  { %9059 = vmatmul.mubr.msk.f32.vlgmr.msra.gmra.mxu1 %vm266_vm2, %v6383_v60 }
0x193a   :  { %9067 = vmatpush3.msra.mxu1 %v10876_v35  ;;  %9068 = vmatprep.mubr.msk.f32.mxu1 %vm9524_vm1, %v9523_v22 }
0x193b   :  { %9076 = vmatprep.subr.mxu1 %v9523_v22 }
0x193c   :  { %v6590_v55 = vpop.trf.xlu0 }
0x193d   :  { %9069 = vmatmul.mubr.msk.f32.vlgmr.msra.gmra.mxu1 %vm266_vm2, %v6590_v55  ;;  %v5859_v55 = vrot.slane %v5858_v51, 1 }
0x193e   :  { %9077 = vmatpush3.msra.mxu1 %v6814_v3  ;;  %9078 = vmatprep.mubr.msk.f32.mxu1 %vm9524_vm1, %v9523_v22  ;;  %v6892_v3 = vrot.slane %v6891_v8, 2 }
0x193f   :  { %9086 = vmatprep.subr.mxu1 %v9523_v22 }
0x1940   :  { %v6893_v60 = vadd.f32 %v6892_v3, %v6891_v8 }
0x1941   :  { %9079 = vmatmul.mubr.msk.f32.vlgmr.msra.gmra.mxu1 %vm266_vm2, %v6797_v52  ;;  %v6272_v52 = vadd.f32 %v6271_v50, %v6270_v20 }
0x1942   :  { %9094 = vmatprep.mubr.msk.f32.mxu1 %vm9524_vm1, %v9523_v22  ;;  %9087 = vmatpush3.msra.mxu1 %v8094_v18 }
0x1943   :  { %9088 = vmatprep.subr.mxu1 %v9523_v22 }
0x1944   :  { %9089 = vmatpush3.msra.mxu1 %v8092_v10 }
0x1945   :  { %9090 = vmatprep.subr.mxu1 %v9523_v22 }
0x1946   :  { %9091 = vmatpush3.msra.mxu1 %v8090_v48 }
0x1947   :  { %9092 = vmatprep.subr.mxu1 %v9523_v22 }
0x196a   :  { %v7022_v6 = vpop.xlane.xlu1 %7021 }
0x196b   :  { %v7027_v28 = vmul.f32 0.03125, %v7022_v6  ;;  %v6478_v6 = vrot.slane %v6477_v41, 2 }
0x196d   :  { %v10947_v49 = vsub.f32 %v10888_v45, %v7027_v28  ;;  %v6684_v28 = vadd.f32 %v6683_v62, %v6682_v27 }
0x196e   :  { %v7025_v53 = vpop.xlane.xlu1 %7024 }
0x196f   :  { %v7028_v24 = vmul.f32 0.03125, %v7025_v53  ;;  %v7033_v31 = vmul.f32 %v10947_v49, %v10947_v49  ;;  %v6067_v53 = vadd.f32 %v6066_v40, %v6065_v25  ;;  %v6685_v63 = vrot.slane %v6684_v28, 2 }
0x1971   :  { %v10952_v33 = vsub.f32 %v10892_v56, %v7028_v24  ;;  %v7038_v36 = vsel %vm109_vm0, %v7033_v31, 0.0  ;;  %v6894_v24 = vrot.slane %v6893_v60, 1  ;;  %v5860_v31 = vadd.f32 %v5859_v55, %v5858_v51 }
0x1972   :  { %7039 = vadd.xlane.f32.xlu0 %v7038_v36  ;;  %v6273_v36 = vrot.slane %v6272_v52, 1  ;;  %v6686_v12 = vadd.f32 %v6685_v63, %v6684_v28  ;;  %v6083_v9 = vpop.permute.xlu1 %6082  ;;  %v5652_v63 = vsel %vm1804_vm9, %v10844_v23, 0.0 }
0x1973   :  { %v7034_v34 = vmul.f32 %v10952_v33, %v10952_v33 }
0x1974   :  { %v6687_v1 = vrot.slane %v6686_v12, 1 }
0x1975   :  { %v7041_v4 = vsel %vm109_vm0, %v7034_v34, 0.0  ;;  %v6479_v34 = vadd.f32 %v6478_v6, %v6477_v41 }
0x1976   :  { %v7019_v35 = vpop.xlane.xlu0 %7018  ;;  %7042 = vadd.xlane.f32.xlu0 %v7041_v4  ;;  %v6895_v4 = vadd.f32 %v6894_v24, %v6893_v60  ;;  %v6688_v42 = vadd.f32 %v6687_v1, %v6686_v12  ;;  %v6290_v27 = vpop.permute.xlu1 %6289  ;;  %v5653_v1 = vrot.slane %v5652_v63, 4 }
0x1977   :  { %v7026_v16 = vmul.f32 0.03125, %v7019_v35  ;;  %v6274_v35 = vadd.f32 %v6273_v36, %v6272_v52  ;;  %v6480_v32 = vrot.slane %v6479_v34, 1 }
0x1979   :  { %v10965_v19 = vsub.f32 %v10899_v14, %v7026_v16  ;;  %v6481_v16 = vadd.f32 %v6480_v32, %v6479_v34 }
0x197a   :  { %v5876_v8 = vpop.permute.xlu0 %5875  ;;  %v6497_v40 = vpop.permute.xlu1 %6496 }
0x197b   :  { %v7032_v44 = vmul.f32 %v10965_v19, %v10965_v19 }
0x197d   :  { %v7035_v47 = vsel %vm109_vm0, %v7032_v44, 0.0  ;;  %v8088_v44 = vld [vmem:[%s11313_s4 + $0x48] sm:$0xff] }
0x197e   :  { %7036 = vadd.xlane.f32.xlu1 %v7035_v47  ;;  %9093 = vmatpush3.msra.mxu1 %v8088_v44  ;;  %v6704_v59 = vpop.permute.xlu0 %6703 }
0x1982   :  { %v6911_v50 = vpop.permute.xlu0 %6910 }
0x198c   :  { %6069 = vrot.lane.b32.xlu0 %v6067_v53, %s9525_s17 }
0x198f   :  { %5862 = vrot.lane.b32.xlu1 %v5860_v31, %s9525_s17 }
0x1990   :  { %6897 = vrot.lane.b32.xlu0 %v6895_v4, %s9525_s17  ;;  %v5448_v4 = vsel %vm1804_vm9, %v10852_v43, 0.0 }
0x1993   :  { %6276 = vrot.lane.b32.xlu1 %v6274_v35, %s9525_s17 }
0x1997   :  { %6483 = vrot.lane.b32.xlu1 %v6481_v16, %s9525_s17 }
0x199b   :  { %6690 = vrot.lane.b32.xlu1 %v6688_v42, %s9525_s17  ;;  %v5449_v42 = vrot.slane %v5448_v4, 4 }
0x199d   :  { %v5450_v23 = vadd.f32 %v5449_v42, %v5448_v4  ;;  %v8101_v4 = vld [vmem:[%s11314_s5 + $0x70] sm:$0xff] }
0x19e3   :  { %v5648_v47 = vpop.f32.mrf.mxu1 }
0x19e5   :  { %v5444_v15 = vpop.f32.mrf.mxu0  ;;  %v9020_v38 = vpop.f32.mrf.mxu1 }
0x19e6   :  { %9012 = vmatpush3.msra.mxu0 %v5444_v15 }
0x19e7   :  { %9014 = vmatmul.mubr.msk.f32.vlgmr.msra.gmra.mxu0 %vm266_vm2, %v10846_v2  ;;  %9021 = vmatprep.subr.mxu0 %v9523_v22  ;;  %v9010_v11 = vpop.f32.mrf.mxu0 }
0x19e8   :  { %9022 = vmatpush3.msra.mxu0 %v5648_v47  ;;  %9023 = vmatprep.mubr.msk.f32.mxu0 %vm9524_vm1, %v9523_v22  ;;  %v5654_v47 = vadd.f32 %v5653_v1, %v5652_v63  ;;  %v5451_v11 = vrot.slane %v5450_v23, 2  ;;  %v8096_v1 = vld [vmem:[%s11314_s5 + $0x48] sm:$0xff] }
0x19e9   :  { %9031 = vmatprep.subr.mxu0 %v9523_v22 }
0x19ea   :  { %v5655_v38 = vrot.slane %v5654_v47, 2 }
0x19eb   :  { %9024 = vmatmul.mubr.msk.f32.vlgmr.msra.gmra.mxu0 %vm266_vm2, %v10840_v0 }
0x19ec   :  { %9033 = vmatprep.mubr.msk.f32.mxu0 %vm9524_vm1, %v9523_v22 }
0x19ed   :  { %v5850_v13 = vpop.f32.mrf.mxu1 }
0x19ee   :  { %9032 = vmatpush3.msra.mxu0 %v5850_v13 }
0x19ef   :  { %v9030_v20 = vpop.f32.mrf.mxu1  ;;  %9034 = vmatmul.mubr.msk.f32.vlgmr.msra.gmra.mxu0 %vm266_vm2, %v5876_v8  ;;  %9041 = vmatprep.subr.mxu0 %v9523_v22 }
0x19f0   :  { %9043 = vmatprep.mubr.msk.f32.mxu0 %vm9524_vm1, %v9523_v22  ;;  %v5452_v20 = vadd.f32 %v5451_v11, %v5450_v23 }
0x19f1   :  { %v6057_v25 = vpop.f32.mrf.mxu1 }
0x19f2   :  { %9042 = vmatpush3.msra.mxu0 %v6057_v25 }
0x19f3   :  { %v9040_v3 = vpop.f32.mrf.mxu1  ;;  %9044 = vmatmul.mubr.msk.f32.vlgmr.msra.gmra.mxu0 %vm266_vm2, %v6083_v9  ;;  %9051 = vmatprep.subr.mxu0 %v9523_v22  ;;  %v5656_v9 = vadd.f32 %v5655_v38, %v5654_v47 }
0x19f4   :  { %9053 = vmatprep.mubr.msk.f32.mxu0 %vm9524_vm1, %v9523_v22 }
0x19f5   :  { %v6264_v51 = vpop.f32.mrf.mxu1 }
0x19f6   :  { %9052 = vmatpush3.msra.mxu0 %v6264_v51 }
0x19f7   :  { %v9050_v41 = vpop.f32.mrf.mxu1  ;;  %9054 = vmatmul.mubr.msk.f32.vlgmr.msra.gmra.mxu0 %vm266_vm2, %v6290_v27  ;;  %9061 = vmatprep.subr.mxu0 %v9523_v22 }
0x19f8   :  { %9063 = vmatprep.mubr.msk.f32.mxu0 %vm9524_vm1, %v9523_v22  ;;  %v5453_v41 = vrot.slane %v5452_v20, 1 }
0x19f9   :  { %v6471_v62 = vpop.f32.mrf.mxu1 }
0x19fa   :  { %9062 = vmatpush3.msra.mxu0 %v6471_v62 }
0x19fb   :  { %v9060_v60 = vpop.f32.mrf.mxu1  ;;  %v7040_v55 = vpop.xlane.xlu0 %7039  ;;  %9064 = vmatmul.mubr.msk.f32.vlgmr.msra.gmra.mxu0 %vm266_vm2, %v6497_v40  ;;  %9071 = vmatprep.subr.mxu0 %v9523_v22 }
0x19fc   :  { %9073 = vmatprep.mubr.msk.f32.mxu0 %vm9524_vm1, %v9523_v22  ;;  %v7045_v24 = vmul.f32 0.03125, %v7040_v55  ;;  %v7059_v60 = vrot.slane %v10883_v46, %v10176_v17 }
0x19fd   :  { %v6678_v52 = vpop.f32.mrf.mxu1 }
0x19fe   :  { %9072 = vmatpush3.msra.mxu0 %v6678_v52  ;;  %v7048_v35 = vadd.f32 1e-05, %v7045_v24  ;;  %v7066_v24 = vrot.slane %v10883_v46, %v10189_v30 }
0x19ff   :  { %v9070_v6 = vpop.f32.mrf.mxu1  ;;  %v7043_v28 = vpop.xlane.xlu0 %7042  ;;  %9074 = vmatmul.mubr.msk.f32.vlgmr.msra.gmra.mxu0 %vm266_vm2, %v6704_v59  ;;  %9081 = vmatprep.subr.mxu0 %v9523_v22 }
0x1a00   :  { %9083 = vmatprep.mubr.msk.f32.mxu0 %vm9524_vm1, %v9523_v22  ;;  %v7046_v32 = vmul.f32 0.03125, %v7043_v28  ;;  %9369 = vrsqrt.f32 %v7048_v35  ;;  %v8100_v35 = vld [vmem:[%s11314_s5 + $0x68] sm:$0xff] }
0x1a01   :  { %v6885_v53 = vpop.f32.mrf.mxu1 }
0x1a02   :  { %9082 = vmatpush3.msra.mxu0 %v6885_v53  ;;  %v7049_v18 = vadd.f32 1e-05, %v7046_v32  ;;  %v5454_v53 = vadd.f32 %v5453_v41, %v5452_v20  ;;  %v8099_v32 = vld [vmem:[%s11314_s5 + $0x60] sm:$0xff] }
0x1a03   :  { %v6070_v31 = vpop.permute.xlu0 %6069  ;;  %9084 = vmatmul.mubr.msk.f32.vlgmr.msra.gmra.mxu0 %vm266_vm2, %v6911_v50  ;;  %v9080_v36 = vpop.f32.mrf.mxu1  ;;  %9103 = vmatprep.subr.mxu0 %v9523_v22  ;;  %v5657_v50 = vrot.slane %v5656_v9, 1 }
0x1a04   :  { %v6072_v34 = vmul.f32 %v6070_v31, %v10840_v0  ;;  %9119 = vmatprep.mubr.msk.f32.mxu0 %vm9524_vm1, %v9523_v22 }
0x1a05   :  { %v5658_v28 = vadd.f32 %v5657_v50, %v5656_v9 }
0x1a06   :  { %6074 = vrot.lane.b32.xlu0 %v6072_v34, %s9527_s20 }
0x1a07   :  { %v7037_v12 = vpop.xlane.xlu1 %7036  ;;  %v6898_v59 = vpop.permute.xlu0 %6897 }
0x1a08   :  { %v7044_v16 = vmul.f32 0.03125, %v7037_v12  ;;  %v6900_v27 = vmul.f32 %v6898_v59, %v10840_v0  ;;  %v8098_v12 = vld [vmem:[%s11314_s5 + $0x58] sm:$0xff] }
0x1a0a   :  { %v7047_v10 = vadd.f32 1e-05, %v7044_v16  ;;  %v8097_v16 = vld [vmem:[%s11314_s5 + $0x50] sm:$0xff] }
0x1a0b   :  { %v5863_v48 = vpop.permute.xlu1 %5862 }
0x1a0c   :  { %9371 = vrsqrt.f32 %v7047_v10  ;;  %v5865_v44 = vmul.f32 %v5863_v48, %v10846_v2 }
0x1a0d   :  { %9373 = vrsqrt.f32 %v7049_v18  ;;  %v9370_v25 = vpop.eup %9369  ;;  %v8095_v18 = vld [vmem:[%s11314_s5 + $0x40] sm:$0xff] }
0x1a0e   :  { %5867 = vrot.lane.b32.xlu1 %v5865_v44, %s9527_s20  ;;  %v7054_v40 = vmul.f32 %v9370_v25, %v10947_v49 }
0x1a0f   :  { %v6277_v43 = vpop.permute.xlu1 %6276 }
0x1a10   :  { %v6279_v15 = vmul.f32 %v6277_v43, %v10846_v2  ;;  %v7061_v36 = vmul.f32 %v7059_v60, %v7054_v40 }
0x1a12   :  { %6281 = vrot.lane.b32.xlu1 %v6279_v15, %s9532_s25 }
0x1a13   :  { %v6484_v8 = vpop.permute.xlu1 %6483 }
0x1a14   :  { %v6486_v13 = vmul.f32 %v6484_v8, %v10840_v0 }
0x1a16   :  { %6488 = vrot.lane.b32.xlu0 %v6486_v13, %s9532_s25 }
0x1a17   :  { %v6691_v3 = vpop.permute.xlu1 %6690 }
0x1a18   :  { %v6693_v51 = vmul.f32 %v6691_v3, %v10846_v2 }
0x1a19   :  { %v9372_v62 = vpop.eup %9371 }
0x1a1a   :  { %v7053_v55 = vmul.f32 %v9372_v62, %v10965_v19  ;;  %6902 = vrot.lane.b32.xlu0 %v6900_v27, %s9535_s1  ;;  %6695 = vrot.lane.b32.xlu1 %v6693_v51, %s9535_s1  ;;  %v9374_v52 = vpop.eup %9373  ;;  %v7068_v19 = vadd.f32 %v7066_v24, %v7061_v36 }
0x1a1b   :  { %v7055_v31 = vmul.f32 %v9374_v52, %v10952_v33  ;;  %v8102_v33 = vld [vmem:[%s11314_s5 + $0x78] sm:$0xff] }
0x1a1c   :  { %v7060_v6 = vmul.f32 %v7059_v60, %v7053_v55  ;;  %9104 = vmatpush3.msra.mxu0 %v8102_v33 }
0x1a1d   :  { %v7062_v34 = vmul.f32 %v7059_v60, %v7055_v31  ;;  %9105 = vmatprep.subr.mxu0 %v9523_v22 }
0x1a1e   :  { %5660 = vrot.lane.b32.xlu0 %v5658_v28, %s9525_s17  ;;  %5456 = vrot.lane.b32.xlu1 %v5454_v53, %s9525_s17  ;;  %v7067_v49 = vadd.f32 %v7066_v24, %v7060_v6 }
0x1a1f   :  { %v7069_v63 = vadd.f32 %v7066_v24, %v7062_v34  ;;  %9106 = vmatpush3.msra.mxu0 %v8101_v4  ;;  %v7073_v24 = vrot.slane %v10883_v46, %v10290_v57 }
0x1a20   :  { %9095 = vmatmul.mubr.msk.f32.vlgmr.msra.gmra.mxu1 %vm109_vm0, %v7067_v49  ;;  %9107 = vmatprep.subr.mxu0 %v9523_v22 }
0x1a21   :  { %9097 = vmatprep.mubr.msk.f32.mxu1 %vm9524_vm1, %v9523_v22  ;;  %9108 = vmatpush3.msra.mxu0 %v8100_v35 }
0x1a22   :  { %9109 = vmatprep.subr.mxu0 %v9523_v22 }
0x1a23   :  { %9110 = vmatpush3.msra.mxu0 %v8099_v32 }
0x1a24   :  { %9098 = vmatmul.mubr.msk.f32.gmra.mxu1 %vm109_vm0, %v7068_v19  ;;  %9111 = vmatprep.subr.mxu0 %v9523_v22 }
0x1a25   :  { %9100 = vmatprep.mubr.msk.f32.mxu1 %vm9524_vm1, %v9523_v22  ;;  %9112 = vmatpush3.msra.mxu0 %v8098_v12 }
0x1a26   :  { %9113 = vmatprep.subr.mxu0 %v9523_v22 }
0x1a27   :  { %9114 = vmatpush3.msra.mxu0 %v8097_v16 }
0x1a28   :  { %9101 = vmatmul.mubr.msk.f32.gmra.mxu1 %vm109_vm0, %v7069_v63  ;;  %9115 = vmatprep.subr.mxu0 %v9523_v22 }
0x1a29   :  { %9116 = vmatpush3.msra.mxu0 %v8096_v1 }
0x1a2a   :  { %9117 = vmatprep.subr.mxu0 %v9523_v22 }
0x1a2b   :  { %9118 = vmatpush3.msra.mxu0 %v8095_v18 }
0x1a2c   :  { %9150 = vmatprep.subr.mxu0 %v9523_v22 }
0x1a78   :  { %v6075_v42 = vpop.permute.xlu0 %6074 }
0x1a79   :  { %v6077_v10 = vsel %vm266_vm2, %v6075_v42, 0.0 }
0x1a7a   :  { %6078 = vadd.xlane.f32.xlu0 %v6077_v10 }
0x1a80   :  { %v5868_v48 = vpop.permute.xlu1 %5867 }
0x1a81   :  { %v5870_v44 = vsel %vm266_vm2, %v5868_v48, 0.0 }
0x1a82   :  { %5871 = vadd.xlane.f32.xlu1 %v5870_v44 }
0x1a84   :  { %v6282_v47 = vpop.permute.xlu1 %6281 }
0x1a85   :  { %v6284_v23 = vsel %vm266_vm2, %v6282_v47, 0.0 }
0x1a86   :  { %6285 = vadd.xlane.f32.xlu0 %v6284_v23 }
0x1a88   :  { %v6489_v43 = vpop.permute.xlu0 %6488 }
0x1a89   :  { %v6491_v15 = vsel %vm266_vm2, %v6489_v43, 0.0 }
0x1a8a   :  { %6492 = vadd.xlane.f32.xlu0 %v6491_v15 }
0x1a8c   :  { %v6903_v38 = vpop.permute.xlu0 %6902  ;;  %v6696_v11 = vpop.permute.xlu1 %6695 }
0x1a8d   :  { %v6905_v8 = vsel %vm266_vm2, %v6903_v38, 0.0  ;;  %v6698_v13 = vsel %vm266_vm2, %v6696_v11, 0.0 }
0x1a8e   :  { %6906 = vadd.xlane.f32.xlu0 %v6905_v8  ;;  %6699 = vadd.xlane.f32.xlu1 %v6698_v13 }
0x1a90   :  { %v5661_v9 = vpop.permute.xlu0 %5660  ;;  %v5457_v20 = vpop.permute.xlu1 %5456 }
0x1a91   :  { %v5663_v59 = vmul.f32 %v5661_v9, %v10840_v0  ;;  %v5459_v25 = vmul.f32 %v5457_v20, %v10846_v2 }
0x1a93   :  { %v5664_v3 = vsel %vm266_vm2, %v5663_v59, 0.0  ;;  %v5460_v27 = vsel %vm266_vm2, %v5459_v25, 0.0 }
0x1a94   :  { %5665 = vadd.xlane.f32.xlu0 %v5664_v3  ;;  %5461 = vadd.xlane.f32.xlu1 %v5460_v27 }
0x1aa5   :  { %7284 = vrot.lane.b32.xlu1 %v10756_v21, %s9530_s23 }
0x1aa7   :  { %v11107_v51 = vpop.f32.mrf.mxu0 }
0x1aa9   :  { %v9015_v50 = vpop.f32.mrf.mxu0  ;;  %7282 = vrot.lane.b32.xlu1 %v10771_v29, %s9530_s23 }
0x1aaa   :  { %7280 = vrot.lane.b32.xlu0 %v10780_v26, %s9530_s23 }
0x1aab   :  { %v11113_v0 = vpop.f32.mrf.mxu0 }
0x1aad   :  { %v9025_v2 = vpop.f32.mrf.mxu0 }
0x1aaf   :  { %v11115_v41 = vpop.f32.mrf.mxu0 }
0x1ab1   :  { %v9035_v62 = vpop.f32.mrf.mxu0 }
0x1ab3   :  { %v6152_v40 = vpop.f32.mrf.mxu0 }
0x1ab5   :  { %v9045_v60 = vpop.f32.mrf.mxu0 }
0x1ab7   :  { %v11117_v55 = vpop.f32.mrf.mxu0 }
0x1ab9   :  { %v9055_v21 = vpop.f32.mrf.mxu0 }
0x1abb   :  { %v11119_v52 = vpop.f32.mrf.mxu0 }
0x1abd   :  { %v9065_v6 = vpop.f32.mrf.mxu0 }
0x1abf   :  { %v11121_v28 = vpop.f32.mrf.mxu0 }
0x1ac1   :  { %v9075_v29 = vpop.f32.mrf.mxu0 }
0x1ac3   :  { %v11123_v53 = vpop.f32.mrf.mxu0 }
0x1ac5   :  { %v9085_v26 = vpop.f32.mrf.mxu0 }
0x1ae0   :  { %v7149_v31 = vpop.f32.mrf.mxu1 }
0x1ae1   :  { %v7150_v49 = vadd.f32 %v7149_v31, %v7073_v24 }
0x1ae2   :  { %v9096_v36 = vpop.f32.mrf.mxu1 }
0x1ae3   :  { %v7166_v19 = vmul.f32 0.70710677, %v7150_v49  ;;  %v7163_v42 = vmul.f32 0.5, %v7150_v49 }
0x1ae4   :  { %v7154_v34 = vpop.f32.mrf.mxu1 }
0x1ae5   :  { %9375 = verf.f32 %v7166_v19  ;;  %v7155_v63 = vadd.f32 %v7154_v34, %v7073_v24 }
0x1ae6   :  { %v9099_v33 = vpop.f32.mrf.mxu1 }
0x1ae7   :  { %v7167_v4 = vmul.f32 0.70710677, %v7155_v63  ;;  %v7164_v44 = vmul.f32 0.5, %v7155_v63 }
0x1ae8   :  { %v7159_v35 = vpop.f32.mrf.mxu1 }
0x1ae9   :  { %9377 = verf.f32 %v7167_v4  ;;  %v7160_v32 = vadd.f32 %v7159_v35, %v7073_v24  ;;  %v9430_v35 = vld [vmem:[%s11315_s6 + $0x20] sm:$0xff] }
0x1aea   :  { %v9102_v12 = vpop.f32.mrf.mxu1 }
0x1aeb   :  { %v7168_v16 = vmul.f32 0.70710677, %v7160_v32  ;;  %v7165_v15 = vmul.f32 0.5, %v7160_v32 }
0x1aed   :  { %9379 = verf.f32 %v7168_v16 }
0x1af2   :  { %v9376_v1 = vpop.eup %9375 }
0x1af3   :  { %v7172_v18 = vadd.f32 1.0, %v9376_v1 }
0x1af5   :  { %v7175_v10 = vmul.f32 %v7172_v18, %v7163_v42 }
0x1af6   :  { %v9378_v48 = vpop.eup %9377 }
0x1af7   :  { %v7173_v47 = vadd.f32 1.0, %v9378_v48  ;;  %9120 = vmatmul.mubr.msk.f32.vlgmr.msra.gmra.mxu0 %vm3543_vm10, %v7175_v10 }
0x1af8   :  { %9122 = vmatprep.mubr.msk.f32.mxu0 %vm9524_vm1, %v9523_v22 }
0x1af9   :  { %v7176_v23 = vmul.f32 %v7173_v47, %v7164_v44 }
0x1afa   :  { %v9380_v43 = vpop.eup %9379 }
0x1afb   :  { %v7174_v38 = vadd.f32 1.0, %v9380_v43  ;;  %9123 = vmatmul.mubr.msk.f32.gmra.mxu0 %vm3543_vm10, %v7176_v23 }
0x1afc   :  { %9125 = vmatprep.mubr.msk.f32.mxu0 %vm9524_vm1, %v9523_v22 }
0x1afd   :  { %v7177_v11 = vmul.f32 %v7174_v38, %v7165_v15 }
0x1aff   :  { %9126 = vmatmul.mubr.msk.f32.gmra.mxu0 %vm3543_vm10, %v7177_v11 }
0x1b00   :  { %9158 = vmatprep.mubr.msk.f32.mxu0 %vm9524_vm1, %v9523_v22 }
0x1b03   :  { %v6079_v8 = vpop.xlane.xlu0 %6078 }
0x1b04   :  { %v6080_v13 = vadd.f32 1e-06, %v6079_v8 }
0x1b06   :  { %9381 = vrcp.f32 %v6080_v13 }
0x1b0b   :  { %v5872_v9 = vpop.xlane.xlu1 %5871 }
0x1b0c   :  { %v5873_v20 = vadd.f32 1e-06, %v5872_v9 }
0x1b0e   :  { %9383 = vrcp.f32 %v5873_v20 }
0x1b0f   :  { %v6286_v59 = vpop.xlane.xlu0 %6285 }
0x1b10   :  { %v6287_v25 = vadd.f32 1e-06, %v6286_v59 }
0x1b12   :  { %9385 = vrcp.f32 %v6287_v25 }
0x1b13   :  { %v9382_v3 = vpop.eup %9381  ;;  %v6493_v27 = vpop.xlane.xlu0 %6492 }
0x1b14   :  { %v6494_v50 = vadd.f32 1e-06, %v6493_v27  ;;  %v6156_v2 = vmul.f32 %v9382_v3, %v6152_v40 }
0x1b16   :  { %9387 = vrcp.f32 %v6494_v50  ;;  %6989 = vrot.lane.b32.xlu1 %v6156_v2, %s9521_s19 }
0x1b17   :  { %v6907_v62 = vpop.xlane.xlu0 %6906  ;;  %v6700_v60 = vpop.xlane.xlu1 %6699 }
0x1b18   :  { %v6701_v21 = vadd.f32 1e-06, %v6700_v60  ;;  %v6908_v6 = vadd.f32 1e-06, %v6907_v62 }
0x1b1a   :  { %9389 = vrcp.f32 %v6701_v21 }
0x1b1b   :  { %v9384_v29 = vpop.eup %9383  ;;  %9391 = vrcp.f32 %v6908_v6 }
0x1b1c   :  { %v5949_v26 = vmul.f32 %v9384_v29, %v11115_v41 }
0x1b1d   :  { %v5462_v24 = vpop.xlane.xlu1 %5461  ;;  %v5666_v19 = vpop.xlane.xlu0 %5665 }
0x1b1e   :  { %6987 = vrot.lane.b32.xlu0 %v5949_v26, %s9521_s19  ;;  %v5463_v32 = vadd.f32 1e-06, %v5462_v24  ;;  %v5667_v12 = vadd.f32 1e-06, %v5666_v19 }
0x1b1f   :  { %v9386_v31 = vpop.eup %9385 }
0x1b20   :  { %v6363_v49 = vmul.f32 %v9386_v31, %v11117_v55  ;;  %9393 = vrcp.f32 %v5463_v32  ;;  %v9431_v31 = vld [vmem:[%s11316_s7 + $0x18] sm:$0x3] }
0x1b21   :  { %v7285_v36 = vpop.permute.xlu1 %7284  ;;  %v7281_v41 = vpop.permute.xlu0 %7280  ;;  %9395 = vrcp.f32 %v5667_v12 }
0x1b22   :  { %6995 = vrot.lane.b32.xlu1 %v6363_v49, %s9539_s30  ;;  %9128 = vmatprep.subr.mxu1 %v7285_v36 }
0x1b23   :  { %v9388_v40 = vpop.eup %9387  ;;  %9129 = vmatpush3.msra.mxu1 %v7285_v36 }
0x1b24   :  { %v6570_v34 = vmul.f32 %v9388_v40, %v11119_v52 }
0x1b25   :  { %v7283_v63 = vpop.permute.xlu1 %7282 }
0x1b26   :  { %6997 = vrot.lane.b32.xlu0 %v6570_v34, %s9539_s30  ;;  %9130 = vmatprep.subr.mxu1 %v7283_v63 }
0x1b27   :  { %9131 = vmatpush3.msra.mxu1 %v7283_v63  ;;  %v9390_v33 = vpop.eup %9389 }
0x1b28   :  { %9132 = vmatprep.subr.mxu1 %v7281_v41  ;;  %v6777_v4 = vmul.f32 %v9390_v33, %v11121_v28  ;;  %v9392_v55 = vpop.eup %9391 }
0x1b29   :  { %9133 = vmatpush3.msra.mxu1 %v7281_v41  ;;  %v6984_v52 = vmul.f32 %v9392_v55, %v11123_v53 }
0x1b2a   :  { %7278 = vrot.lane.b32.xlu0 %v9430_v35, %s9530_s23  ;;  %7003 = vrot.lane.b32.xlu1 %v6777_v4, %s9538_s29 }
0x1b2d   :  { %v9394_v1 = vpop.eup %9393 }
0x1b2e   :  { %7005 = vrot.lane.b32.xlu1 %v6984_v52, %s9538_s29  ;;  %v5538_v10 = vmul.f32 %v9394_v1, %v11107_v51  ;;  %v9396_v48 = vpop.eup %9395  ;;  %v7385_v1 = vld [vmem:[%s11317_s8 + $0x20] sm:$0xff] }
0x1b2f   :  { %v5742_v43 = vmul.f32 %v9396_v48, %v11113_v0  ;;  %v7181_v0 = vrot.slane %v10883_v46, %v10348_v58 }
0x1b88   :  { %v6990_v28 = vpop.permute.xlu1 %6989 }
0x1b89   :  { %v7010_v11 = vsel %vm266_vm2, %v5742_v43, %v6990_v28 }
0x1b90   :  { %v6988_v16 = vpop.permute.xlu0 %6987 }
0x1b91   :  { %v7009_v44 = vsel %vm266_vm2, %v5538_v10, %v6988_v16  ;;  %v7381_v10 = vld [vmem:[%s11317_s8] sm:$0xff]  ;;  %vm7719_vm2 = vcmask 1040384  }
0x1b94   :  { %v6996_v18 = vpop.permute.xlu1 %6995 }
0x1b95   :  { %v7011_v23 = vsel %vm3371_vm11, %v7009_v44, %v6996_v18  ;;  %v7383_v18 = vld [vmem:[%s11317_s8 + $0x10] sm:$0xff] }
0x1b98   :  { %v6998_v42 = vpop.permute.xlu0 %6997 }
0x1b99   :  { %v7012_v8 = vsel %vm3371_vm11, %v7010_v11, %v6998_v42 }
0x1b9c   :  { %v7279_v47 = vpop.permute.xlu0 %7278  ;;  %v7004_v53 = vpop.permute.xlu1 %7003 }
0x1b9d   :  { %9134 = vmatprep.subr.mxu1 %v7279_v47  ;;  %v7013_v15 = vsel %vm359_vm3, %v7011_v23, %v7004_v53 }
0x1b9e   :  { %9135 = vmatpush3.msra.mxu1 %v7279_v47  ;;  %v7015_v38 = vadd.f32 %v7013_v15, %v10800_v5 }
0x1ba0   :  { %9136 = vmatprep.mubr.msk.f32.mxu1 %vm109_vm0, %v7015_v38  ;;  %v7006_v51 = vpop.permute.xlu1 %7005 }
0x1ba1   :  { %v7014_v13 = vsel %vm359_vm3, %v7012_v8, %v7006_v51 }
0x1ba2   :  { %v7016_v9 = vadd.f32 %v7014_v13, %v10806_v7 }
0x1ba4   :  { %9137 = vmatmul.mubr.msk.f32.vlgmr.msra.gmra.mxu1 %vm109_vm0, %v7016_v9 }
0x1bb7   :  { %v7257_v20 = vpop.f32.mrf.mxu0 }
0x1bb8   :  { %v7258_v59 = vadd.f32 %v7257_v20, %v7181_v0 }
0x1bb9   :  { %v9121_v25 = vpop.f32.mrf.mxu0 }
0x1bba   :  { %v7271_v5 = vadd.f32 %v7258_v59, %v10899_v14  ;;  %v11174_v14 = vld [vmem:[%s11317_s8 + $0x30] sm:$0xff] }
0x1bbb   :  { %v7262_v3 = vpop.f32.mrf.mxu0  ;;  %9139 = vmatprep.subr.mxu1 %v11174_v14 }
0x1bbc   :  { %v7263_v27 = vadd.f32 %v7262_v3, %v7181_v0  ;;  %v7389_v50 = vsel %vm109_vm0, %v7271_v5, 0.0  ;;  %9140 = vmatpush3.msra.mxu1 %v11174_v14 }
0x1bbd   :  { %v9124_v2 = vpop.f32.mrf.mxu0  ;;  %7390 = vadd.xlane.f32.xlu1 %v7389_v50  ;;  %9141 = vmatprep.subr.mxu1 %v7385_v1 }
0x1bbe   :  { %v7272_v62 = vadd.f32 %v7263_v27, %v10888_v45  ;;  %9142 = vmatpush3.msra.mxu1 %v7385_v1 }
0x1bbf   :  { %v7267_v60 = vpop.f32.mrf.mxu0  ;;  %9143 = vmatprep.subr.mxu1 %v7383_v18 }
0x1bc0   :  { %v7268_v7 = vadd.f32 %v7267_v60, %v7181_v0  ;;  %v7392_v21 = vsel %vm109_vm0, %v7272_v62, 0.0  ;;  %9144 = vmatpush3.msra.mxu1 %v7383_v18 }
0x1bc1   :  { %v9127_v6 = vpop.f32.mrf.mxu0  ;;  %7393 = vadd.xlane.f32.xlu0 %v7392_v21  ;;  %9145 = vmatprep.subr.mxu1 %v7381_v10 }
0x1bc2   :  { %v7273_v46 = vadd.f32 %v7268_v7, %v10892_v56  ;;  %v7376_v56 = vrot.slane %v9431_v31, %v9657_v39  ;;  %9146 = vmatpush3.msra.mxu1 %v7381_v10  ;;  %v11234_v7 = vld [vmem:[%s11318_s9] sm:$0xff] }
0x1bc3   :  { %9167 = vmatprep.subr.mxu1 %v9523_v22  ;;  %v7431_v6 = vrot.slane %v11234_v7, %v9651_v37 }
0x1bc4   :  { %v7395_v29 = vsel %vm109_vm0, %v7273_v46, 0.0 }
0x1bc5   :  { %7396 = vadd.xlane.f32.xlu0 %v7395_v29 }
0x1c46   :  { %v7391_v26 = vpop.xlane.xlu1 %7390 }
0x1c47   :  { %v7398_v24 = vmul.f32 0.03125, %v7391_v26 }
0x1c49   :  { %v11182_v34 = vsub.f32 %v7271_v5, %v7398_v24 }
0x1c4a   :  { %v7394_v45 = vpop.xlane.xlu0 %7393 }
0x1c4b   :  { %v7404_v32 = vmul.f32 %v11182_v34, %v11182_v34  ;;  %v7399_v42 = vmul.f32 0.03125, %v7394_v45 }
0x1c4d   :  { %v7407_v12 = vsel %vm109_vm0, %v7404_v32, 0.0  ;;  %v7402_v48 = vsub.f32 %v7272_v62, %v7399_v42 }
0x1c4e   :  { %v7397_v49 = vpop.xlane.xlu0 %7396 }
0x1c4f   :  { %v7400_v63 = vmul.f32 0.03125, %v7397_v49  ;;  %v7405_v44 = vmul.f32 %v7402_v48, %v7402_v48 }
0x1c51   :  { %v11185_v35 = vsub.f32 %v7273_v46, %v7400_v63  ;;  %v7410_v47 = vsel %vm109_vm0, %v7405_v44, 0.0 }
0x1c53   :  { %v7406_v16 = vmul.f32 %v11185_v35, %v11185_v35 }
0x1c55   :  { %v7413_v28 = vsel %vm109_vm0, %v7406_v16, 0.0 }
0x1c64   :  { %v9138_v36 = vpop.f32.mrf.mxu1 }
0x1c65   :  { %v7372_v40 = vadd.f32 %v9138_v36, %v7016_v9 }
0x1c66   :  { %v7362_v19 = vpop.f32.mrf.mxu1 }
0x1c67   :  { %v7378_v41 = vadd.f32 %v7376_v56, %v7372_v40  ;;  %v7371_v33 = vadd.f32 %v7362_v19, %v7015_v38 }
0x1c69   :  { %v7377_v4 = vadd.f32 %v7376_v56, %v7371_v33  ;;  %v7445_v55 = vsel %vm109_vm0, %v7378_v41, 0.0  ;;  %v7438_v56 = vrot.slane %v11234_v7, %v9657_v39 }
0x1c6a   :  { %7446 = vadd.xlane.f32.xlu1 %v7445_v55 }
0x1c6b   :  { %v7442_v52 = vsel %vm109_vm0, %v7377_v4, 0.0 }
0x1c6c   :  { %7443 = vadd.xlane.f32.xlu0 %v7442_v52  ;;  %v7471_v52 = vrot.slane %v11234_v7, %v9671_v54 }
0x1c70   :  { %7408 = vadd.xlane.f32.xlu0 %v7407_v12 }
0x1c74   :  { %7414 = vadd.xlane.f32.xlu0 %v7413_v28 }
0x1c7b   :  { %7579 = vrot.lane.b32.xlu1 %v11174_v14, %s9525_s17 }
0x1c9f   :  { %7411 = vadd.xlane.f32.xlu1 %v7410_v47 }
0x1cb0   :  { %7575 = vrot.lane.b32.xlu1 %v7383_v18, %s9525_s17 }
0x1cf3   :  { %v7447_v23 = vpop.xlane.xlu1 %7446 }
0x1cf4   :  { %v7449_v53 = vmul.f32 0.03125, %v7447_v23  ;;  %v7568_v23 = vrot.slane %v11234_v7, %v10189_v30 }
0x1cf5   :  { %v7444_v43 = vpop.xlane.xlu0 %7443 }
0x1cf6   :  { %v11208_v15 = vsub.f32 %v7378_v41, %v7449_v53  ;;  %v7448_v38 = vmul.f32 0.03125, %v7444_v43 }
0x1cf7   :  { %v7580_v11 = vpop.permute.xlu1 %7579 }
0x1cf8   :  { %v11210_v8 = vsub.f32 %v7377_v4, %v7448_v38  ;;  %v7453_v51 = vmul.f32 %v11208_v15, %v11208_v15  ;;  %9151 = vmatpush3.msra.mxu0 %v7580_v11 }
0x1cf9   :  { %9152 = vmatprep.subr.mxu0 %v9523_v22  ;;  %v7409_v20 = vpop.xlane.xlu0 %7408 }
0x1cfa   :  { %v7457_v13 = vsel %vm109_vm0, %v7453_v51, 0.0  ;;  %v7452_v9 = vmul.f32 %v11210_v8, %v11210_v8  ;;  %v7416_v59 = vmul.f32 0.03125, %v7409_v20 }
0x1cfb   :  { %7458 = vadd.xlane.f32.xlu0 %v7457_v13 }
0x1cfc   :  { %v7454_v0 = vsel %vm109_vm0, %v7452_v9, 0.0  ;;  %v7419_v5 = vadd.f32 1e-05, %v7416_v59 }
0x1cfd   :  { %7455 = vadd.xlane.f32.xlu1 %v7454_v0  ;;  %v7415_v27 = vpop.xlane.xlu0 %7414 }
0x1cfe   :  { %9397 = vrsqrt.f32 %v7419_v5  ;;  %v7418_v50 = vmul.f32 0.03125, %v7415_v27 }
0x1d00   :  { %v7421_v62 = vadd.f32 1e-05, %v7418_v50 }
0x1d0b   :  { %v9398_v60 = vpop.eup %9397 }
0x1d0c   :  { %v7425_v46 = vmul.f32 %v9398_v60, %v11182_v34 }
0x1d0e   :  { %7573 = vrot.lane.b32.xlu1 %v7381_v10, %s9525_s17  ;;  %v7432_v49 = vmul.f32 %v7431_v6, %v7425_v46 }
0x1d10   :  { %v7439_v34 = vadd.f32 %v7438_v56, %v7432_v49 }
0x1d11   :  { %7577 = vrot.lane.b32.xlu0 %v7385_v1, %s9525_s17 }
0x1d12   :  { %7731 = vrot.lane.b32.xlu1 %v11174_v14, %s9528_s21 }
0x1d15   :  { %7729 = vrot.lane.b32.xlu0 %v7385_v1, %s9528_s21 }
0x1d16   :  { %7727 = vrot.lane.b32.xlu1 %v7383_v18, %s9528_s21 }
0x1d19   :  { %7725 = vrot.lane.b32.xlu0 %v7381_v10, %s9528_s21 }
0x1d1a   :  { %7820 = vrot.lane.b32.xlu1 %v7381_v10, %s9530_s23 }
0x1d1d   :  { %7822 = vrot.lane.b32.xlu0 %v7383_v18, %s9530_s23 }
0x1d1e   :  { %7824 = vrot.lane.b32.xlu1 %v7385_v1, %s9530_s23  ;;  %v7477_v1 = vrot.slane %v11234_v7, %v10058_v61 }
0x1d21   :  { %7826 = vrot.lane.b32.xlu0 %v11174_v14, %s9530_s23 }
0x1d28   :  { %v7412_v25 = vpop.xlane.xlu1 %7411 }
0x1d29   :  { %v7417_v3 = vmul.f32 0.03125, %v7412_v25 }
0x1d2b   :  { %v7420_v2 = vadd.f32 1e-05, %v7417_v3 }
0x1d2c   :  { %v7576_v21 = vpop.permute.xlu1 %7575 }
0x1d2d   :  { %9399 = vrsqrt.f32 %v7420_v2  ;;  %v7483_v2 = vrot.slane %v11234_v7, %v10176_v17 }
0x1d2e   :  { %9401 = vrsqrt.f32 %v7421_v62 }
0x1d3a   :  { %v9400_v14 = vpop.eup %9399 }
0x1d3b   :  { %v7426_v36 = vmul.f32 %v9400_v14, %v7402_v48  ;;  %v9402_v19 = vpop.eup %9401 }
0x1d3c   :  { %v7427_v41 = vmul.f32 %v9402_v19, %v11185_v35 }
0x1d3d   :  { %v7433_v33 = vmul.f32 %v7431_v6, %v7426_v36 }
0x1d3e   :  { %v7434_v4 = vmul.f32 %v7431_v6, %v7427_v41 }
0x1d3f   :  { %v7440_v39 = vadd.f32 %v7438_v56, %v7433_v33 }
0x1d40   :  { %v7441_v55 = vadd.f32 %v7438_v56, %v7434_v4 }
0x1d84   :  { %v7459_v29 = vpop.xlane.xlu0 %7458 }
0x1d85   :  { %v7461_v45 = vmul.f32 0.03125, %v7459_v29 }
0x1d86   :  { %v7456_v26 = vpop.xlane.xlu1 %7455 }
0x1d87   :  { %v7463_v24 = vadd.f32 1e-05, %v7461_v45  ;;  %v7460_v31 = vmul.f32 0.03125, %v7456_v26 }
0x1d88   :  { %v7578_v40 = vpop.permute.xlu0 %7577 }
0x1d89   :  { %9403 = vrsqrt.f32 %v7463_v24  ;;  %v7462_v63 = vadd.f32 1e-05, %v7460_v31  ;;  %9153 = vmatpush3.msra.mxu0 %v7578_v40 }
0x1d8a   :  { %9154 = vmatprep.subr.mxu0 %v9523_v22  ;;  %v7574_v37 = vpop.permute.xlu1 %7573 }
0x1d8b   :  { %9405 = vrsqrt.f32 %v7462_v63  ;;  %9155 = vmatpush3.msra.mxu0 %v7576_v21 }
0x1d8c   :  { %9156 = vmatprep.subr.mxu0 %v9523_v22  ;;  %v7730_v48 = vpop.permute.xlu0 %7729 }
0x1d8d   :  { %9157 = vmatpush3.msra.mxu0 %v7574_v37 }
0x1d8e   :  { %9159 = vmatmul.mubr.msk.f32.vlgmr.msra.gmra.mxu0 %vm109_vm0, %v7439_v34  ;;  %9178 = vmatprep.subr.mxu0 %v9523_v22  ;;  %v7732_v54 = vpop.permute.xlu1 %7731 }
0x1d8f   :  { %9161 = vmatprep.mubr.msk.f32.mxu0 %vm9524_vm1, %v9523_v22 }
0x1d90   :  { %v7726_v61 = vpop.permute.xlu0 %7725 }
0x1d92   :  { %9162 = vmatmul.mubr.msk.f32.gmra.mxu0 %vm109_vm0, %v7440_v39  ;;  %v7728_v44 = vpop.permute.xlu1 %7727 }
0x1d93   :  { %9164 = vmatprep.mubr.msk.f32.mxu0 %vm9524_vm1, %v9523_v22 }
0x1d96   :  { %v9404_v35 = vpop.eup %9403  ;;  %9165 = vmatmul.mubr.msk.f32.gmra.mxu0 %vm109_vm0, %v7441_v55 }
0x1d97   :  { %v7467_v32 = vmul.f32 %v9404_v35, %v11208_v15  ;;  %9186 = vmatprep.mubr.msk.f32.mxu0 %vm9524_vm1, %v9523_v22 }
0x1d98   :  { %v9406_v12 = vpop.eup %9405 }
0x1d99   :  { %v7466_v16 = vmul.f32 %v9406_v12, %v11210_v8  ;;  %v7473_v28 = vmul.f32 %v7471_v52, %v7467_v32 }
0x1d9b   :  { %v7472_v42 = vmul.f32 %v7471_v52, %v7466_v16  ;;  %v7479_v10 = vadd.f32 %v7477_v1, %v7473_v28 }
0x1d9d   :  { %v7478_v18 = vadd.f32 %v7477_v1, %v7472_v42 }
0x1d9f   :  { %9147 = vmatprep.mubr.msk.f32.mxu1 %vm109_vm0, %v7478_v18 }
0x1da0   :  { %9148 = vmatmul.mubr.msk.f32.vlgmr.msra.gmra.mxu1 %vm109_vm0, %v7479_v10  ;;  %v7823_v10 = vpop.permute.xlu0 %7822 }
0x1da1   :  { %9175 = vmatprep.mubr.msk.f32.mxu1 %vm9524_vm1, %v9523_v22  ;;  %9168 = vmatpush3.msra.mxu1 %v7732_v54  ;;  %v7821_v54 = vpop.permute.xlu1 %7820 }
0x1da2   :  { %9169 = vmatprep.subr.mxu1 %v9523_v22 }
0x1da3   :  { %9170 = vmatpush3.msra.mxu1 %v7730_v48 }
0x1da4   :  { %9171 = vmatprep.subr.mxu1 %v9523_v22  ;;  %v7827_v48 = vpop.permute.xlu0 %7826 }
0x1da5   :  { %9172 = vmatpush3.msra.mxu1 %v7728_v44  ;;  %9179 = vmatpush3.msra.mxu0 %v7827_v48  ;;  %v7825_v44 = vpop.permute.xlu1 %7824 }
0x1da6   :  { %9173 = vmatprep.subr.mxu1 %v9523_v22  ;;  %9180 = vmatprep.subr.mxu0 %v9523_v22 }
0x1da7   :  { %9174 = vmatpush3.msra.mxu1 %v7726_v61  ;;  %9181 = vmatpush3.msra.mxu0 %v7825_v44  ;;  %v7724_v61 = vrot.slane %v11234_v7, %v10290_v57  ;;  %v7386_v57 = vld [vmem:[%s11317_s8 + $0x28] sm:$0xff] }
0x1da8   :  { %9189 = vmatprep.subr.mxu1 %v9523_v22  ;;  %9182 = vmatprep.subr.mxu0 %v9523_v22 }
0x1da9   :  { %9183 = vmatpush3.msra.mxu0 %v7823_v10 }
0x1daa   :  { %9184 = vmatprep.subr.mxu0 %v9523_v22 }
0x1dab   :  { %9185 = vmatpush3.msra.mxu0 %v7821_v54 }
0x1e4e   :  { %v7660_v47 = vpop.f32.mrf.mxu0 }
0x1e4f   :  { %v7661_v15 = vadd.f32 %v7660_v47, %v7568_v23 }
0x1e50   :  { %v9160_v53 = vpop.f32.mrf.mxu0 }
0x1e51   :  { %v7681_v13 = vsel %vm109_vm0, %v7661_v15, 0.0 }
0x1e52   :  { %v7665_v43 = vpop.f32.mrf.mxu0 }
0x1e53   :  { %v7666_v38 = vadd.f32 %v7665_v43, %v7568_v23 }
0x1e54   :  { %v9163_v11 = vpop.f32.mrf.mxu0 }
0x1e55   :  { %v7683_v8 = vsel %vm7682_vm14, %v7666_v38, 0.0  ;;  %v7703_v59 = vrot.slane %v7666_v38, 4 }
0x1e56   :  { %v7670_v51 = vpop.f32.mrf.mxu0  ;;  %v7684_v0 = vadd.f32 %v7683_v8, %v7681_v13  ;;  %v7388_v13 = vld [vmem:[%s11317_s8 + $0x38] sm:$0xff] }
0x1e57   :  { %v7671_v9 = vadd.f32 %v7670_v51, %v7568_v23 }
0x1e58   :  { %v9166_v20 = vpop.f32.mrf.mxu0  ;;  %v7685_v27 = vrot.slane %v7684_v0, 4 }
0x1e59   :  { %v7704_v25 = vrot.slane %v7671_v9, 4  ;;  %v7384_v9 = vld [vmem:[%s11317_s8 + $0x18] sm:$0xff]  ;;  %v7819_v20 = vrot.slane %v11234_v7, %v10348_v58 }
0x1e5a   :  { %v7686_v60 = vadd.f32 %v7685_v27, %v7684_v0  ;;  %v7382_v0 = vld [vmem:[%s11317_s8 + $0x8] sm:$0xff] }
0x1e5b   :  { %v7705_v5 = vsel %vm7702_vm15, %v7703_v59, %v7704_v25  ;;  %v7709_v3 = vsel %vm7682_vm14, %v7704_v25, 0.0 }
0x1e5c   :  { %v7708_v30 = vsel %vm109_vm0, %v7705_v5, 0.0  ;;  %v7687_v24 = vrot.slane %v7686_v60, 2 }
0x1e5d   :  { %v7710_v50 = vadd.f32 %v7709_v3, %v7708_v30 }
0x1e5e   :  { %v7688_v19 = vadd.f32 %v7687_v24, %v7686_v60 }
0x1e5f   :  { %v7711_v62 = vrot.slane %v7710_v50, 4 }
0x1e60   :  { %v9149_v21 = vpop.f32.mrf.mxu1  ;;  %v7689_v33 = vrot.slane %v7688_v19, 1 }
0x1e61   :  { %v7712_v6 = vadd.f32 %v7711_v62, %v7710_v50  ;;  %v7562_v46 = vadd.f32 %v9149_v21, %v7483_v2 }
0x1e62   :  { %v7556_v29 = vpop.f32.mrf.mxu1  ;;  %v7690_v32 = vadd.f32 %v7689_v33, %v7688_v19 }
0x1e63   :  { %v7713_v14 = vrot.slane %v7712_v6, 2  ;;  %v7693_v45 = vsel %vm109_vm0, %v7562_v46, 0.0  ;;  %v7557_v26 = vadd.f32 %v7556_v29, %v7483_v2 }
0x1e64   :  { %v7694_v31 = vrot.slane %v7693_v45, 4 }
0x1e65   :  { %v7674_v56 = vsel %vm109_vm0, %v7557_v26, 0.0  ;;  %v7714_v49 = vadd.f32 %v7713_v14, %v7712_v6 }
0x1e66   :  { %v7695_v36 = vadd.f32 %v7694_v31, %v7693_v45  ;;  %v7675_v40 = vrot.slane %v7674_v56, 4 }
0x1e67   :  { %v7715_v37 = vrot.slane %v7714_v49, 1 }
0x1e68   :  { %v7696_v63 = vrot.slane %v7695_v36, 2  ;;  %v7676_v17 = vadd.f32 %v7675_v40, %v7674_v56 }
0x1e69   :  { %v7716_v55 = vadd.f32 %v7715_v37, %v7714_v49 }
0x1e6a   :  { %v7697_v34 = vadd.f32 %v7696_v63, %v7695_v36  ;;  %v7677_v41 = vrot.slane %v7676_v17, 2 }
0x1e6c   :  { %v7698_v39 = vrot.slane %v7697_v34, 1  ;;  %v7678_v4 = vadd.f32 %v7677_v41, %v7676_v17 }
0x1e6e   :  { %v7699_v35 = vadd.f32 %v7698_v39, %v7697_v34  ;;  %v7679_v52 = vrot.slane %v7678_v4, 1 }
0x1e70   :  { %v7717_v12 = vadd.f32 %v7716_v55, %v7699_v35  ;;  %v7680_v16 = vadd.f32 %v7679_v52, %v7678_v4 }
0x1e72   :  { %v7691_v28 = vadd.f32 %v7690_v32, %v7680_v16  ;;  %v7718_v1 = vmul.f32 0.05, %v7717_v12 }
0x1e74   :  { %v7692_v42 = vmul.f32 0.05, %v7691_v28 }
0x1e76   :  { %v7720_v18 = vsel %vm7719_vm2, %v7692_v42, %v7718_v1 }
0x1e77   :  { %9176 = vmatmul.mubr.msk.f32.vlgmr.msra.gmra.mxu1 %vm109_vm0, %v7720_v18 }
0x1e78   :  { %9197 = vmatprep.mubr.msk.f32.mxu1 %vm9524_vm1, %v9523_v22  ;;  %9190 = vmatpush3.msra.mxu1 %v7388_v13 }
0x1e79   :  { %9191 = vmatprep.subr.mxu1 %v9523_v22 }
0x1e7a   :  { %9192 = vmatpush3.msra.mxu1 %v7386_v57 }
0x1e7b   :  { %9193 = vmatprep.subr.mxu1 %v9523_v22 }
0x1e7c   :  { %9194 = vmatpush3.msra.mxu1 %v7384_v9 }
0x1e7d   :  { %9195 = vmatprep.subr.mxu1 %v9523_v22  ;;  %v8193_v22 = vld [vmem:[%s11318_s9 + $0x8] ss:$0 sm:$0xff] }
0x1e7e   :  { %9196 = vmatpush3.msra.mxu1 %v7382_v0 }
0x1f37   :  { %v7806_v47 = vpop.f32.mrf.mxu1 }
0x1f38   :  { %v7807_v23 = vadd.f32 %v7806_v47, %v7724_v61 }
0x1f39   :  { %v9177_v53 = vpop.f32.mrf.mxu1 }
0x1f3a   :  { %v7811_v43 = vmul.f32 0.70710677, %v7807_v23  ;;  %v7810_v38 = vmul.f32 0.5, %v7807_v23 }
0x1f3c   :  { %9407 = verf.f32 %v7811_v43 }
0x1f49   :  { %v9408_v15 = vpop.eup %9407 }
0x1f4a   :  { %v7813_v11 = vadd.f32 1.0, %v9408_v15 }
0x1f4c   :  { %v7814_v8 = vmul.f32 %v7813_v11, %v7810_v38 }
0x1f4e   :  { %v7815_v51 = vadd.f32 %v7814_v8, %v7720_v18 }
0x1f50   :  { %9187 = vmatmul.mubr.msk.f32.vlgmr.msra.gmra.mxu0 %vm109_vm0, %v7815_v51 }
0x2010   :  { %v7901_v59 = vpop.f32.mrf.mxu0 }
0x2011   :  { %v7902_v25 = vadd.f32 %v7901_v59, %v7819_v20 }
0x2012   :  { %v9188_v5 = vpop.f32.mrf.mxu0 }
0x2013   :  { %v7906_v3 = vmul.f32 0.70710677, %v7902_v25  ;;  %v7905_v30 = vmul.f32 0.5, %v7902_v25 }
0x2015   :  { %9409 = verf.f32 %v7906_v3 }
0x2022   :  { %v9410_v27 = vpop.eup %9409 }
0x2023   :  { %v7908_v50 = vadd.f32 1.0, %v9410_v27 }
0x2025   :  { %v7909_v2 = vmul.f32 %v7908_v50, %v7905_v30 }
0x2027   :  { %v7910_v62 = vadd.f32 %v7909_v2, %v7815_v51 }
0x2029   :  { %9198 = vmatmul.mubr.msk.f32.vlgmr.msra.gmra.mxu1 %vm109_vm0, %v7910_v62 }
0x20e9   :  { %v7984_v60 = vpop.f32.mrf.mxu1 }
0x20ea   :  { %v7985_v21 = vadd.f32 %v8193_v22, %v7984_v60 }
0x20eb   :  { %v9199_v6 = vpop.f32.mrf.mxu1 }
0x20ec   :  { %v7988_v58 = vsub.f32 0.0, %v7985_v21 }
0x20ee   :  { %v7989_v7 = vmul.f32 1.442695, %v7988_v58 }
0x20f0   :  { %9411 = vpow2.f32 %v7989_v7 }
0x20fd   :  { %v9412_v46 = vpop.eup %9411 }
0x20fe   :  { %v7991_v29 = vadd.f32 1.0, %v9412_v46 }
0x2100   :  { %9413 = vrcp.f32 %v7991_v29 }
0x210d   :  { %v9414_v14 = vpop.eup %9413 }
0x210e   :  { %7993 = vst [vmem:[#allocation8] sm:$0x3] %v9414_v14 }
0x210f   :  { %9503 = shalt.err (!%p9500_p5)
}
0x2110   :  { %8003 = dma.vmem_to_hbm [thread:$0]  %s8001_s26, 32, %s11319_s10, [#allocation4]  }
0x2111   :  { %9516 = dma.done.wait [#allocation4], 32  }
0x2112   :  { %9517 = vsyncadd [#allocation4], 4294967264 }
0x2113   :  { %8007 = vsyncpa [#allocation3], 1 }
0x2114   :  { %8008 = vsyncpa [#allocation6], 1 }
0x2115   :  { %8009 = vsyncpa [#allocation4], 1 }

</bundles_post_ra>
